<compile_context>
chip_gen: v6e
topology: v6e:2x2x1
jax: 0.10.0
libtpu: 0.0.40
codegen_flags: <defaults>
</compile_context>

<pallas_src>
import numpy as np
import jax
import jax.numpy as jnp
from jax.experimental import pallas as pl
from jax.experimental.pallas import tpu as pltpu

EPS = 1e-5
# Set to jnp.bfloat16 on v6e/v7x for ~2x MXU throughput; accumulation and BN stats stay f32.
MM_DTYPE = jnp.float32


def _mm(a, b):
    return jnp.dot(a.astype(MM_DTYPE), b.astype(MM_DTYPE),
                   preferred_element_type=jnp.float32)


def _round_up(x, m):
    return ((x + m - 1) // m) * m


def deconv_forward(params, x1, x2):
    """x1: (N, Ci, H1, W1), x2: (N, Ci-Co, H, W).  Returns (N, Co, H, W) float32."""
    N, Ci, H1, W1 = x1.shape
    _, C2, H, W = x2.shape
    Co = params["up_w"].shape[1]
    Cc = C2 + Co                       # conv1 input channels (== Ci in the UNet block)
    Q = H1 * W1

    # Faithful to the torch module: diffX is the *H* difference, diffY the *W* difference,
    # and F.pad(x1, (diffX, 0, diffY, 0)) left-pads W by diffX and top-pads H by diffY.
    pad_left = H - 2 * H1              # left pad of the W axis
    pad_top = W - 2 * W1               # top pad of the H axis
    assert pad_left >= 0 and pad_top >= 0
    assert 2 * H1 + pad_top == H and 2 * W1 + pad_left == W, \
        "shapes must be concat-compatible (same requirement as the torch module)"

    # Internal padded planar layout: (C, Hp * Wcols) with a 128-aligned row pitch.
    Hp = H + 2
    Wcols = max(128, _round_up(W + 2, 128))
    HWc = Hp * Wcols
    G = Wcols + 128                    # guard band (multiple of 128, > Wcols + 1)
    inv_cnt = 1.0 / float(N * H * W)
    row_lo = 1 + pad_top               # first padded-grid row written by the deconv
    row_hi = 1 + pad_top + 2 * H1      # one past the last written row (== Hp - 1)

    tap_offs = [(t // 3 - 1) * Wcols + (t % 3 - 1) for t in range(9)]

    # ---- trace-time constants -------------------------------------------------------------
    # Column placement matrices: E[kx][x, 1 + pad_left + 2*x + kx] = 1 (zero elsewhere), so a
    # (Co, W1) x (W1, Wcols) GEMM yields a full padded row including the zero pad-ring columns.
    e_np = np.zeros((2, W1, Wcols), np.float32)
    for kx in range(2):
        e_np[kx, np.arange(W1), 1 + pad_left + 2 * np.arange(W1) + kx] = 1.0
    ecat = jnp.asarray(e_np.reshape(2 * W1, Wcols))

    colmask_np = np.zeros((1, Wcols), np.float32)
    colmask_np[0, 1 + pad_left:1 + pad_left + 2 * W1] = 1.0   # where the deconv output exists
    bupgrid = params["up_b"].reshape(Co, 1) * jnp.asarray(colmask_np)   # (Co, Wcols)

    imask_np = np.zeros((Hp, Wcols), np.float32)
    imask_np[1:H + 1, 1:W + 1] = 1.0                          # valid (interior) output pixels
    imask = jnp.asarray(imask_np.reshape(1, HWc))

    # ---- tiny weight re-layouts -------------------------------------------------------------
    # ConvTranspose2d weight (Ci, Co, 2, 2) -> (4*Co, Ci) with rows ordered (k = ky*2+kx, o).
    wup = jnp.transpose(params["up_w"], (2, 3, 1, 0)).reshape(4 * Co, Ci)
    w1cat = jnp.transpose(params["c1_w"], (0, 2, 3, 1)).reshape(Co, 9 * Cc)   # [o, t*Cc + c]
    b1 = params["c1_b"].reshape(Co, 1)
    g1, be1 = params["c1_g"].reshape(Co, 1), params["c1_be"].reshape(Co, 1)
    w2cat = jnp.transpose(params["c2_w"], (0, 2, 3, 1)).reshape(Co, 9 * Co)
    b2 = params["c2_b"].reshape(Co, 1)
    g2, be2 = params["c2_g"].reshape(Co, 1), params["c2_be"].reshape(Co, 1)

    # ---- cheap XLA input re-layouts (fuse / run at HBM roofline) ------------------------------
    x1r = x1.reshape(N, Ci, Q)                                 # metadata-only (NCHW row-major)
    x2p = jnp.pad(x2, ((0, 0), (0, 0), (1, Hp - 1 - H), (1, Wcols - 1 - W)))
    x2p = x2p.reshape(N, C2, HWc)                              # pre-padded skip connection

    def conv3x3(xc_ref, w_ref, cin):
        """3x3 conv over the guard-banded flat scratch -> (Co, HWc) f32 (pre-bias)."""
        views = [xc_ref[:, G + off:G + off + HWc] for off in tap_offs]
        if 9 * cin <= 256:                         # small K: one fused K = 9*cin GEMM
            return _mm(w_ref[...], jnp.concatenate(views, axis=0))
        acc = _mm(w_ref[:, 0:cin], views[0])       # large K: 9 accumulating passes, no 9x buffer
        for t in range(1, 9):
            acc = acc + _mm(w_ref[:, t * cin:(t + 1) * cin], views[t])
        return acc

    # --------------------------------------------------------------------------------------
    # Kernel A: ConvTranspose(2,2,s=2) + F.pad + concat + conv1(3x3)+bias, per-image BN stats.
    # --------------------------------------------------------------------------------------
    def kernel_a(x1_ref, x2p_ref, wup_ref, e_ref, bupg_ref, imask_ref, w1_ref, b1_ref,
                 y_ref, st_ref, xc_ref):
        # Guard bands + never-written pad rows of the upsample channels: cheap, idempotent
        # zero fills (no program_id gate, so megacore batch splitting stays correct).
        xc_ref[:, 0:G] = jnp.zeros((Cc, G), jnp.float32)
        xc_ref[:, G + HWc:2 * G + HWc] = jnp.zeros((Cc, G), jnp.float32)
        xc_ref[C2:Cc, G:G + row_lo * Wcols] = jnp.zeros((Co, row_lo * Wcols), jnp.float32)
        xc_ref[C2:Cc, G + row_hi * Wcols:G + HWc] = (
            jnp.zeros((Co, (Hp - row_hi) * Wcols), jnp.float32))

        # Skip connection: one lane-dense store of the pre-padded x2 plane.
        xc_ref[0:C2, G:G + HWc] = x2p_ref[0]

        # ConvTranspose2d(2,2,stride=2): one channel-mixing GEMM; then, per output row, a tiny
        # (Co, W1) x (W1, Wcols) placement GEMM interleaves the two column parities and bakes in
        # the F.pad column offset; every store is full-width and 128-aligned.
        U = _mm(wup_ref[...], x1_ref[0])                        # (4*Co, Q)
        e0 = e_ref[0:W1, :]
        e1 = e_ref[W1:2 * W1, :]
        bg = bupg_ref[...]                                      # bias where deconv writes, else 0
        for ky in range(2):
            u_e = U[(2 * ky) * Co:(2 * ky + 1) * Co, :]         # kx = 0 parity (Co, Q)
            u_o = U[(2 * ky + 1) * Co:(2 * ky + 2) * Co, :]     # kx = 1 parity (Co, Q)
            for y in range(H1):
                row = (_mm(u_e[:, y * W1:(y + 1) * W1], e0)
                       + _mm(u_o[:, y * W1:(y + 1) * W1], e1) + bg)     # (Co, Wcols)
                r = row_lo + 2 * y + ky
                xc_ref[C2:Cc, G + r * Wcols:G + (r + 1) * Wcols] = row

        # conv1 (3x3, padding=1) + bias; per-image BN stats over the valid interior pixels.
        yv = conv3x3(xc_ref, w1_ref, Cc) + b1_ref[...]
        y_ref[0] = yv                                           # lane-dense (HWc % 128 == 0)
        ym = yv * imask_ref[...]
        st_ref[0] = jnp.concatenate([jnp.sum(ym, axis=1, keepdims=True),
                                     jnp.sum(ym * ym, axis=1, keepdims=True)], axis=1)

    y1_pad, st1 = pl.pallas_call(
        kernel_a,
        out_shape=(jax.ShapeDtypeStruct((N, Co, HWc), jnp.float32),
                   jax.ShapeDtypeStruct((N, Co, 2), jnp.float32)),
        grid_spec=pltpu.PrefetchScalarGridSpec(
            num_scalar_prefetch=0, grid=(N,),
            in_specs=[
                pl.BlockSpec((1, Ci, Q), lambda n: (n, 0, 0)),
                pl.BlockSpec((1, C2, HWc), lambda n: (n, 0, 0)),
                pl.BlockSpec((4 * Co, Ci), lambda n: (0, 0)),
                pl.BlockSpec((2 * W1, Wcols), lambda n: (0, 0)),
                pl.BlockSpec((Co, Wcols), lambda n: (0, 0)),
                pl.BlockSpec((1, HWc), lambda n: (0, 0)),
                pl.BlockSpec((Co, 9 * Cc), lambda n: (0, 0)),
                pl.BlockSpec((Co, 1), lambda n: (0, 0)),
            ],
            out_specs=(pl.BlockSpec((1, Co, HWc), lambda n: (n, 0, 0)),
                       pl.BlockSpec((1, Co, 2), lambda n: (n, 0, 0))),
            scratch_shapes=[pltpu.VMEM((Cc, 2 * G + HWc), jnp.float32)],
        ),
        compiler_params=pltpu.CompilerParams(dimension_semantics=("parallel",)),
    )(x1r, x2p, wup, ecat, bupgrid, imask, w1cat, b1)

    # BN affine (training-mode batch statistics) from the per-image sums: tiny XLA reduce.
    def bn_affine(st, gamma, beta):
        tot = jnp.sum(st, axis=0)                       # (Co, 2)
        mean = tot[:, 0:1] * inv_cnt
        var = tot[:, 1:2] * inv_cnt - mean * mean       # biased batch variance (torch training)
        scale = gamma * jax.lax.rsqrt(var + EPS)
        return scale, beta - mean * scale

    scale1, shift1 = bn_affine(st1, g1, be1)

    # --------------------------------------------------------------------------------------
    # Kernel B: BN1+ReLU applied on read, conv2(3x3)+bias, per-image BN stats.
    # --------------------------------------------------------------------------------------
    def kernel_b(y1_ref, sc_ref, sh_ref, imask_ref, w2_ref, b2_ref, y_ref, st_ref, xc_ref):
        xc_ref[:, 0:G] = jnp.zeros((Co, G), jnp.float32)
        xc_ref[:, G + HWc:2 * G + HWc] = jnp.zeros((Co, G), jnp.float32)
        # BN1 (precomputed batch affine) + ReLU; imask re-zeros the pad ring / slop lanes.
        xin = jnp.maximum(y1_ref[0] * sc_ref[...] + sh_ref[...], 0.0) * imask_ref[...]
        xc_ref[:, G:G + HWc] = xin                               # single lane-dense store

        yv = conv3x3(xc_ref, w2_ref, Co) + b2_ref[...]
        y_ref[0] = yv
        ym = yv * imask_ref[...]
        st_ref[0] = jnp.concatenate([jnp.sum(ym, axis=1, keepdims=True),
                                     jnp.sum(ym * ym, axis=1, keepdims=True)], axis=1)

    y2_pad, st2 = pl.pallas_call(
        kernel_b,
        out_shape=(jax.ShapeDtypeStruct((N, Co, HWc), jnp.float32),
                   jax.ShapeDtypeStruct((N, Co, 2), jnp.float32)),
        grid_spec=pltpu.PrefetchScalarGridSpec(
            num_scalar_prefetch=0, grid=(N,),
            in_specs=[
                pl.BlockSpec((1, Co, HWc), lambda n: (n, 0, 0)),
                pl.BlockSpec((Co, 1), lambda n: (0, 0)),
                pl.BlockSpec((Co, 1), lambda n: (0, 0)),
                pl.BlockSpec((1, HWc), lambda n: (0, 0)),
                pl.BlockSpec((Co, 9 * Co), lambda n: (0, 0)),
                pl.BlockSpec((Co, 1), lambda n: (0, 0)),
            ],
            out_specs=(pl.BlockSpec((1, Co, HWc), lambda n: (n, 0, 0)),
                       pl.BlockSpec((1, Co, 2), lambda n: (n, 0, 0))),
            scratch_shapes=[pltpu.VMEM((Co, 2 * G + HWc), jnp.float32)],
        ),
        compiler_params=pltpu.CompilerParams(dimension_semantics=("parallel",)),
    )(y1_pad, scale1, shift1, imask, w2cat, b2)

    # BN2 + ReLU + crop: fused XLA elementwise epilogue (pure mem-bound; no extra pallas_call).
    scale2, shift2 = bn_affine(st2, g2, be2)
    y2 = y2_pad.reshape(N, Co, Hp, Wcols)[:, :, 1:H + 1, 1:W + 1]
    return jnp.maximum(y2 * scale2.reshape(1, Co, 1, 1) + shift2.reshape(1, Co, 1, 1), 0.0)


if __name__ == "__main__":
    key = jax.random.PRNGKey(0)
    ci, co = 8, 4
    N, H1, W1 = 2, 8, 8  # x1 spatial; x2 spatial is 2x

    ks = jax.random.split(key, 12)
    params = {
        # ConvTranspose2d(ci, co, 2, stride=2): weight (ci, co, 2, 2), bias (co,)
        "up_w": 0.1 * jax.random.normal(ks[0], (ci, co, 2, 2), jnp.float32),
        "up_b": 0.1 * jax.random.normal(ks[1], (co,), jnp.float32),
        # conv1: Conv2d(ci, co, 3, padding=1) + BN(co)
        "c1_w": 0.1 * jax.random.normal(ks[2], (co, ci, 3, 3), jnp.float32),
        "c1_b": 0.1 * jax.random.normal(ks[3], (co,), jnp.float32),
        "c1_g": 1.0 + 0.05 * jax.random.normal(ks[4], (co,), jnp.float32),
        "c1_be": 0.05 * jax.random.normal(ks[5], (co,), jnp.float32),
        # conv2: Conv2d(co, co, 3, padding=1) + BN(co)
        "c2_w": 0.1 * jax.random.normal(ks[6], (co, co, 3, 3), jnp.float32),
        "c2_b": 0.1 * jax.random.normal(ks[7], (co,), jnp.float32),
        "c2_g": 1.0 + 0.05 * jax.random.normal(ks[8], (co,), jnp.float32),
        "c2_be": 0.05 * jax.random.normal(ks[9], (co,), jnp.float32),
    }

    # x1: (N, ci, H1, W1); x2: (N, ci - co, 2*H1, 2*W1)  -> concat has ci channels
    x1 = jax.random.normal(ks[10], (N, ci, H1, W1), jnp.float32)
    x2 = jax.random.normal(ks[11], (N, ci - co, 2 * H1, 2 * W1), jnp.float32)

    out = jax.jit(deconv_forward)(params, x1, x2)
    out = jax.block_until_ready(out)

    assert out.shape == (N, co, 2 * H1, 2 * W1), out.shape
    assert bool(jnp.all(jnp.isfinite(out)))
    print("KERNEL_OK")
</pallas_src>

<mosaic_0001>
module attributes {stable_mosaic.version = 11 : i64} {
  func.func @kernel_a(%arg0: i32, %arg1: memref<1x8x64xf32, #tpu.memory_space<vmem>>, %arg2: memref<1x4x2304xf32, #tpu.memory_space<vmem>>, %arg3: memref<16x8xf32, #tpu.memory_space<vmem>>, %arg4: memref<16x128xf32, #tpu.memory_space<vmem>>, %arg5: memref<4x128xf32, #tpu.memory_space<vmem>>, %arg6: memref<1x2304xf32, #tpu.memory_space<vmem>>, %arg7: memref<4x72xf32, #tpu.memory_space<vmem>>, %arg8: memref<4x1xf32, #tpu.memory_space<vmem>>, %arg9: memref<1x4x2304xf32, #tpu.memory_space<vmem>>, %arg10: memref<1x4x2xf32, #tpu.memory_space<vmem>>, %arg11: memref<8x2816xf32, #tpu.memory_space<vmem>>) attributes {dimension_semantics = [#tpu.dimension_semantics<parallel>], iteration_bounds = array<i64: 2>, scalar_prefetch = 0 : i64, scratch_operands = 1 : i64, tpu.core_type = #tpu.core_type<tc>, window_params = [{transform_indices = @transform_0, window_bounds = array<i64: 1, 8, 64>}, {transform_indices = @transform_1, window_bounds = array<i64: 1, 4, 2304>}, {pipeline_mode = #tpu.pipeline_mode<synchronous>, transform_indices = @transform_2, window_bounds = array<i64: 16, 8>}, {pipeline_mode = #tpu.pipeline_mode<synchronous>, transform_indices = @transform_3, window_bounds = array<i64: 16, 128>}, {pipeline_mode = #tpu.pipeline_mode<synchronous>, transform_indices = @transform_4, window_bounds = array<i64: 4, 128>}, {pipeline_mode = #tpu.pipeline_mode<synchronous>, transform_indices = @transform_5, window_bounds = array<i64: 1, 2304>}, {pipeline_mode = #tpu.pipeline_mode<synchronous>, transform_indices = @transform_6, window_bounds = array<i64: 4, 72>}, {pipeline_mode = #tpu.pipeline_mode<synchronous>, transform_indices = @transform_7, window_bounds = array<i64: 4, 1>}, {transform_indices = @transform_8, window_bounds = array<i64: 1, 4, 2304>}, {transform_indices = @transform_9, window_bounds = array<i64: 1, 4, 2>}]} {
    %cst = arith.constant 0.000000e+00 : f32
    %0 = vector.broadcast %cst : f32 to vector<8x256xf32>
    %c0 = arith.constant 0 : index
    %c0_0 = arith.constant 0 : index
    %1 = vector.load %arg11[%c0, %c0_0] : memref<8x2816xf32, #tpu.memory_space<vmem>>, vector<8x256xf32>
    tpu.vector_store %arg11[%c0, %c0_0], %0 {strides = array<i32>} : memref<8x2816xf32, #tpu.memory_space<vmem>>, vector<8x256xf32>,
    %cst_1 = arith.constant 0.000000e+00 : f32
    %2 = vector.broadcast %cst_1 : f32 to vector<8x256xf32>
    %c0_2 = arith.constant 0 : index
    %c2560 = arith.constant 2560 : index
    %3 = vector.load %arg11[%c0_2, %c2560] : memref<8x2816xf32, #tpu.memory_space<vmem>>, vector<8x256xf32>
    tpu.vector_store %arg11[%c0_2, %c2560], %2 {strides = array<i32>} : memref<8x2816xf32, #tpu.memory_space<vmem>>, vector<8x256xf32>,
    %cst_3 = arith.constant 0.000000e+00 : f32
    %4 = vector.broadcast %cst_3 : f32 to vector<4x128xf32>
    %c4 = arith.constant 4 : index
    %c256 = arith.constant 256 : index
    %5 = vector.load %arg11[%c4, %c256] : memref<8x2816xf32, #tpu.memory_space<vmem>>, vector<4x128xf32>
    tpu.vector_store %arg11[%c4, %c256], %4 {strides = array<i32>} : memref<8x2816xf32, #tpu.memory_space<vmem>>, vector<4x128xf32>,
    %cst_4 = arith.constant 0.000000e+00 : f32
    %6 = vector.broadcast %cst_4 : f32 to vector<4x128xf32>
    %c4_5 = arith.constant 4 : index
    %c2432 = arith.constant 2432 : index
    %7 = vector.load %arg11[%c4_5, %c2432] : memref<8x2816xf32, #tpu.memory_space<vmem>>, vector<4x128xf32>
    tpu.vector_store %arg11[%c4_5, %c2432], %6 {strides = array<i32>} : memref<8x2816xf32, #tpu.memory_space<vmem>>, vector<4x128xf32>,
    %c0_6 = arith.constant 0 : index
    %c0_7 = arith.constant 0 : index
    %c0_8 = arith.constant 0 : index
    %8 = vector.load %arg2[%c0_6, %c0_7, %c0_8] : memref<1x4x2304xf32, #tpu.memory_space<vmem>>, vector<1x4x2304xf32>
    %9 = vector.shape_cast %8 : vector<1x4x2304xf32> to vector<4x2304xf32>
    %c0_9 = arith.constant 0 : index
    %c256_10 = arith.constant 256 : index
    %10 = vector.load %arg11[%c0_9, %c256_10] : memref<8x2816xf32, #tpu.memory_space<vmem>>, vector<4x2304xf32>
    tpu.vector_store %arg11[%c0_9, %c256_10], %9 {strides = array<i32>} : memref<8x2816xf32, #tpu.memory_space<vmem>>, vector<4x2304xf32>,
    %c0_11 = arith.constant 0 : index
    %c0_12 = arith.constant 0 : index
    %11 = vector.load %arg3[%c0_11, %c0_12] : memref<16x8xf32, #tpu.memory_space<vmem>>, vector<16x8xf32>
    %c0_13 = arith.constant 0 : index
    %c0_14 = arith.constant 0 : index
    %c0_15 = arith.constant 0 : index
    %12 = vector.load %arg1[%c0_13, %c0_14, %c0_15] : memref<1x8x64xf32, #tpu.memory_space<vmem>>, vector<1x8x64xf32>
    %13 = vector.shape_cast %12 : vector<1x8x64xf32> to vector<8x64xf32>
    %cst_16 = arith.constant dense<0.000000e+00> : vector<16x64xf32>
    %14 = tpu.matmul %11, %13, %cst_16 {dimension_numbers = #tpu.dot_dimension_numbers<[1], [0], [0], [1], [0, 0, 1, 1], [], []>} : vector<16x8xf32>, vector<8x64xf32>, vector<16x64xf32> -> vector<16x64xf32>
    %c0_17 = arith.constant 0 : index
    %c0_18 = arith.constant 0 : index
    %15 = vector.load %arg4[%c0_17, %c0_18] : memref<16x128xf32, #tpu.memory_space<vmem>>, vector<8x128xf32>
    %c8 = arith.constant 8 : index
    %c0_19 = arith.constant 0 : index
    %16 = vector.load %arg4[%c8, %c0_19] : memref<16x128xf32, #tpu.memory_space<vmem>>, vector<8x128xf32>
    %c0_20 = arith.constant 0 : index
    %c0_21 = arith.constant 0 : index
    %17 = vector.load %arg5[%c0_20, %c0_21] : memref<4x128xf32, #tpu.memory_space<vmem>>, vector<4x128xf32>
    %18 = vector.extract_strided_slice %14 {offsets = [0, 0], sizes = [4, 64], strides = [1, 1]} : vector<16x64xf32> to vector<4x64xf32>
    %19 = vector.extract_strided_slice %14 {offsets = [4, 0], sizes = [4, 64], strides = [1, 1]} : vector<16x64xf32> to vector<4x64xf32>
    %20 = vector.extract_strided_slice %18 {offsets = [0, 0], sizes = [4, 8], strides = [1, 1]} : vector<4x64xf32> to vector<4x8xf32>
    %cst_22 = arith.constant dense<0.000000e+00> : vector<4x128xf32>
    %21 = tpu.matmul %20, %15, %cst_22 {dimension_numbers = #tpu.dot_dimension_numbers<[1], [0], [0], [1], [0, 0, 1, 1], [], []>} : vector<4x8xf32>, vector<8x128xf32>, vector<4x128xf32> -> vector<4x128xf32>
    %22 = vector.extract_strided_slice %19 {offsets = [0, 0], sizes = [4, 8], strides = [1, 1]} : vector<4x64xf32> to vector<4x8xf32>
    %cst_23 = arith.constant dense<0.000000e+00> : vector<4x128xf32>
    %23 = tpu.matmul %22, %16, %cst_23 {dimension_numbers = #tpu.dot_dimension_numbers<[1], [0], [0], [1], [0, 0, 1, 1], [], []>} : vector<4x8xf32>, vector<8x128xf32>, vector<4x128xf32> -> vector<4x128xf32>
    %24 = arith.addf %21, %23 : vector<4x128xf32>
    %25 = arith.addf %24, %17 : vector<4x128xf32>
    %c4_24 = arith.constant 4 : index
    %c384 = arith.constant 384 : index
    %26 = vector.load %arg11[%c4_24, %c384] : memref<8x2816xf32, #tpu.memory_space<vmem>>, vector<4x128xf32>
    tpu.vector_store %arg11[%c4_24, %c384], %25 {strides = array<i32>} : memref<8x2816xf32, #tpu.memory_space<vmem>>, vector<4x128xf32>,
    %27 = vector.extract_strided_slice %18 {offsets = [0, 8], sizes = [4, 8], strides = [1, 1]} : vector<4x64xf32> to vector<4x8xf32>
    %cst_25 = arith.constant dense<0.000000e+00> : vector<4x128xf32>
    %28 = tpu.matmul %27, %15, %cst_25 {dimension_numbers = #tpu.dot_dimension_numbers<[1], [0], [0], [1], [0, 0, 1, 1], [], []>} : vector<4x8xf32>, vector<8x128xf32>, vector<4x128xf32> -> vector<4x128xf32>
    %29 = vector.extract_strided_slice %19 {offsets = [0, 8], sizes = [4, 8], strides = [1, 1]} : vector<4x64xf32> to vector<4x8xf32>
    %cst_26 = arith.constant dense<0.000000e+00> : vector<4x128xf32>
    %30 = tpu.matmul %29, %16, %cst_26 {dimension_numbers = #tpu.dot_dimension_numbers<[1], [0], [0], [1], [0, 0, 1, 1], [], []>} : vector<4x8xf32>, vector<8x128xf32>, vector<4x128xf32> -> vector<4x128xf32>
    %31 = arith.addf %28, %30 : vector<4x128xf32>
    %32 = arith.addf %31, %17 : vector<4x128xf32>
    %c4_27 = arith.constant 4 : index
    %c640 = arith.constant 640 : index
    %33 = vector.load %arg11[%c4_27, %c640] : memref<8x2816xf32, #tpu.memory_space<vmem>>, vector<4x128xf32>
    tpu.vector_store %arg11[%c4_27, %c640], %32 {strides = array<i32>} : memref<8x2816xf32, #tpu.memory_space<vmem>>, vector<4x128xf32>,
    %34 = vector.extract_strided_slice %18 {offsets = [0, 16], sizes = [4, 8], strides = [1, 1]} : vector<4x64xf32> to vector<4x8xf32>
    %cst_28 = arith.constant dense<0.000000e+00> : vector<4x128xf32>
    %35 = tpu.matmul %34, %15, %cst_28 {dimension_numbers = #tpu.dot_dimension_numbers<[1], [0], [0], [1], [0, 0, 1, 1], [], []>} : vector<4x8xf32>, vector<8x128xf32>, vector<4x128xf32> -> vector<4x128xf32>
    %36 = vector.extract_strided_slice %19 {offsets = [0, 16], sizes = [4, 8], strides = [1, 1]} : vector<4x64xf32> to vector<4x8xf32>
    %cst_29 = arith.constant dense<0.000000e+00> : vector<4x128xf32>
    %37 = tpu.matmul %36, %16, %cst_29 {dimension_numbers = #tpu.dot_dimension_numbers<[1], [0], [0], [1], [0, 0, 1, 1], [], []>} : vector<4x8xf32>, vector<8x128xf32>, vector<4x128xf32> -> vector<4x128xf32>
    %38 = arith.addf %35, %37 : vector<4x128xf32>
    %39 = arith.addf %38, %17 : vector<4x128xf32>
    %c4_30 = arith.constant 4 : index
    %c896 = arith.constant 896 : index
    %40 = vector.load %arg11[%c4_30, %c896] : memref<8x2816xf32, #tpu.memory_space<vmem>>, vector<4x128xf32>
    tpu.vector_store %arg11[%c4_30, %c896], %39 {strides = array<i32>} : memref<8x2816xf32, #tpu.memory_space<vmem>>, vector<4x128xf32>,
    %41 = vector.extract_strided_slice %18 {offsets = [0, 24], sizes = [4, 8], strides = [1, 1]} : vector<4x64xf32> to vector<4x8xf32>
    %cst_31 = arith.constant dense<0.000000e+00> : vector<4x128xf32>
    %42 = tpu.matmul %41, %15, %cst_31 {dimension_numbers = #tpu.dot_dimension_numbers<[1], [0], [0], [1], [0, 0, 1, 1], [], []>} : vector<4x8xf32>, vector<8x128xf32>, vector<4x128xf32> -> vector<4x128xf32>
    %43 = vector.extract_strided_slice %19 {offsets = [0, 24], sizes = [4, 8], strides = [1, 1]} : vector<4x64xf32> to vector<4x8xf32>
    %cst_32 = arith.constant dense<0.000000e+00> : vector<4x128xf32>
    %44 = tpu.matmul %43, %16, %cst_32 {dimension_numbers = #tpu.dot_dimension_numbers<[1], [0], [0], [1], [0, 0, 1, 1], [], []>} : vector<4x8xf32>, vector<8x128xf32>, vector<4x128xf32> -> vector<4x128xf32>
    %45 = arith.addf %42, %44 : vector<4x128xf32>
    %46 = arith.addf %45, %17 : vector<4x128xf32>
    %c4_33 = arith.constant 4 : index
    %c1152 = arith.constant 1152 : index
    %47 = vector.load %arg11[%c4_33, %c1152] : memref<8x2816xf32, #tpu.memory_space<vmem>>, vector<4x128xf32>
    tpu.vector_store %arg11[%c4_33, %c1152], %46 {strides = array<i32>} : memref<8x2816xf32, #tpu.memory_space<vmem>>, vector<4x128xf32>,
    %48 = vector.extract_strided_slice %18 {offsets = [0, 32], sizes = [4, 8], strides = [1, 1]} : vector<4x64xf32> to vector<4x8xf32>
    %cst_34 = arith.constant dense<0.000000e+00> : vector<4x128xf32>
    %49 = tpu.matmul %48, %15, %cst_34 {dimension_numbers = #tpu.dot_dimension_numbers<[1], [0], [0], [1], [0, 0, 1, 1], [], []>} : vector<4x8xf32>, vector<8x128xf32>, vector<4x128xf32> -> vector<4x128xf32>
    %50 = vector.extract_strided_slice %19 {offsets = [0, 32], sizes = [4, 8], strides = [1, 1]} : vector<4x64xf32> to vector<4x8xf32>
    %cst_35 = arith.constant dense<0.000000e+00> : vector<4x128xf32>
    %51 = tpu.matmul %50, %16, %cst_35 {dimension_numbers = #tpu.dot_dimension_numbers<[1], [0], [0], [1], [0, 0, 1, 1], [], []>} : vector<4x8xf32>, vector<8x128xf32>, vector<4x128xf32> -> vector<4x128xf32>
    %52 = arith.addf %49, %51 : vector<4x128xf32>
    %53 = arith.addf %52, %17 : vector<4x128xf32>
    %c4_36 = arith.constant 4 : index
    %c1408 = arith.constant 1408 : index
    %54 = vector.load %arg11[%c4_36, %c1408] : memref<8x2816xf32, #tpu.memory_space<vmem>>, vector<4x128xf32>
    tpu.vector_store %arg11[%c4_36, %c1408], %53 {strides = array<i32>} : memref<8x2816xf32, #tpu.memory_space<vmem>>, vector<4x128xf32>,
    %55 = vector.extract_strided_slice %18 {offsets = [0, 40], sizes = [4, 8], strides = [1, 1]} : vector<4x64xf32> to vector<4x8xf32>
    %cst_37 = arith.constant dense<0.000000e+00> : vector<4x128xf32>
    %56 = tpu.matmul %55, %15, %cst_37 {dimension_numbers = #tpu.dot_dimension_numbers<[1], [0], [0], [1], [0, 0, 1, 1], [], []>} : vector<4x8xf32>, vector<8x128xf32>, vector<4x128xf32> -> vector<4x128xf32>
    %57 = vector.extract_strided_slice %19 {offsets = [0, 40], sizes = [4, 8], strides = [1, 1]} : vector<4x64xf32> to vector<4x8xf32>
    %cst_38 = arith.constant dense<0.000000e+00> : vector<4x128xf32>
    %58 = tpu.matmul %57, %16, %cst_38 {dimension_numbers = #tpu.dot_dimension_numbers<[1], [0], [0], [1], [0, 0, 1, 1], [], []>} : vector<4x8xf32>, vector<8x128xf32>, vector<4x128xf32> -> vector<4x128xf32>
    %59 = arith.addf %56, %58 : vector<4x128xf32>
    %60 = arith.addf %59, %17 : vector<4x128xf32>
    %c4_39 = arith.constant 4 : index
    %c1664 = arith.constant 1664 : index
    %61 = vector.load %arg11[%c4_39, %c1664] : memref<8x2816xf32, #tpu.memory_space<vmem>>, vector<4x128xf32>
    tpu.vector_store %arg11[%c4_39, %c1664], %60 {strides = array<i32>} : memref<8x2816xf32, #tpu.memory_space<vmem>>, vector<4x128xf32>,
    %62 = vector.extract_strided_slice %18 {offsets = [0, 48], sizes = [4, 8], strides = [1, 1]} : vector<4x64xf32> to vector<4x8xf32>
    %cst_40 = arith.constant dense<0.000000e+00> : vector<4x128xf32>
    %63 = tpu.matmul %62, %15, %cst_40 {dimension_numbers = #tpu.dot_dimension_numbers<[1], [0], [0], [1], [0, 0, 1, 1], [], []>} : vector<4x8xf32>, vector<8x128xf32>, vector<4x128xf32> -> vector<4x128xf32>
    %64 = vector.extract_strided_slice %19 {offsets = [0, 48], sizes = [4, 8], strides = [1, 1]} : vector<4x64xf32> to vector<4x8xf32>
    %cst_41 = arith.constant dense<0.000000e+00> : vector<4x128xf32>
    %65 = tpu.matmul %64, %16, %cst_41 {dimension_numbers = #tpu.dot_dimension_numbers<[1], [0], [0], [1], [0, 0, 1, 1], [], []>} : vector<4x8xf32>, vector<8x128xf32>, vector<4x128xf32> -> vector<4x128xf32>
    %66 = arith.addf %63, %65 : vector<4x128xf32>
    %67 = arith.addf %66, %17 : vector<4x128xf32>
    %c4_42 = arith.constant 4 : index
    %c1920 = arith.constant 1920 : index
    %68 = vector.load %arg11[%c4_42, %c1920] : memref<8x2816xf32, #tpu.memory_space<vmem>>, vector<4x128xf32>
    tpu.vector_store %arg11[%c4_42, %c1920], %67 {strides = array<i32>} : memref<8x2816xf32, #tpu.memory_space<vmem>>, vector<4x128xf32>,
    %69 = vector.extract_strided_slice %18 {offsets = [0, 56], sizes = [4, 8], strides = [1, 1]} : vector<4x64xf32> to vector<4x8xf32>
    %cst_43 = arith.constant dense<0.000000e+00> : vector<4x128xf32>
    %70 = tpu.matmul %69, %15, %cst_43 {dimension_numbers = #tpu.dot_dimension_numbers<[1], [0], [0], [1], [0, 0, 1, 1], [], []>} : vector<4x8xf32>, vector<8x128xf32>, vector<4x128xf32> -> vector<4x128xf32>
    %71 = vector.extract_strided_slice %19 {offsets = [0, 56], sizes = [4, 8], strides = [1, 1]} : vector<4x64xf32> to vector<4x8xf32>
    %cst_44 = arith.constant dense<0.000000e+00> : vector<4x128xf32>
    %72 = tpu.matmul %71, %16, %cst_44 {dimension_numbers = #tpu.dot_dimension_numbers<[1], [0], [0], [1], [0, 0, 1, 1], [], []>} : vector<4x8xf32>, vector<8x128xf32>, vector<4x128xf32> -> vector<4x128xf32>
    %73 = arith.addf %70, %72 : vector<4x128xf32>
    %74 = arith.addf %73, %17 : vector<4x128xf32>
    %c4_45 = arith.constant 4 : index
    %c2176 = arith.constant 2176 : index
    %75 = vector.load %arg11[%c4_45, %c2176] : memref<8x2816xf32, #tpu.memory_space<vmem>>, vector<4x128xf32>
    tpu.vector_store %arg11[%c4_45, %c2176], %74 {strides = array<i32>} : memref<8x2816xf32, #tpu.memory_space<vmem>>, vector<4x128xf32>,
    %76 = vector.extract_strided_slice %14 {offsets = [8, 0], sizes = [4, 64], strides = [1, 1]} : vector<16x64xf32> to vector<4x64xf32>
    %77 = vector.extract_strided_slice %14 {offsets = [12, 0], sizes = [4, 64], strides = [1, 1]} : vector<16x64xf32> to vector<4x64xf32>
    %78 = vector.extract_strided_slice %76 {offsets = [0, 0], sizes = [4, 8], strides = [1, 1]} : vector<4x64xf32> to vector<4x8xf32>
    %cst_46 = arith.constant dense<0.000000e+00> : vector<4x128xf32>
    %79 = tpu.matmul %78, %15, %cst_46 {dimension_numbers = #tpu.dot_dimension_numbers<[1], [0], [0], [1], [0, 0, 1, 1], [], []>} : vector<4x8xf32>, vector<8x128xf32>, vector<4x128xf32> -> vector<4x128xf32>
    %80 = vector.extract_strided_slice %77 {offsets = [0, 0], sizes = [4, 8], strides = [1, 1]} : vector<4x64xf32> to vector<4x8xf32>
    %cst_47 = arith.constant dense<0.000000e+00> : vector<4x128xf32>
    %81 = tpu.matmul %80, %16, %cst_47 {dimension_numbers = #tpu.dot_dimension_numbers<[1], [0], [0], [1], [0, 0, 1, 1], [], []>} : vector<4x8xf32>, vector<8x128xf32>, vector<4x128xf32> -> vector<4x128xf32>
    %82 = arith.addf %79, %81 : vector<4x128xf32>
    %83 = arith.addf %82, %17 : vector<4x128xf32>
    %c4_48 = arith.constant 4 : index
    %c512 = arith.constant 512 : index
    %84 = vector.load %arg11[%c4_48, %c512] : memref<8x2816xf32, #tpu.memory_space<vmem>>, vector<4x128xf32>
    tpu.vector_store %arg11[%c4_48, %c512], %83 {strides = array<i32>} : memref<8x2816xf32, #tpu.memory_space<vmem>>, vector<4x128xf32>,
    %85 = vector.extract_strided_slice %76 {offsets = [0, 8], sizes = [4, 8], strides = [1, 1]} : vector<4x64xf32> to vector<4x8xf32>
    %cst_49 = arith.constant dense<0.000000e+00> : vector<4x128xf32>
    %86 = tpu.matmul %85, %15, %cst_49 {dimension_numbers = #tpu.dot_dimension_numbers<[1], [0], [0], [1], [0, 0, 1, 1], [], []>} : vector<4x8xf32>, vector<8x128xf32>, vector<4x128xf32> -> vector<4x128xf32>
    %87 = vector.extract_strided_slice %77 {offsets = [0, 8], sizes = [4, 8], strides = [1, 1]} : vector<4x64xf32> to vector<4x8xf32>
    %cst_50 = arith.constant dense<0.000000e+00> : vector<4x128xf32>
    %88 = tpu.matmul %87, %16, %cst_50 {dimension_numbers = #tpu.dot_dimension_numbers<[1], [0], [0], [1], [0, 0, 1, 1], [], []>} : vector<4x8xf32>, vector<8x128xf32>, vector<4x128xf32> -> vector<4x128xf32>
    %89 = arith.addf %86, %88 : vector<4x128xf32>
    %90 = arith.addf %89, %17 : vector<4x128xf32>
    %c4_51 = arith.constant 4 : index
    %c768 = arith.constant 768 : index
    %91 = vector.load %arg11[%c4_51, %c768] : memref<8x2816xf32, #tpu.memory_space<vmem>>, vector<4x128xf32>
    tpu.vector_store %arg11[%c4_51, %c768], %90 {strides = array<i32>} : memref<8x2816xf32, #tpu.memory_space<vmem>>, vector<4x128xf32>,
    %92 = vector.extract_strided_slice %76 {offsets = [0, 16], sizes = [4, 8], strides = [1, 1]} : vector<4x64xf32> to vector<4x8xf32>
    %cst_52 = arith.constant dense<0.000000e+00> : vector<4x128xf32>
    %93 = tpu.matmul %92, %15, %cst_52 {dimension_numbers = #tpu.dot_dimension_numbers<[1], [0], [0], [1], [0, 0, 1, 1], [], []>} : vector<4x8xf32>, vector<8x128xf32>, vector<4x128xf32> -> vector<4x128xf32>
    %94 = vector.extract_strided_slice %77 {offsets = [0, 16], sizes = [4, 8], strides = [1, 1]} : vector<4x64xf32> to vector<4x8xf32>
    %cst_53 = arith.constant dense<0.000000e+00> : vector<4x128xf32>
    %95 = tpu.matmul %94, %16, %cst_53 {dimension_numbers = #tpu.dot_dimension_numbers<[1], [0], [0], [1], [0, 0, 1, 1], [], []>} : vector<4x8xf32>, vector<8x128xf32>, vector<4x128xf32> -> vector<4x128xf32>
    %96 = arith.addf %93, %95 : vector<4x128xf32>
    %97 = arith.addf %96, %17 : vector<4x128xf32>
    %c4_54 = arith.constant 4 : index
    %c1024 = arith.constant 1024 : index
    %98 = vector.load %arg11[%c4_54, %c1024] : memref<8x2816xf32, #tpu.memory_space<vmem>>, vector<4x128xf32>
    tpu.vector_store %arg11[%c4_54, %c1024], %97 {strides = array<i32>} : memref<8x2816xf32, #tpu.memory_space<vmem>>, vector<4x128xf32>,
    %99 = vector.extract_strided_slice %76 {offsets = [0, 24], sizes = [4, 8], strides = [1, 1]} : vector<4x64xf32> to vector<4x8xf32>
    %cst_55 = arith.constant dense<0.000000e+00> : vector<4x128xf32>
    %100 = tpu.matmul %99, %15, %cst_55 {dimension_numbers = #tpu.dot_dimension_numbers<[1], [0], [0], [1], [0, 0, 1, 1], [], []>} : vector<4x8xf32>, vector<8x128xf32>, vector<4x128xf32> -> vector<4x128xf32>
    %101 = vector.extract_strided_slice %77 {offsets = [0, 24], sizes = [4, 8], strides = [1, 1]} : vector<4x64xf32> to vector<4x8xf32>
    %cst_56 = arith.constant dense<0.000000e+00> : vector<4x128xf32>
    %102 = tpu.matmul %101, %16, %cst_56 {dimension_numbers = #tpu.dot_dimension_numbers<[1], [0], [0], [1], [0, 0, 1, 1], [], []>} : vector<4x8xf32>, vector<8x128xf32>, vector<4x128xf32> -> vector<4x128xf32>
    %103 = arith.addf %100, %102 : vector<4x128xf32>
    %104 = arith.addf %103, %17 : vector<4x128xf32>
    %c4_57 = arith.constant 4 : index
    %c1280 = arith.constant 1280 : index
    %105 = vector.load %arg11[%c4_57, %c1280] : memref<8x2816xf32, #tpu.memory_space<vmem>>, vector<4x128xf32>
    tpu.vector_store %arg11[%c4_57, %c1280], %104 {strides = array<i32>} : memref<8x2816xf32, #tpu.memory_space<vmem>>, vector<4x128xf32>,
    %106 = vector.extract_strided_slice %76 {offsets = [0, 32], sizes = [4, 8], strides = [1, 1]} : vector<4x64xf32> to vector<4x8xf32>
    %cst_58 = arith.constant dense<0.000000e+00> : vector<4x128xf32>
    %107 = tpu.matmul %106, %15, %cst_58 {dimension_numbers = #tpu.dot_dimension_numbers<[1], [0], [0], [1], [0, 0, 1, 1], [], []>} : vector<4x8xf32>, vector<8x128xf32>, vector<4x128xf32> -> vector<4x128xf32>
    %108 = vector.extract_strided_slice %77 {offsets = [0, 32], sizes = [4, 8], strides = [1, 1]} : vector<4x64xf32> to vector<4x8xf32>
    %cst_59 = arith.constant dense<0.000000e+00> : vector<4x128xf32>
    %109 = tpu.matmul %108, %16, %cst_59 {dimension_numbers = #tpu.dot_dimension_numbers<[1], [0], [0], [1], [0, 0, 1, 1], [], []>} : vector<4x8xf32>, vector<8x128xf32>, vector<4x128xf32> -> vector<4x128xf32>
    %110 = arith.addf %107, %109 : vector<4x128xf32>
    %111 = arith.addf %110, %17 : vector<4x128xf32>
    %c4_60 = arith.constant 4 : index
    %c1536 = arith.constant 1536 : index
    %112 = vector.load %arg11[%c4_60, %c1536] : memref<8x2816xf32, #tpu.memory_space<vmem>>, vector<4x128xf32>
    tpu.vector_store %arg11[%c4_60, %c1536], %111 {strides = array<i32>} : memref<8x2816xf32, #tpu.memory_space<vmem>>, vector<4x128xf32>,
    %113 = vector.extract_strided_slice %76 {offsets = [0, 40], sizes = [4, 8], strides = [1, 1]} : vector<4x64xf32> to vector<4x8xf32>
    %cst_61 = arith.constant dense<0.000000e+00> : vector<4x128xf32>
    %114 = tpu.matmul %113, %15, %cst_61 {dimension_numbers = #tpu.dot_dimension_numbers<[1], [0], [0], [1], [0, 0, 1, 1], [], []>} : vector<4x8xf32>, vector<8x128xf32>, vector<4x128xf32> -> vector<4x128xf32>
    %115 = vector.extract_strided_slice %77 {offsets = [0, 40], sizes = [4, 8], strides = [1, 1]} : vector<4x64xf32> to vector<4x8xf32>
    %cst_62 = arith.constant dense<0.000000e+00> : vector<4x128xf32>
    %116 = tpu.matmul %115, %16, %cst_62 {dimension_numbers = #tpu.dot_dimension_numbers<[1], [0], [0], [1], [0, 0, 1, 1], [], []>} : vector<4x8xf32>, vector<8x128xf32>, vector<4x128xf32> -> vector<4x128xf32>
    %117 = arith.addf %114, %116 : vector<4x128xf32>
    %118 = arith.addf %117, %17 : vector<4x128xf32>
    %c4_63 = arith.constant 4 : index
    %c1792 = arith.constant 1792 : index
    %119 = vector.load %arg11[%c4_63, %c1792] : memref<8x2816xf32, #tpu.memory_space<vmem>>, vector<4x128xf32>
    tpu.vector_store %arg11[%c4_63, %c1792], %118 {strides = array<i32>} : memref<8x2816xf32, #tpu.memory_space<vmem>>, vector<4x128xf32>,
    %120 = vector.extract_strided_slice %76 {offsets = [0, 48], sizes = [4, 8], strides = [1, 1]} : vector<4x64xf32> to vector<4x8xf32>
    %cst_64 = arith.constant dense<0.000000e+00> : vector<4x128xf32>
    %121 = tpu.matmul %120, %15, %cst_64 {dimension_numbers = #tpu.dot_dimension_numbers<[1], [0], [0], [1], [0, 0, 1, 1], [], []>} : vector<4x8xf32>, vector<8x128xf32>, vector<4x128xf32> -> vector<4x128xf32>
    %122 = vector.extract_strided_slice %77 {offsets = [0, 48], sizes = [4, 8], strides = [1, 1]} : vector<4x64xf32> to vector<4x8xf32>
    %cst_65 = arith.constant dense<0.000000e+00> : vector<4x128xf32>
    %123 = tpu.matmul %122, %16, %cst_65 {dimension_numbers = #tpu.dot_dimension_numbers<[1], [0], [0], [1], [0, 0, 1, 1], [], []>} : vector<4x8xf32>, vector<8x128xf32>, vector<4x128xf32> -> vector<4x128xf32>
    %124 = arith.addf %121, %123 : vector<4x128xf32>
    %125 = arith.addf %124, %17 : vector<4x128xf32>
    %c4_66 = arith.constant 4 : index
    %c2048 = arith.constant 2048 : index
    %126 = vector.load %arg11[%c4_66, %c2048] : memref<8x2816xf32, #tpu.memory_space<vmem>>, vector<4x128xf32>
    tpu.vector_store %arg11[%c4_66, %c2048], %125 {strides = array<i32>} : memref<8x2816xf32, #tpu.memory_space<vmem>>, vector<4x128xf32>,
    %127 = vector.extract_strided_slice %76 {offsets = [0, 56], sizes = [4, 8], strides = [1, 1]} : vector<4x64xf32> to vector<4x8xf32>
    %cst_67 = arith.constant dense<0.000000e+00> : vector<4x128xf32>
    %128 = tpu.matmul %127, %15, %cst_67 {dimension_numbers = #tpu.dot_dimension_numbers<[1], [0], [0], [1], [0, 0, 1, 1], [], []>} : vector<4x8xf32>, vector<8x128xf32>, vector<4x128xf32> -> vector<4x128xf32>
    %129 = vector.extract_strided_slice %77 {offsets = [0, 56], sizes = [4, 8], strides = [1, 1]} : vector<4x64xf32> to vector<4x8xf32>
    %cst_68 = arith.constant dense<0.000000e+00> : vector<4x128xf32>
    %130 = tpu.matmul %129, %16, %cst_68 {dimension_numbers = #tpu.dot_dimension_numbers<[1], [0], [0], [1], [0, 0, 1, 1], [], []>} : vector<4x8xf32>, vector<8x128xf32>, vector<4x128xf32> -> vector<4x128xf32>
    %131 = arith.addf %128, %130 : vector<4x128xf32>
    %132 = arith.addf %131, %17 : vector<4x128xf32>
    %c4_69 = arith.constant 4 : index
    %c2304 = arith.constant 2304 : index
    %133 = vector.load %arg11[%c4_69, %c2304] : memref<8x2816xf32, #tpu.memory_space<vmem>>, vector<4x128xf32>
    tpu.vector_store %arg11[%c4_69, %c2304], %132 {strides = array<i32>} : memref<8x2816xf32, #tpu.memory_space<vmem>>, vector<4x128xf32>,
    %c0_70 = arith.constant 0 : index
    %c127 = arith.constant 127 : index
    %134 = vector.load %arg11[%c0_70, %c127] : memref<8x2816xf32, #tpu.memory_space<vmem>>, vector<8x2304xf32>
    %c0_71 = arith.constant 0 : index
    %c128 = arith.constant 128 : index
    %135 = vector.load %arg11[%c0_71, %c128] : memref<8x2816xf32, #tpu.memory_space<vmem>>, vector<8x2304xf32>
    %c0_72 = arith.constant 0 : index
    %c129 = arith.constant 129 : index
    %136 = vector.load %arg11[%c0_72, %c129] : memref<8x2816xf32, #tpu.memory_space<vmem>>, vector<8x2304xf32>
    %c0_73 = arith.constant 0 : index
    %c255 = arith.constant 255 : index
    %137 = vector.load %arg11[%c0_73, %c255] : memref<8x2816xf32, #tpu.memory_space<vmem>>, vector<8x2304xf32>
    %c0_74 = arith.constant 0 : index
    %c256_75 = arith.constant 256 : index
    %138 = vector.load %arg11[%c0_74, %c256_75] : memref<8x2816xf32, #tpu.memory_space<vmem>>, vector<8x2304xf32>
    %c0_76 = arith.constant 0 : index
    %c257 = arith.constant 257 : index
    %139 = vector.load %arg11[%c0_76, %c257] : memref<8x2816xf32, #tpu.memory_space<vmem>>, vector<8x2304xf32>
    %c0_77 = arith.constant 0 : index
    %c383 = arith.constant 383 : index
    %140 = vector.load %arg11[%c0_77, %c383] : memref<8x2816xf32, #tpu.memory_space<vmem>>, vector<8x2304xf32>
    %c0_78 = arith.constant 0 : index
    %c384_79 = arith.constant 384 : index
    %141 = vector.load %arg11[%c0_78, %c384_79] : memref<8x2816xf32, #tpu.memory_space<vmem>>, vector<8x2304xf32>
    %c0_80 = arith.constant 0 : index
    %c385 = arith.constant 385 : index
    %142 = vector.load %arg11[%c0_80, %c385] : memref<8x2816xf32, #tpu.memory_space<vmem>>, vector<8x2304xf32>
    %c0_81 = arith.constant 0 : index
    %c0_82 = arith.constant 0 : index
    %143 = vector.load %arg7[%c0_81, %c0_82] : memref<4x72xf32, #tpu.memory_space<vmem>>, vector<4x72xf32>
    %144 = tpu.concatenate %134, %135, %136, %137, %138, %139, %140, %141, %142 in 0 : vector<8x2304xf32>, vector<8x2304xf32>, vector<8x2304xf32>, vector<8x2304xf32>, vector<8x2304xf32>, vector<8x2304xf32>, vector<8x2304xf32>, vector<8x2304xf32>, vector<8x2304xf32> -> vector<72x2304xf32>
    %cst_83 = arith.constant dense<0.000000e+00> : vector<4x2304xf32>
    %145 = tpu.matmul %143, %144, %cst_83 {dimension_numbers = #tpu.dot_dimension_numbers<[1], [0], [0], [1], [0, 0, 1, 1], [], []>} : vector<4x72xf32>, vector<72x2304xf32>, vector<4x2304xf32> -> vector<4x2304xf32>
    %c0_84 = arith.constant 0 : index
    %c0_85 = arith.constant 0 : index
    %146 = vector.load %arg8[%c0_84, %c0_85] : memref<4x1xf32, #tpu.memory_space<vmem>>, vector<4x1xf32>
    %147 = vector.broadcast %146 : vector<4x1xf32> to vector<4x2304xf32>
    %148 = arith.addf %145, %147 : vector<4x2304xf32>
    %c0_86 = arith.constant 0 : index
    %c0_87 = arith.constant 0 : index
    %c0_88 = arith.constant 0 : index
    %149 = vector.load %arg9[%c0_86, %c0_87, %c0_88] : memref<1x4x2304xf32, #tpu.memory_space<vmem>>, vector<1x4x2304xf32>
    %150 = vector.shape_cast %149 : vector<1x4x2304xf32> to vector<4x2304xf32>
    %151 = vector.shape_cast %148 : vector<4x2304xf32> to vector<1x4x2304xf32>
    tpu.vector_store %arg9[%c0_86, %c0_87, %c0_88], %151 {strides = array<i32>} : memref<1x4x2304xf32, #tpu.memory_space<vmem>>, vector<1x4x2304xf32>,
    %c0_89 = arith.constant 0 : index
    %c0_90 = arith.constant 0 : index
    %152 = vector.load %arg6[%c0_89, %c0_90] : memref<1x2304xf32, #tpu.memory_space<vmem>>, vector<1x2304xf32>
    %153 = vector.broadcast %152 : vector<1x2304xf32> to vector<4x2304xf32>
    %154 = arith.mulf %148, %153 : vector<4x2304xf32>
    %cst_91 = arith.constant dense<0.000000e+00> : vector<4xf32>
    %155 = vector.multi_reduction <add>, %154, %cst_91 [1] : vector<4x2304xf32> to vector<4xf32>
    %156 = vector.shape_cast %155 : vector<4xf32> to vector<4x1xf32>
    %157 = arith.mulf %154, %154 : vector<4x2304xf32>
    %cst_92 = arith.constant dense<0.000000e+00> : vector<4xf32>
    %158 = vector.multi_reduction <add>, %157, %cst_92 [1] : vector<4x2304xf32> to vector<4xf32>
    %159 = vector.shape_cast %158 : vector<4xf32> to vector<4x1xf32>
    %160 = tpu.concatenate %156, %159 in 1 : vector<4x1xf32>, vector<4x1xf32> -> vector<4x2xf32>
    %c0_93 = arith.constant 0 : index
    %c0_94 = arith.constant 0 : index
    %c0_95 = arith.constant 0 : index
    %161 = vector.load %arg10[%c0_93, %c0_94, %c0_95] : memref<1x4x2xf32, #tpu.memory_space<vmem>>, vector<1x4x2xf32>
    %162 = vector.shape_cast %161 : vector<1x4x2xf32> to vector<4x2xf32>
    %163 = vector.shape_cast %160 : vector<4x2xf32> to vector<1x4x2xf32>
    tpu.vector_store %arg10[%c0_93, %c0_94, %c0_95], %163 {strides = array<i32>} : memref<1x4x2xf32, #tpu.memory_space<vmem>>, vector<1x4x2xf32>,
    return
  }
  func.func @transform_0(%arg0: i32) -> (i32, i32, i32) {
    %c0_i32 = arith.constant 0 : i32
    %c0_i32_0 = arith.constant 0 : i32
    %c0_i32_1 = arith.constant 0 : i32
    return %arg0, %c0_i32, %c0_i32_0 : i32, i32, i32
  }
  func.func @transform_1(%arg0: i32) -> (i32, i32, i32) {
    %c0_i32 = arith.constant 0 : i32
    %c0_i32_0 = arith.constant 0 : i32
    %c0_i32_1 = arith.constant 0 : i32
    return %arg0, %c0_i32, %c0_i32_0 : i32, i32, i32
  }
  func.func @transform_2(%arg0: i32) -> (i32, i32) {
    %c0_i32 = arith.constant 0 : i32
    %c0_i32_0 = arith.constant 0 : i32
    %c0_i32_1 = arith.constant 0 : i32
    return %c0_i32, %c0_i32_0 : i32, i32
  }
  func.func @transform_3(%arg0: i32) -> (i32, i32) {
    %c0_i32 = arith.constant 0 : i32
    %c0_i32_0 = arith.constant 0 : i32
    %c0_i32_1 = arith.constant 0 : i32
    return %c0_i32, %c0_i32_0 : i32, i32
  }
  func.func @transform_4(%arg0: i32) -> (i32, i32) {
    %c0_i32 = arith.constant 0 : i32
    %c0_i32_0 = arith.constant 0 : i32
    %c0_i32_1 = arith.constant 0 : i32
    return %c0_i32, %c0_i32_0 : i32, i32
  }
  func.func @transform_5(%arg0: i32) -> (i32, i32) {
    %c0_i32 = arith.constant 0 : i32
    %c0_i32_0 = arith.constant 0 : i32
    %c0_i32_1 = arith.constant 0 : i32
    return %c0_i32, %c0_i32_0 : i32, i32
  }
  func.func @transform_6(%arg0: i32) -> (i32, i32) {
    %c0_i32 = arith.constant 0 : i32
    %c0_i32_0 = arith.constant 0 : i32
    %c0_i32_1 = arith.constant 0 : i32
    return %c0_i32, %c0_i32_0 : i32, i32
  }
  func.func @transform_7(%arg0: i32) -> (i32, i32) {
    %c0_i32 = arith.constant 0 : i32
    %c0_i32_0 = arith.constant 0 : i32
    %c0_i32_1 = arith.constant 0 : i32
    return %c0_i32, %c0_i32_0 : i32, i32
  }
  func.func @transform_8(%arg0: i32) -> (i32, i32, i32) {
    %c0_i32 = arith.constant 0 : i32
    %c0_i32_0 = arith.constant 0 : i32
    %c0_i32_1 = arith.constant 0 : i32
    return %arg0, %c0_i32, %c0_i32_0 : i32, i32, i32
  }
  func.func @transform_9(%arg0: i32) -> (i32, i32, i32) {
    %c0_i32 = arith.constant 0 : i32
    %c0_i32_0 = arith.constant 0 : i32
    %c0_i32_1 = arith.constant 0 : i32
    return %arg0, %c0_i32, %c0_i32_0 : i32, i32, i32
  }
}

module attributes {stable_mosaic.version = 11 : i64} {
  func.func @kernel_b(%arg0: i32, %arg1: memref<1x4x2304xf32, #tpu.memory_space<vmem>>, %arg2: memref<4x1xf32, #tpu.memory_space<vmem>>, %arg3: memref<4x1xf32, #tpu.memory_space<vmem>>, %arg4: memref<1x2304xf32, #tpu.memory_space<vmem>>, %arg5: memref<4x36xf32, #tpu.memory_space<vmem>>, %arg6: memref<4x1xf32, #tpu.memory_space<vmem>>, %arg7: memref<1x4x2304xf32, #tpu.memory_space<vmem>>, %arg8: memref<1x4x2xf32, #tpu.memory_space<vmem>>, %arg9: memref<4x2816xf32, #tpu.memory_space<vmem>>) attributes {dimension_semantics = [#tpu.dimension_semantics<parallel>], iteration_bounds = array<i64: 2>, scalar_prefetch = 0 : i64, scratch_operands = 1 : i64, tpu.core_type = #tpu.core_type<tc>, window_params = [{transform_indices = @transform_0, window_bounds = array<i64: 1, 4, 2304>}, {pipeline_mode = #tpu.pipeline_mode<synchronous>, transform_indices = @transform_1, window_bounds = array<i64: 4, 1>}, {pipeline_mode = #tpu.pipeline_mode<synchronous>, transform_indices = @transform_2, window_bounds = array<i64: 4, 1>}, {pipeline_mode = #tpu.pipeline_mode<synchronous>, transform_indices = @transform_3, window_bounds = array<i64: 1, 2304>}, {pipeline_mode = #tpu.pipeline_mode<synchronous>, transform_indices = @transform_4, window_bounds = array<i64: 4, 36>}, {pipeline_mode = #tpu.pipeline_mode<synchronous>, transform_indices = @transform_5, window_bounds = array<i64: 4, 1>}, {transform_indices = @transform_6, window_bounds = array<i64: 1, 4, 2304>}, {transform_indices = @transform_7, window_bounds = array<i64: 1, 4, 2>}]} {
    %cst = arith.constant 0.000000e+00 : f32
    %0 = vector.broadcast %cst : f32 to vector<4x256xf32>
    %c0 = arith.constant 0 : index
    %c0_0 = arith.constant 0 : index
    %1 = vector.load %arg9[%c0, %c0_0] : memref<4x2816xf32, #tpu.memory_space<vmem>>, vector<4x256xf32>
    tpu.vector_store %arg9[%c0, %c0_0], %0 {strides = array<i32>} : memref<4x2816xf32, #tpu.memory_space<vmem>>, vector<4x256xf32>,
    %cst_1 = arith.constant 0.000000e+00 : f32
    %2 = vector.broadcast %cst_1 : f32 to vector<4x256xf32>
    %c0_2 = arith.constant 0 : index
    %c2560 = arith.constant 2560 : index
    %3 = vector.load %arg9[%c0_2, %c2560] : memref<4x2816xf32, #tpu.memory_space<vmem>>, vector<4x256xf32>
    tpu.vector_store %arg9[%c0_2, %c2560], %2 {strides = array<i32>} : memref<4x2816xf32, #tpu.memory_space<vmem>>, vector<4x256xf32>,
    %c0_3 = arith.constant 0 : index
    %c0_4 = arith.constant 0 : index
    %c0_5 = arith.constant 0 : index
    %4 = vector.load %arg1[%c0_3, %c0_4, %c0_5] : memref<1x4x2304xf32, #tpu.memory_space<vmem>>, vector<1x4x2304xf32>
    %5 = vector.shape_cast %4 : vector<1x4x2304xf32> to vector<4x2304xf32>
    %c0_6 = arith.constant 0 : index
    %c0_7 = arith.constant 0 : index
    %6 = vector.load %arg2[%c0_6, %c0_7] : memref<4x1xf32, #tpu.memory_space<vmem>>, vector<4x1xf32>
    %7 = vector.broadcast %6 : vector<4x1xf32> to vector<4x2304xf32>
    %8 = arith.mulf %5, %7 : vector<4x2304xf32>
    %c0_8 = arith.constant 0 : index
    %c0_9 = arith.constant 0 : index
    %9 = vector.load %arg3[%c0_8, %c0_9] : memref<4x1xf32, #tpu.memory_space<vmem>>, vector<4x1xf32>
    %10 = vector.broadcast %9 : vector<4x1xf32> to vector<4x2304xf32>
    %11 = arith.addf %8, %10 : vector<4x2304xf32>
    %cst_10 = arith.constant 0.000000e+00 : f32
    %12 = vector.broadcast %cst_10 : f32 to vector<4x2304xf32>
    %13 = arith.maximumf %11, %12 : vector<4x2304xf32>
    %c0_11 = arith.constant 0 : index
    %c0_12 = arith.constant 0 : index
    %14 = vector.load %arg4[%c0_11, %c0_12] : memref<1x2304xf32, #tpu.memory_space<vmem>>, vector<1x2304xf32>
    %15 = vector.broadcast %14 : vector<1x2304xf32> to vector<4x2304xf32>
    %16 = arith.mulf %13, %15 : vector<4x2304xf32>
    %c0_13 = arith.constant 0 : index
    %c256 = arith.constant 256 : index
    %17 = vector.load %arg9[%c0_13, %c256] : memref<4x2816xf32, #tpu.memory_space<vmem>>, vector<4x2304xf32>
    tpu.vector_store %arg9[%c0_13, %c256], %16 {strides = array<i32>} : memref<4x2816xf32, #tpu.memory_space<vmem>>, vector<4x2304xf32>,
    %c0_14 = arith.constant 0 : index
    %c127 = arith.constant 127 : index
    %18 = vector.load %arg9[%c0_14, %c127] : memref<4x2816xf32, #tpu.memory_space<vmem>>, vector<4x2304xf32>
    %c0_15 = arith.constant 0 : index
    %c128 = arith.constant 128 : index
    %19 = vector.load %arg9[%c0_15, %c128] : memref<4x2816xf32, #tpu.memory_space<vmem>>, vector<4x2304xf32>
    %c0_16 = arith.constant 0 : index
    %c129 = arith.constant 129 : index
    %20 = vector.load %arg9[%c0_16, %c129] : memref<4x2816xf32, #tpu.memory_space<vmem>>, vector<4x2304xf32>
    %c0_17 = arith.constant 0 : index
    %c255 = arith.constant 255 : index
    %21 = vector.load %arg9[%c0_17, %c255] : memref<4x2816xf32, #tpu.memory_space<vmem>>, vector<4x2304xf32>
    %c0_18 = arith.constant 0 : index
    %c256_19 = arith.constant 256 : index
    %22 = vector.load %arg9[%c0_18, %c256_19] : memref<4x2816xf32, #tpu.memory_space<vmem>>, vector<4x2304xf32>
    %c0_20 = arith.constant 0 : index
    %c257 = arith.constant 257 : index
    %23 = vector.load %arg9[%c0_20, %c257] : memref<4x2816xf32, #tpu.memory_space<vmem>>, vector<4x2304xf32>
    %c0_21 = arith.constant 0 : index
    %c383 = arith.constant 383 : index
    %24 = vector.load %arg9[%c0_21, %c383] : memref<4x2816xf32, #tpu.memory_space<vmem>>, vector<4x2304xf32>
    %c0_22 = arith.constant 0 : index
    %c384 = arith.constant 384 : index
    %25 = vector.load %arg9[%c0_22, %c384] : memref<4x2816xf32, #tpu.memory_space<vmem>>, vector<4x2304xf32>
    %c0_23 = arith.constant 0 : index
    %c385 = arith.constant 385 : index
    %26 = vector.load %arg9[%c0_23, %c385] : memref<4x2816xf32, #tpu.memory_space<vmem>>, vector<4x2304xf32>
    %c0_24 = arith.constant 0 : index
    %c0_25 = arith.constant 0 : index
    %27 = vector.load %arg5[%c0_24, %c0_25] : memref<4x36xf32, #tpu.memory_space<vmem>>, vector<4x36xf32>
    %28 = tpu.concatenate %18, %19, %20, %21, %22, %23, %24, %25, %26 in 0 : vector<4x2304xf32>, vector<4x2304xf32>, vector<4x2304xf32>, vector<4x2304xf32>, vector<4x2304xf32>, vector<4x2304xf32>, vector<4x2304xf32>, vector<4x2304xf32>, vector<4x2304xf32> -> vector<36x2304xf32>
    %cst_26 = arith.constant dense<0.000000e+00> : vector<4x2304xf32>
    %29 = tpu.matmul %27, %28, %cst_26 {dimension_numbers = #tpu.dot_dimension_numbers<[1], [0], [0], [1], [0, 0, 1, 1], [], []>} : vector<4x36xf32>, vector<36x2304xf32>, vector<4x2304xf32> -> vector<4x2304xf32>
    %c0_27 = arith.constant 0 : index
    %c0_28 = arith.constant 0 : index
    %30 = vector.load %arg6[%c0_27, %c0_28] : memref<4x1xf32, #tpu.memory_space<vmem>>, vector<4x1xf32>
    %31 = vector.broadcast %30 : vector<4x1xf32> to vector<4x2304xf32>
    %32 = arith.addf %29, %31 : vector<4x2304xf32>
    %c0_29 = arith.constant 0 : index
    %c0_30 = arith.constant 0 : index
    %c0_31 = arith.constant 0 : index
    %33 = vector.load %arg7[%c0_29, %c0_30, %c0_31] : memref<1x4x2304xf32, #tpu.memory_space<vmem>>, vector<1x4x2304xf32>
    %34 = vector.shape_cast %33 : vector<1x4x2304xf32> to vector<4x2304xf32>
    %35 = vector.shape_cast %32 : vector<4x2304xf32> to vector<1x4x2304xf32>
    tpu.vector_store %arg7[%c0_29, %c0_30, %c0_31], %35 {strides = array<i32>} : memref<1x4x2304xf32, #tpu.memory_space<vmem>>, vector<1x4x2304xf32>,
    %c0_32 = arith.constant 0 : index
    %c0_33 = arith.constant 0 : index
    %36 = vector.load %arg4[%c0_32, %c0_33] : memref<1x2304xf32, #tpu.memory_space<vmem>>, vector<1x2304xf32>
    %37 = vector.broadcast %36 : vector<1x2304xf32> to vector<4x2304xf32>
    %38 = arith.mulf %32, %37 : vector<4x2304xf32>
    %cst_34 = arith.constant dense<0.000000e+00> : vector<4xf32>
    %39 = vector.multi_reduction <add>, %38, %cst_34 [1] : vector<4x2304xf32> to vector<4xf32>
    %40 = vector.shape_cast %39 : vector<4xf32> to vector<4x1xf32>
    %41 = arith.mulf %38, %38 : vector<4x2304xf32>
    %cst_35 = arith.constant dense<0.000000e+00> : vector<4xf32>
    %42 = vector.multi_reduction <add>, %41, %cst_35 [1] : vector<4x2304xf32> to vector<4xf32>
    %43 = vector.shape_cast %42 : vector<4xf32> to vector<4x1xf32>
    %44 = tpu.concatenate %40, %43 in 1 : vector<4x1xf32>, vector<4x1xf32> -> vector<4x2xf32>
    %c0_36 = arith.constant 0 : index
    %c0_37 = arith.constant 0 : index
    %c0_38 = arith.constant 0 : index
    %45 = vector.load %arg8[%c0_36, %c0_37, %c0_38] : memref<1x4x2xf32, #tpu.memory_space<vmem>>, vector<1x4x2xf32>
    %46 = vector.shape_cast %45 : vector<1x4x2xf32> to vector<4x2xf32>
    %47 = vector.shape_cast %44 : vector<4x2xf32> to vector<1x4x2xf32>
    tpu.vector_store %arg8[%c0_36, %c0_37, %c0_38], %47 {strides = array<i32>} : memref<1x4x2xf32, #tpu.memory_space<vmem>>, vector<1x4x2xf32>,
    return
  }
  func.func @transform_0(%arg0: i32) -> (i32, i32, i32) {
    %c0_i32 = arith.constant 0 : i32
    %c0_i32_0 = arith.constant 0 : i32
    %c0_i32_1 = arith.constant 0 : i32
    return %arg0, %c0_i32, %c0_i32_0 : i32, i32, i32
  }
  func.func @transform_1(%arg0: i32) -> (i32, i32) {
    %c0_i32 = arith.constant 0 : i32
    %c0_i32_0 = arith.constant 0 : i32
    %c0_i32_1 = arith.constant 0 : i32
    return %c0_i32, %c0_i32_0 : i32, i32
  }
  func.func @transform_2(%arg0: i32) -> (i32, i32) {
    %c0_i32 = arith.constant 0 : i32
    %c0_i32_0 = arith.constant 0 : i32
    %c0_i32_1 = arith.constant 0 : i32
    return %c0_i32, %c0_i32_0 : i32, i32
  }
  func.func @transform_3(%arg0: i32) -> (i32, i32) {
    %c0_i32 = arith.constant 0 : i32
    %c0_i32_0 = arith.constant 0 : i32
    %c0_i32_1 = arith.constant 0 : i32
    return %c0_i32, %c0_i32_0 : i32, i32
  }
  func.func @transform_4(%arg0: i32) -> (i32, i32) {
    %c0_i32 = arith.constant 0 : i32
    %c0_i32_0 = arith.constant 0 : i32
    %c0_i32_1 = arith.constant 0 : i32
    return %c0_i32, %c0_i32_0 : i32, i32
  }
  func.func @transform_5(%arg0: i32) -> (i32, i32) {
    %c0_i32 = arith.constant 0 : i32
    %c0_i32_0 = arith.constant 0 : i32
    %c0_i32_1 = arith.constant 0 : i32
    return %c0_i32, %c0_i32_0 : i32, i32
  }
  func.func @transform_6(%arg0: i32) -> (i32, i32, i32) {
    %c0_i32 = arith.constant 0 : i32
    %c0_i32_0 = arith.constant 0 : i32
    %c0_i32_1 = arith.constant 0 : i32
    return %arg0, %c0_i32, %c0_i32_0 : i32, i32, i32
  }
  func.func @transform_7(%arg0: i32) -> (i32, i32, i32) {
    %c0_i32 = arith.constant 0 : i32
    %c0_i32_0 = arith.constant 0 : i32
    %c0_i32_1 = arith.constant 0 : i32
    return %arg0, %c0_i32, %c0_i32_0 : i32, i32, i32
  }
}

</mosaic_0001>

<bundles_post_ra>
// kernel: deconv_forward.3
= control target key start
LH: loop header
LB: loop body
LE: loop exit
PB: predicated region body
PF: predicated region fallthrough
CT: control target
= control target key end

     0   :  { %s2539_s24 = smov 0   ;;  %s3881_s0 = inlined_call_operand.vmem [shape: f32[2,4,2304], index: 0, kind: input, shape index: {}]   ;;  %s3882_s1 = inlined_call_operand.vmem [shape: f32[4,1], index: 1, kind: input, shape index: {}]   ;;  %s3883_s2 = inlined_call_operand.vmem [shape: f32[4,1], index: 2, kind: input, shape index: {}]   ;;  %s3884_s3 = inlined_call_operand.vmem [shape: f32[1,2304], index: 3, kind: input, shape index: {}]   ;;  %s3885_s4 = inlined_call_operand.vmem [shape: f32[4,36], index: 4, kind: input, shape index: {}]   ;;  %s3886_s5 = inlined_call_operand.vmem [shape: f32[4,1], index: 5, kind: input, shape index: {}]   ;;  %s3887_s6 = inlined_call_operand.vmem [shape: f32[2,4,2304], index: 6, kind: output, shape index: {0}]   ;;  %s3888_s7 = inlined_call_operand.vmem [shape: f32[2,4,2], index: 7, kind: output, shape index: {1}]  }
   0x1 LB: > { %s2408_s25 = sadd.s32 4294967295, %s2491_s24   ;;  %p2412_p0 = scmp.ge.s32.totalorder %s2491_s24, 1  ;;  %s2491_s24 = sphi %s2539_s24, %s18_s24  }
   0x2   : > { %p240_p1 = scmp.lt.s32.totalorder %s2491_s24, 3 }
   0x4   : > { %p241_p2 = pnand %p2412_p0, %p240_p1 }
   0x6   : > { %244 = sbr.rel (%p241_p2) target bundleno = 978 (0x3d2), region = 44 }
   0xb   : > { %v301_v0 = vld [vmem:[%s3882_s1] sm:$0xf]  ;;  %v2493_v1 = vmov 0   ;;  %v3889_v3 = vmov 0.0   ;;  %p276_p3 = scmp.lt.s32.totalorder %s2408_s25, 1  ;;  %v309_v4 = vlaneseq  ;;  %v355_v18 = vld [vmem:[%s3884_s3 + $0x8] sm:$0xff] }
   0xc   : > { %2460 = vset.pattern.permute.xlu0 %v2493_v1  ;;  %2461 = vset.pattern.permute.xlu1 %v2493_v1  ;;  %v323_v2 = vld [vmem:[%s3883_s2] sm:$0xf]  ;;  %290 = vst [vmem:[#allocation2] sm:$0xff] %v3889_v3  ;;  %291 = vst [vmem:[#allocation2 + $0x50] sm:$0xff] %v3889_v3  ;;  %v2495_v5 = vmov 839922192  }
   0xd   : > { %304 = vperm.xlu0 %2460, %v301_v0   ;;  %1493 = vmatprep.mubr.f32.mxu0 %v3889_v3  ;;  %v307_v6 = vunpack.c.l.s4 %v2495_v5  ;;  %s4008_s25 = smov (!%p276_p3, %s2408_s25), 1  ;;  %v310_v7 = vshrl.u32 %v309_v4, 7  ;;  %v354_v13 = vld [vmem:[%s3884_s3] sm:$0xff]  ;;  %v2606_v37 = vld [vmem:[%s3884_s3 + $0x10] sm:$0x3]  ;;  %s2496_s17 = smov 126  }
   0xe   : > { %1564 = vmatprep.mubr.f32.mxu1 %v3889_v3  ;;  %s2445_s30 = smul.u32 72, %s4008_s25  ;;  %s2497_s18 = smov 127   ;;  %vm965_vm0 = vcmask 1043456   ;;  %vm668_vm1 = vcmask 1031168   ;;  %vm583_vm2 = vcmask 1039360   ;;  %vm1254_vm3 = vcmask 7168  }
   0xf   : > { %v308_v8 = vunpack.c.0.s8 %v307_v6  ;;  %v2559_v9 = vsub.s32 2, %v310_v7  ;;  %v2561_v10 = vsub.s32 3, %v310_v7  ;;  %v2563_v11 = vsub.s32 4, %v310_v7  ;;  %s2498_s19 = smov 1   ;;  %s2415_s12 = sshll.u32 %s4008_s25, 2 }
  0x10   : > { %v2565_v12 = vsub.s32 5, %v310_v7  ;;  %v2571_v14 = vsub.s32 0, %v310_v7  ;;  %v2573_v15 = vsub.s32 1, %v310_v7  ;;  %v2575_v16 = vsub.s32 6, %v310_v7  ;;  %s280_s14 = scalar_lea.vmem %s3881_s0, %s2445_s30  ;;  %s3772_s8 = scalar_lea.vmem %s3887_s6, %s2445_s30 }
  0x11   : > { %326 = vperm.xlu0 %2460, %v323_v2   ;;  %3934 = vst [vmem:[#allocation3_spill] sm:$0xff] %v2559_v9  ;;  %3935 = vst [vmem:[#allocation4_spill] sm:$0xff] %v2561_v10  ;;  %v2577_v17 = vsub.s32 7, %v310_v7  ;;  %v311_v19 = vsub.s32 %v308_v8, %v310_v7  ;;  %v371_v20 = vrot.slane %v354_v13, %v2559_v9  ;;  %v295_v38 = vld [vmem:[%s280_s14 + $0x18] sm:$0xff]  ;;  %v296_v39 = vld [vmem:[%s280_s14 + $0x20] sm:$0xff]  ;;  %vm1389_vm4 = vcmask 293888   ;;  %s289_s15 = scalar_lea.vmem %s3888_s7, %s2415_s12 }
  0x12   : > { %3936 = vst [vmem:[#allocation5_spill] sm:$0xff] %v2563_v11  ;;  %3937 = vst [vmem:[#allocation6_spill] sm:$0xff] %v2565_v12  ;;  %v375_v21 = vrot.slane %v354_v13, %v2561_v10  ;;  %v379_v22 = vrot.slane %v354_v13, %v2563_v11  ;;  %v383_v23 = vrot.slane %v354_v13, %v2565_v12  ;;  %v297_v40 = vld [vmem:[%s280_s14 + $0x28] sm:$0xff]  ;;  %v294_v43 = vld [vmem:[%s280_s14 + $0x10] sm:$0xff]  ;;  %vm2320_vm5 = vcmask 11264  }
  0x13   : > { %3938 = vst [vmem:[#allocation7_spill] sm:$0xff] %v2571_v14  ;;  %3939 = vst [vmem:[#allocation8_spill] sm:$0xff] %v2573_v15  ;;  %v363_v24 = vrot.slane %v354_v13, %v2571_v14  ;;  %v367_v25 = vrot.slane %v354_v13, %v2573_v15  ;;  %v395_v26 = vrot.slane %v355_v18, %v2571_v14  ;;  %v293_v42 = vld [vmem:[%s280_s14 + $0x8] sm:$0xff]  ;;  %v292_v46 = vld [vmem:[%s280_s14] sm:$0xff] }
  0x14   : > { %3940 = vst [vmem:[#allocation9_spill] sm:$0xff] %v2575_v16  ;;  %3941 = vst [vmem:[#allocation10_spill] sm:$0xff] %v2577_v17  ;;  %v399_v27 = vrot.slane %v355_v18, %v2573_v15  ;;  %v387_v28 = vrot.slane %v354_v13, %v2575_v16  ;;  %v391_v29 = vrot.slane %v354_v13, %v2577_v17  ;;  %v298_v49 = vld [vmem:[%s280_s14 + $0x30] sm:$0xff]  ;;  %v299_v50 = vld [vmem:[%s280_s14 + $0x38] sm:$0xff] }
  0x15   : > { %v403_v30 = vrot.slane %v355_v18, %v2559_v9  ;;  %v407_v31 = vrot.slane %v355_v18, %v2561_v10  ;;  %v411_v33 = vrot.slane %v355_v18, %v2563_v11  ;;  %v415_v34 = vrot.slane %v355_v18, %v2565_v12  ;;  %v300_v53 = vld [vmem:[%s280_s14 + $0x40] sm:$0xff] }
  0x16   : > { %v419_v35 = vrot.slane %v355_v18, %v2575_v16  ;;  %v423_v36 = vrot.slane %v355_v18, %v2577_v17  ;;  %v433_v44 = vcombine.low %v371_v20, %v375_v21  ;;  %v434_v45 = vcombine.low %v379_v22, %v383_v23 }
  0x17   : > { %v432_v47 = vcombine.low %v363_v24, %v367_v25  ;;  %v436_v48 = vcombine.low %v395_v26, %v399_v27  ;;  %v435_v51 = vcombine.low %v387_v28, %v391_v29  ;;  %v437_v52 = vcombine.low %v403_v30, %v407_v31 }
  0x18   : > { %v427_v54 = vrot.slane %v2606_v37, %v2571_v14  ;;  %v431_v55 = vrot.slane %v2606_v37, %v2573_v15  ;;  %v438_v59 = vcombine.low %v411_v33, %v415_v34  ;;  %v439_v60 = vcombine.low %v419_v35, %v423_v36 }
  0x88   : > { %v305_v32 = vpop.permute.xlu0 %304 }
  0x89   : > { %v312_v41 = vrot.slane %v305_v32, %v311_v19 }
  0x8b   : > { %v317_v56 = vmul.f32 %v312_v41, %v295_v38  ;;  %v318_v57 = vmul.f32 %v312_v41, %v296_v39  ;;  %v315_v62 = vmul.f32 %v312_v41, %v293_v42  ;;  %v316_v63 = vmul.f32 %v312_v41, %v294_v43 }
  0x8c   : > { %v327_v58 = vpop.permute.xlu0 %326  ;;  %v314_v0 = vmul.f32 %v312_v41, %v292_v46  ;;  %v319_v1 = vmul.f32 %v312_v41, %v297_v40  ;;  %v320_v2 = vmul.f32 %v312_v41, %v298_v49  ;;  %v321_v4 = vmul.f32 %v312_v41, %v299_v50 }
  0x8d   : > { %v334_v61 = vrot.slane %v327_v58, %v311_v19  ;;  %v322_v5 = vmul.f32 %v312_v41, %v300_v53  ;;  %v440_v39 = vcombine.low %v427_v54, %v431_v55 }
  0x8f   : > { %v337_v6 = vadd.f32 %v334_v61, %v315_v62  ;;  %v338_v7 = vadd.f32 %v334_v61, %v316_v63  ;;  %v336_v8 = vadd.f32 %v334_v61, %v314_v0  ;;  %v339_v13 = vadd.f32 %v334_v61, %v317_v56 }
  0x90   : > { %v340_v18 = vadd.f32 %v334_v61, %v318_v57  ;;  %v341_v20 = vadd.f32 %v334_v61, %v319_v1  ;;  %v342_v21 = vadd.f32 %v334_v61, %v320_v2  ;;  %v343_v22 = vadd.f32 %v334_v61, %v321_v4 }
  0x91   : > { %v346_v23 = vmax.f32 %v337_v6, 0.0  ;;  %v347_v24 = vmax.f32 %v338_v7, 0.0  ;;  %v345_v25 = vmax.f32 %v336_v8, 0.0  ;;  %v348_v26 = vmax.f32 %v339_v13, 0.0 }
  0x92   : > { %v349_v19 = vmax.f32 %v340_v18, 0.0  ;;  %v350_v27 = vmax.f32 %v341_v20, 0.0  ;;  %v351_v28 = vmax.f32 %v342_v21, 0.0  ;;  %v352_v29 = vmax.f32 %v343_v22, 0.0 }
  0x93   : > { %v2612_v30 = vmul.f32 %v433_v44, %v346_v23  ;;  %v2614_v31 = vmul.f32 %v434_v45, %v347_v24  ;;  %v2616_v32 = vmul.f32 %v432_v47, %v345_v25  ;;  %v2618_v33 = vmul.f32 %v435_v51, %v348_v26 }
  0x94   : > { %v2620_v34 = vmul.f32 %v436_v48, %v349_v19  ;;  %v2622_v35 = vmul.f32 %v437_v52, %v350_v27  ;;  %v2624_v36 = vmul.f32 %v438_v59, %v351_v28  ;;  %v2626_v37 = vmul.f32 %v439_v60, %v352_v29 }
  0x95   : > { %460 = vst [vmem:[#allocation2 + $0x10] sm:$0xff] %v2612_v30  ;;  %461 = vst [vmem:[#allocation2 + $0x18] sm:$0xff] %v2614_v31  ;;  %v344_v38 = vadd.f32 %v334_v61, %v322_v5  ;;  %v2726_v53 = vcombine.high %v2616_v32, %v2616_v32  ;;  %v792_v54 = vcombine.low %v2616_v32, %v2616_v32 }
  0x96   : > { %3942 = vst [vmem:[#allocation11_spill] sm:$0xff] %v2624_v36  ;;  %3943 = vst [vmem:[#allocation12_spill] sm:$0xff] %v2626_v37  ;;  %v793_v55 = vcombine.low %v2612_v30, %v2612_v30  ;;  %v2762_v59 = vcombine.high %v2612_v30, %v2612_v30  ;;  %v2784_v63 = vcombine.high %v2614_v31, %v2614_v31 }
  0x97   : > { %459 = vst [vmem:[#allocation2 + $0x8] sm:$0xff] %v2616_v32  ;;  %462 = vst [vmem:[#allocation2 + $0x20] sm:$0xff] %v2618_v33  ;;  %v353_v40 = vmax.f32 %v344_v38, 0.0  ;;  %v794_v0 = vcombine.low %v2614_v31, %v2614_v31  ;;  %v795_v4 = vcombine.low %v2618_v33, %v2618_v33  ;;  %v2807_v5 = vcombine.high %v2618_v33, %v2618_v33 }
  0x98   : > { %463 = vst [vmem:[#allocation2 + $0x28] sm:$0xff] %v2620_v34  ;;  %464 = vst [vmem:[#allocation2 + $0x30] sm:$0xff] %v2622_v35  ;;  %v796_v18 = vcombine.low %v2620_v34, %v2620_v34  ;;  %v2839_v23 = vcombine.high %v2620_v34, %v2620_v34  ;;  %v797_v26 = vcombine.low %v2622_v35, %v2622_v35 }
  0x99   : > { %465 = vst [vmem:[#allocation2 + $0x38] sm:$0xff] %v2624_v36  ;;  %466 = vst [vmem:[#allocation2 + $0x40] sm:$0xff] %v2626_v37  ;;  %v2636_v41 = vmul.f32 %v440_v39, %v353_v40  ;;  %v798_v40 = vcombine.low %v2624_v36, %v2624_v36 }
  0x9b   : > { %3944 = vst [vmem:[#allocation13_spill] sm:$0xff] %v2636_v41  ;;  %467 = vst [vmem:[#allocation2 + $0x48] sm:$0xff] %v2636_v41 }
  0x9c   : > { %v2638_v42 = vld [vmem:[#allocation2 + $0x14] sm:$0xff] }
  0x9d   : > { %913 = vrot.lane.b32.xlu0 %v2638_v42, %s2496_s17  ;;  %v2718_v52 = vcombine.low %v2638_v42, %v2638_v42  ;;  %v901_v57 = vcombine.high %v2638_v42, %v2638_v42 }
  0x9e   : > { %v2640_v43 = vld [vmem:[#allocation2 + $0xc] sm:$0xff]  ;;  %v2655_v44 = vld [vmem:[#allocation2 + $0x1c] sm:$0xff]  ;;  %v2667_v46 = vld [vmem:[#allocation2 + $0x4] sm:$0xff] }
  0x9f   : > { %909 = vrot.lane.b32.xlu1 %v2640_v43, %s2496_s17  ;;  %v2665_v45 = vld [vmem:[#allocation2 + $0x24] sm:$0xff]  ;;  %v2677_v47 = vld [vmem:[#allocation2 + $0x2c] sm:$0xff]  ;;  %v900_v50 = vcombine.high %v2640_v43, %v2640_v43  ;;  %v2710_v51 = vcombine.low %v2640_v43, %v2640_v43  ;;  %v621_v56 = vcombine.high %v2667_v46, %v2667_v46  ;;  %v2754_v58 = vcombine.low %v2667_v46, %v2667_v46 }
  0xa0   : > { %3945 = vst [vmem:[#allocation14_spill] sm:$0xff] %v2665_v45  ;;  %3946 = vst [vmem:[#allocation15_spill] sm:$0xff] %v2677_v47  ;;  %v2687_v48 = vld [vmem:[#allocation2 + $0x34] sm:$0xff]  ;;  %v2697_v49 = vld [vmem:[#allocation2 + $0x3c] sm:$0xff]  ;;  %v902_v60 = vcombine.high %v2655_v44, %v2655_v44  ;;  %v2780_v62 = vcombine.low %v2655_v44, %v2655_v44  ;;  %v903_v1 = vcombine.high %v2665_v45, %v2665_v45 }
  0xa1   : > { %553 = vrot.lane.b32.xlu0 %v2640_v43, %s2497_s18  ;;  %3947 = vst [vmem:[#allocation16_spill] sm:$0xff] %v2687_v48  ;;  %3948 = vst [vmem:[#allocation17_spill] sm:$0xff] %v2697_v49  ;;  %v2798_v2 = vcombine.low %v2665_v45, %v2665_v45  ;;  %v904_v6 = vcombine.high %v2677_v47, %v2677_v47  ;;  %v2816_v7 = vcombine.low %v2677_v47, %v2677_v47 }
  0xa2   : > { %v2770_v61 = vld [vmem:[#allocation2 + $0x44] sm:$0xff]  ;;  %v2835_v22 = vcombine.low %v2687_v48, %v2687_v48  ;;  %v905_v19 = vcombine.high %v2687_v48, %v2687_v48  ;;  %v2861_v29 = vcombine.low %v2697_v49, %v2697_v49  ;;  %v499_v16 = vld [vmem:[#allocation2 + $0x4c] sm:$0xff] }
  0xa3   : > { %557 = vrot.lane.b32.xlu1 %v2638_v42, %s2497_s18  ;;  %3949 = vst [vmem:[#allocation18_spill] sm:$0xff] %v2770_v61  ;;  %3950 = vst [vmem:[#allocation19_spill] sm:$0xff] %v2816_v7  ;;  %v879_v10 = vcombine.low %v499_v16, %v499_v16 }
  0xa4   : > { %3951 = vst [vmem:[#allocation20_spill] sm:$0xff] %v2835_v22  ;;  %3952 = vst [vmem:[#allocation21_spill] sm:$0xff] %v2861_v29 }
  0xa5   : > { %719 = vrot.lane.b32.xlu0 %v2616_v32, %s2497_s18 }
  0xa7   : > { %808 = vrot.lane.b32.xlu1 %v2612_v30, %s2496_s17 }
  0xa9   : > { %723 = vrot.lane.b32.xlu0 %v2612_v30, %s2497_s18 }
  0xab   : > { %561 = vrot.lane.b32.xlu1 %v2655_v44, %s2497_s18 }
  0xad   : > { %804 = vrot.lane.b32.xlu0 %v2616_v32, %s2496_s17 }
  0xaf   : > { %812 = vrot.lane.b32.xlu1 %v2614_v31, %s2496_s17 }
  0xb1   : > { %630 = vrot.lane.b32.xlu0 %v2667_v46, %s2496_s17 }
  0xb3   : > { %565 = vrot.lane.b32.xlu1 %v2665_v45, %s2497_s18 }
  0xb5   : > { %634 = vrot.lane.b32.xlu0 %v2640_v43, %s2496_s17 }
  0xb7   : > { %816 = vrot.lane.b32.xlu1 %v2618_v33, %s2496_s17 }
  0xb9   : > { %917 = vrot.lane.b32.xlu0 %v2655_v44, %s2496_s17 }
  0xbb   : > { %569 = vrot.lane.b32.xlu1 %v2677_v47, %s2497_s18 }
  0xbd   : > { %549 = vrot.lane.b32.xlu0 %v2667_v46, %s2497_s18 }
  0xbf   : > { %820 = vrot.lane.b32.xlu1 %v2620_v34, %s2496_s17 }
  0xc1   : > { %727 = vrot.lane.b32.xlu0 %v2614_v31, %s2497_s18 }
  0xc3   : > { %573 = vrot.lane.b32.xlu1 %v2687_v48, %s2497_s18 }
  0xc5   : > { %921 = vrot.lane.b32.xlu0 %v2665_v45, %s2496_s17 }
  0xc7   : > { %824 = vrot.lane.b32.xlu1 %v2622_v35, %s2496_s17 }
  0xc9   : > { %638 = vrot.lane.b32.xlu0 %v2638_v42, %s2496_s17 }
  0xcb   : > { %577 = vrot.lane.b32.xlu1 %v2697_v49, %s2497_s18 }
  0xcd   : > { %731 = vrot.lane.b32.xlu0 %v2618_v33, %s2497_s18 }
  0xcf   : > { %911 = vrot.lane.b32.xlu1 %v900_v50, %s2496_s17 }
  0xd1   : > { %642 = vrot.lane.b32.xlu0 %v2655_v44, %s2496_s17 }
  0xd3   : > { %551 = vrot.lane.b32.xlu1 %v2710_v51, %s2497_s18 }
  0xd5   : > { %925 = vrot.lane.b32.xlu0 %v2677_v47, %s2496_s17 }
  0xd7   : > { %555 = vrot.lane.b32.xlu1 %v2718_v52, %s2497_s18 }
  0xd9   : > { %735 = vrot.lane.b32.xlu0 %v2620_v34, %s2497_s18 }
  0xdb   : > { %721 = vrot.lane.b32.xlu1 %v2726_v53, %s2497_s18 }
  0xdd   : > { %929 = vrot.lane.b32.xlu0 %v2687_v48, %s2496_s17 }
  0xdf   : > { %802 = vrot.lane.b32.xlu1 %v792_v54, %s2496_s17  ;;  %v906_v54 = vcombine.high %v2697_v49, %v2697_v49 }
  0xe1   : > { %646 = vrot.lane.b32.xlu0 %v2665_v45, %s2496_s17 }
  0xe3   : > { %806 = vrot.lane.b32.xlu1 %v793_v55, %s2496_s17 }
  0xe5   : > { %739 = vrot.lane.b32.xlu0 %v2622_v35, %s2497_s18 }
  0xe7   : > { %632 = vrot.lane.b32.xlu1 %v621_v56, %s2496_s17 }
  0xe9   : > { %650 = vrot.lane.b32.xlu0 %v2677_v47, %s2496_s17  ;;  %v908_v47 = vcombine.high %v499_v16, %v499_v16 }
  0xeb   : > { %915 = vrot.lane.b32.xlu1 %v901_v57, %s2496_s17 }
  0xed   : > { %933 = vrot.lane.b32.xlu0 %v2697_v49, %s2496_s17 }
  0xef   : > { %547 = vrot.lane.b32.xlu1 %v2754_v58, %s2497_s18 }
  0xf1   : > { %743 = vrot.lane.b32.xlu0 %v2624_v36, %s2497_s18 }
  0xf3   : > { %725 = vrot.lane.b32.xlu1 %v2762_v59, %s2497_s18 }
  0xf5   : > { %937 = vrot.lane.b32.xlu0 %v2770_v61, %s2496_s17 }
  0xf7   : > { %919 = vrot.lane.b32.xlu1 %v902_v60, %s2496_s17 }
  0xf9   : > { %654 = vrot.lane.b32.xlu0 %v2687_v48, %s2496_s17 }
  0xfb   : > { %636 = vrot.lane.b32.xlu1 %v900_v50, %s2496_s17  ;;  %v2874_v50 = vcombine.high %v2622_v35, %v2622_v35 }
  0xfd   : > { %559 = vrot.lane.b32.xlu0 %v2780_v62, %s2497_s18  ;;  %3953 = vst [vmem:[#allocation22_spill] sm:$0xff] %v2874_v50 }
  0xff   : > { %729 = vrot.lane.b32.xlu1 %v2784_v63, %s2497_s18 }
 0x101   : > { %810 = vrot.lane.b32.xlu0 %v794_v0, %s2496_s17 }
 0x103   : > { %640 = vrot.lane.b32.xlu1 %v901_v57, %s2496_s17  ;;  %v2887_v57 = vcombine.low %v2770_v61, %v2770_v61 }
 0x105   : > { %563 = vrot.lane.b32.xlu0 %v2798_v2, %s2497_s18  ;;  %3954 = vst [vmem:[#allocation23_spill] sm:$0xff] %v2887_v57 }
 0x107   : > { %923 = vrot.lane.b32.xlu1 %v903_v1, %s2496_s17 }
 0x109   : > { %814 = vrot.lane.b32.xlu0 %v795_v4, %s2496_s17 }
 0x10b   : > { %733 = vrot.lane.b32.xlu1 %v2807_v5, %s2497_s18 }
 0x10d   : > { %567 = vrot.lane.b32.xlu0 %v2816_v7, %s2497_s18 }
 0x10f   : > { %927 = vrot.lane.b32.xlu1 %v904_v6, %s2496_s17  ;;  %v2821_v8 = vpop.permute.xlu0 %913 }
 0x111   : > { %v2823_v13 = vpop.permute.xlu1 %909  ;;  %818 = vrot.lane.b32.xlu0 %v796_v18, %s2496_s17  ;;  %v799_v18 = vcombine.low %v2626_v37, %v2626_v37 }
 0x113   : > { %644 = vrot.lane.b32.xlu1 %v902_v60, %s2496_s17  ;;  %v2831_v21 = vpop.permute.xlu0 %553 }
 0x115   : > { %v2829_v20 = vpop.permute.xlu1 %557  ;;  %571 = vrot.lane.b32.xlu0 %v2835_v22, %s2497_s18 }
 0x117   : > { %737 = vrot.lane.b32.xlu1 %v2839_v23, %s2497_s18  ;;  %v2847_v25 = vpop.permute.xlu0 %719 }
 0x119   : > { %v2845_v24 = vpop.permute.xlu1 %808  ;;  %822 = vrot.lane.b32.xlu0 %v797_v26, %s2496_s17  ;;  %v2907_v26 = vcombine.high %v2624_v36, %v2624_v36 }
 0x11b   : > { %648 = vrot.lane.b32.xlu1 %v903_v1, %s2496_s17  ;;  %v2857_v28 = vpop.permute.xlu0 %723  ;;  %3955 = vst [vmem:[#allocation24_spill] sm:$0xff] %v2907_v26 }
 0x11d   : > { %v2855_v27 = vpop.permute.xlu1 %561  ;;  %575 = vrot.lane.b32.xlu0 %v2861_v29, %s2497_s18 }
 0x11f   : > { %931 = vrot.lane.b32.xlu1 %v905_v19, %s2496_s17  ;;  %v2868_v39 = vpop.permute.xlu0 %804 }
 0x121   : > { %v2866_v38 = vpop.permute.xlu1 %812  ;;  %826 = vrot.lane.b32.xlu0 %v798_v40, %s2496_s17 }
 0x123   : > { %741 = vrot.lane.b32.xlu1 %v2874_v50, %s2497_s18  ;;  %v2883_v56 = vpop.permute.xlu0 %630 }
 0x125   : > { %v2881_v55 = vpop.permute.xlu1 %565  ;;  %579 = vrot.lane.b32.xlu0 %v2887_v57, %s2497_s18  ;;  %v500_v57 = vld [vmem:[#allocation2 + $0x54] sm:$0xf] }
 0x127   : > { %935 = vrot.lane.b32.xlu1 %v906_v54, %s2496_s17  ;;  %v2894_v0 = vpop.permute.xlu0 %634 }
 0x129   : > { %v2892_v60 = vpop.permute.xlu1 %816  ;;  %747 = vrot.lane.b32.xlu0 %v2626_v37, %s2497_s18 }
 0x12b   : > { %652 = vrot.lane.b32.xlu1 %v904_v6, %s2496_s17  ;;  %v2901_v4 = vpop.permute.xlu0 %917 }
 0x12d   : > { %v2899_v1 = vpop.permute.xlu1 %569  ;;  %830 = vrot.lane.b32.xlu0 %v799_v18, %s2496_s17  ;;  %v907_v18 = vcombine.high %v2770_v61, %v2770_v61 }
 0x12f   : > { %745 = vrot.lane.b32.xlu1 %v2907_v26, %s2497_s18  ;;  %v2914_v3 = vpop.permute.xlu0 %549 }
 0x131   : > { %v2912_v40 = vpop.permute.xlu1 %820  ;;  %658 = vrot.lane.b32.xlu0 %v2697_v49, %s2496_s17  ;;  %v800_v49 = vcombine.low %v2636_v41, %v2636_v41 }
 0x132   : > { %3956 = vst [vmem:[#allocation25_spill] sm:$0xff] %v2912_v40 }
 0x133   : > { %828 = vrot.lane.b32.xlu1 %v2624_v36, %s2496_s17  ;;  %v2922_v17 = vpop.permute.xlu0 %727  ;;  %v2992_v36 = vld [vmem:[#allocation2 + $0x4c] sm:$0xf] }
 0x134   : > { %3963 = vst [vmem:[#allocation32_spill] sm:$0xff] %v2992_v36 }
 0x135   : > { %v2920_v6 = vpop.permute.xlu1 %573  ;;  %941 = vrot.lane.b32.xlu0 %v499_v16, %s2496_s17 }
 0x136   : > { %3957 = vst [vmem:[#allocation26_spill] sm:$0xff] %v2920_v6 }
 0x137   : > { %656 = vrot.lane.b32.xlu1 %v905_v19, %s2496_s17  ;;  %v2930_v11 = vpop.permute.xlu0 %921 }
 0x139   : > { %v2928_v12 = vpop.permute.xlu1 %824  ;;  %880 = vrot.lane.b32.xlu0 %v879_v10, %s2497_s18  ;;  %v2948_v10 = vcombine.high %v2626_v37, %v2626_v37 }
 0x13a   : > { %3958 = vst [vmem:[#allocation27_spill] sm:$0xff] %v2928_v12 }
 0x13b   : > { %939 = vrot.lane.b32.xlu1 %v907_v18, %s2496_s17  ;;  %v2936_v15 = vpop.permute.xlu0 %638  ;;  %3960 = vst [vmem:[#allocation29_spill] sm:$0xff] %v2948_v10 }
 0x13d   : > { %v2934_v9 = vpop.permute.xlu1 %577  ;;  %751 = vrot.lane.b32.xlu0 %v2636_v41, %s2497_s18 }
 0x13e   : > { %3959 = vst [vmem:[#allocation28_spill] sm:$0xff] %v2934_v9 }
 0x13f   : > { %581 = vrot.lane.b32.xlu1 %v2770_v61, %s2497_s18  ;;  %v2942_v14 = vpop.permute.xlu0 %731 }
 0x141   : > { %v912_v19 = vpop.permute.xlu1 %911  ;;  %834 = vrot.lane.b32.xlu0 %v800_v49, %s2496_s17  ;;  %v2967_v49 = vld [vmem:[#allocation2 + $0x50] sm:$0xf] }
 0x142   : > { %3961 = vst [vmem:[#allocation30_spill] sm:$0xff] %v2967_v49 }
 0x143   : > { %749 = vrot.lane.b32.xlu1 %v2948_v10, %s2497_s18  ;;  %v2955_v29 = vpop.permute.xlu0 %642 }
 0x145   : > { %v2953_v48 = vpop.permute.xlu1 %551  ;;  %945 = vrot.lane.b32.xlu0 %v500_v57, %s2496_s17  ;;  %v2975_v57 = vcombine.high %v2636_v41, %v2636_v41 }
 0x147   : > { %832 = vrot.lane.b32.xlu1 %v2626_v37, %s2496_s17  ;;  %v2962_v26 = vpop.permute.xlu0 %925  ;;  %3962 = vst [vmem:[#allocation31_spill] sm:$0xff] %v2975_v57 }
 0x149   : > { %v2960_v22 = vpop.permute.xlu1 %555  ;;  %662 = vrot.lane.b32.xlu0 %v2770_v61, %s2496_s17  ;;  %v801_v61 = vcombine.low %v2967_v49, %v2967_v49  ;;  %v948_v49 = vsel %vm668_vm1, %v912_v19, %v2821_v8 }
 0x14b   : > { %943 = vrot.lane.b32.xlu1 %v908_v47, %s2496_s17  ;;  %v2969_v10 = vpop.permute.xlu0 %735 }
 0x14d   : > { %v2971_v9 = vpop.permute.xlu1 %721  ;;  %753 = vrot.lane.b32.xlu0 %v2975_v57, %s2497_s18 }
 0x14f   : > { %660 = vrot.lane.b32.xlu1 %v906_v54, %s2496_s17  ;;  %v2982_v37 = vpop.permute.xlu0 %929 }
 0x151   : > { %v2984_v47 = vpop.permute.xlu1 %802  ;;  %838 = vrot.lane.b32.xlu0 %v801_v61, %s2496_s17 }
 0x153   : > { %882 = vrot.lane.b32.xlu1 %v499_v16, %s2497_s18  ;;  %v2988_v12 = vpop.permute.xlu0 %646  ;;  %v985_v16 = vsel %vm965_vm0, %v2883_v56, %v2754_v58 }
 0x155   : > { %v2990_v50 = vpop.permute.xlu1 %806  ;;  %666 = vrot.lane.b32.xlu0 %v2992_v36, %s2496_s17 }
 0x157   : > { %836 = vrot.lane.b32.xlu1 %v2636_v41, %s2496_s17  ;;  %v2998_v54 = vpop.permute.xlu0 %739 }
 0x158   : > { %3964 = vst [vmem:[#allocation33_spill] sm:$0xff] %v2998_v54 }
 0x159   : > { %v3000_v57 = vpop.permute.xlu1 %632  ;;  %1132 = vrot.lane.b32.xlu0 %v985_v16, %s2498_s19  ;;  %v1023_v16 = vsel %vm965_vm0, %v2616_v32, %v2953_v48 }
 0x15b   : > { %664 = vrot.lane.b32.xlu1 %v907_v18, %s2496_s17  ;;  %v3007_v61 = vpop.permute.xlu0 %650  ;;  %v947_v18 = vsel %vm668_vm1, %v2823_v13, %v912_v19 }
 0x15c   : > { %3965 = vst [vmem:[#allocation34_spill] sm:$0xff] %v3007_v61 }
 0x15d   : > { %v916_v36 = vpop.permute.xlu1 %915  ;;  %1220 = vrot.lane.b32.xlu0 %v948_v49, %s2498_s19 }
 0x15e   : > { %v949_v45 = vsel %vm668_vm1, %v2821_v8, %v916_v36 }
 0x15f   : > { %1216 = vrot.lane.b32.xlu1 %v2823_v13, %s2498_s19  ;;  %v3014_v41 = vpop.permute.xlu0 %933 }
 0x160   : > { %3966 = vst [vmem:[#allocation35_spill] sm:$0xff] %v3014_v41  ;;  %v1004_v41 = vsel %vm965_vm0, %v2847_v25, %v2984_v47 }
 0x161   : > { %v548_v58 = vpop.permute.xlu1 %547  ;;  %1208 = vrot.lane.b32.xlu0 %v1023_v16, %s2498_s19  ;;  %v950_v16 = vsel %vm668_vm1, %v916_v36, %v2901_v4 }
 0x163   : > { %1218 = vrot.lane.b32.xlu1 %v947_v18, %s2498_s19  ;;  %v3023_v6 = vpop.permute.xlu0 %743 }
 0x164   : > { %3967 = vst [vmem:[#allocation36_spill] sm:$0xff] %v3023_v6 }
 0x165   : > { %v3025_v49 = vpop.permute.xlu1 %725  ;;  %1222 = vrot.lane.b32.xlu0 %v949_v45, %s2498_s19 }
 0x167   : > { %1170 = vrot.lane.b32.xlu1 %v1004_v41, %s2498_s19  ;;  %v3034_v13 = vpop.permute.xlu0 %937  ;;  %v966_v41 = vsel %vm965_vm0, 0.0, %v548_v58 }
 0x168   : > { %3968 = vst [vmem:[#allocation37_spill] sm:$0xff] %v3034_v13 }
 0x169   : > { %v920_v19 = vpop.permute.xlu1 %919 }
 0x16a   : > { %v951_v18 = vsel %vm668_vm1, %v2901_v4, %v920_v19  ;;  %v952_v36 = vsel %vm668_vm1, %v920_v19, %v2930_v11  ;;  %v587_v19 = vsel %vm583_vm2, %v2831_v21, %v2960_v22 }
 0x16b   : > { %1224 = vrot.lane.b32.xlu1 %v950_v16, %s2498_s19  ;;  %1226 = vrot.lane.b32.xlu0 %v951_v18, %s2498_s19  ;;  %v3042_v6 = vpop.permute.xlu0 %654  ;;  %v970_v40 = vsel %vm965_vm0, %v2612_v30, %v587_v19  ;;  %v756_v30 = vsel %vm583_vm2, %v2971_v9, %v2857_v28 }
 0x16c   : > { %3969 = vst [vmem:[#allocation38_spill] sm:$0xff] %v3042_v6 }
 0x16d   : > { %v3044_v8 = vpop.permute.xlu1 %636 }
 0x16f   : > { %1094 = vrot.lane.b32.xlu1 %v966_v41, %s2498_s19  ;;  %v3048_v45 = vpop.permute.xlu0 %559 }
 0x171   : > { %v3050_v13 = vpop.permute.xlu1 %729 }
 0x173   : > { %1228 = vrot.lane.b32.xlu1 %v952_v36, %s2498_s19  ;;  %v3055_v4 = vpop.permute.xlu0 %810  ;;  %v586_v36 = vsel %vm583_vm2, %v2953_v48, %v2831_v21  ;;  %v755_v21 = vsel %vm583_vm2, %v2847_v25, %v2971_v9  ;;  %v670_v25 = vsel %vm668_vm1, %v3000_v57, %v2894_v0 }
 0x175   : > { %v3057_v16 = vpop.permute.xlu1 %640 }
 0x177   : > { %v3059_v18 = vpop.permute.xlu0 %563 }
 0x179   : > { %v924_v6 = vpop.permute.xlu1 %923 }
 0x17a   : > { %v954_v41 = vsel %vm668_vm1, %v924_v6, %v2962_v26  ;;  %v953_v7 = vsel %vm668_vm1, %v2930_v11, %v924_v6  ;;  %v969_v11 = vsel %vm965_vm0, %v2726_v53, %v586_v36  ;;  %v840_v6 = vsel %vm668_vm1, %v2984_v47, %v2868_v39 }
 0x17b   : > { %1232 = vrot.lane.b32.xlu1 %v954_v41, %s2498_s19  ;;  %1230 = vrot.lane.b32.xlu0 %v953_v7, %s2498_s19  ;;  %v3073_v61 = vpop.permute.xlu0 %814  ;;  %v841_v7 = vsel %vm668_vm1, %v2868_v39, %v2990_v50  ;;  %v1005_v47 = vsel %vm965_vm0, %v755_v21, %v840_v6  ;;  %v3970_v36 = vmov 0.0   ;;  %v987_v6 = vsel %vm965_vm0, %v670_v25, %v2710_v51 }
 0x17c   : > { %v1006_v39 = vsel %vm965_vm0, %v756_v30, %v841_v7  ;;  %v585_v7 = vsel %vm583_vm2, %v2914_v3, %v2953_v48 }
 0x17d   : > { %v3075_v54 = vpop.permute.xlu1 %733 }
 0x17f   : > { %1102 = vrot.lane.b32.xlu1 %v970_v40, %s2498_s19  ;;  %1100 = vrot.lane.b32.xlu0 %v969_v11, %s2498_s19  ;;  %v3095_v53 = vpop.permute.xlu0 %567  ;;  %v669_v40 = vsel %vm668_vm1, %v2883_v56, %v3000_v57  ;;  %v511_v11 = vcombine.high %v3970_v36, %v3970_v36  ;;  %v584_v57 = vsel %vm583_vm2, %v548_v58, %v2914_v3 }
 0x180   : > { %v986_v56 = vsel %vm965_vm0, %v669_v40, %v2667_v46  ;;  %v968_v46 = vsel %vm965_vm0, %v2616_v32, %v585_v7  ;;  %v588_v58 = vsel %vm583_vm2, %v2960_v22, %v2829_v20  ;;  %v757_v22 = vsel %vm583_vm2, %v2857_v28, %v3025_v49 }
 0x181   : > { %v3097_v41 = vpop.permute.xlu1 %927  ;;  %v967_v51 = vsel %vm965_vm0, %v511_v11, %v584_v57  ;;  %v842_v40 = vsel %vm668_vm1, %v2990_v50, %v2845_v24  ;;  %v590_v11 = vsel %vm583_vm2, %v3048_v45, %v2855_v27 }
 0x182   : > { %v1007_v36 = vsel %vm965_vm0, %v757_v22, %v842_v40 }
 0x183   : > { %1172 = vrot.lane.b32.xlu1 %v1005_v47, %s2498_s19  ;;  %1174 = vrot.lane.b32.xlu0 %v1006_v39, %s2498_s19  ;;  %v3109_v9 = vpop.permute.xlu0 %818  ;;  %v589_v47 = vsel %vm583_vm2, %v2829_v20, %v3048_v45  ;;  %v971_v39 = vsel %vm965_vm0, %v2762_v59, %v588_v58  ;;  %v843_v20 = vsel %vm668_vm1, %v2845_v24, %v3055_v4 }
 0x184   : > { %v972_v32 = vsel %vm965_vm0, %v2614_v31, %v589_v47  ;;  %v758_v31 = vsel %vm583_vm2, %v3025_v49, %v2922_v17  ;;  %v591_v24 = vsel %vm583_vm2, %v2855_v27, %v3059_v18  ;;  %v671_v45 = vsel %vm668_vm1, %v2894_v0, %v3044_v8 }
 0x185   : > { %v3111_v19 = vpop.permute.xlu1 %644  ;;  %v1008_v28 = vsel %vm965_vm0, %v758_v31, %v843_v20  ;;  %v672_v27 = vsel %vm668_vm1, %v3044_v8, %v2936_v15  ;;  %v844_v0 = vsel %vm668_vm1, %v3055_v4, %v2866_v38  ;;  %v845_v8 = vsel %vm668_vm1, %v2866_v38, %v3073_v61 }
 0x186   : > { %v673_v58 = vsel %vm668_vm1, %v2936_v15, %v3057_v16  ;;  %v592_v15 = vsel %vm583_vm2, %v3059_v18, %v2881_v55  ;;  %v846_v18 = vsel %vm668_vm1, %v3073_v61, %v2892_v60  ;;  %v847_v40 = vsel %vm668_vm1, %v2892_v60, %v3109_v9 }
 0x187   : > { %1136 = vrot.lane.b32.xlu1 %v987_v6, %s2498_s19  ;;  %1134 = vrot.lane.b32.xlu0 %v986_v56, %s2498_s19  ;;  %v3126_v21 = vpop.permute.xlu0 %571  ;;  %v974_v6 = vsel %vm965_vm0, %v2618_v33, %v591_v24  ;;  %v973_v56 = vsel %vm965_vm0, %v2784_v63, %v590_v11  ;;  %v989_v33 = vsel %vm965_vm0, %v672_v27, %v2718_v52 }
 0x188   : > { %v988_v63 = vsel %vm965_vm0, %v671_v45, %v2640_v43  ;;  %v760_v43 = vsel %vm583_vm2, %v3050_v13, %v2942_v14  ;;  %v594_v11 = vsel %vm583_vm2, %v3095_v53, %v2899_v1  ;;  %v595_v24 = vsel %vm583_vm2, %v2899_v1, %v3126_v21 }
 0x189   : > { %v3128_v30 = vpop.permute.xlu1 %737  ;;  %v1010_v4 = vsel %vm965_vm0, %v760_v43, %v845_v8  ;;  %v978_v45 = vsel %vm965_vm0, %v2622_v35, %v595_v24  ;;  %v676_v1 = vsel %vm668_vm1, %v3111_v19, %v2988_v12 }
 0x18a   : > { %v993_v35 = vsel %vm965_vm0, %v676_v1, %v2798_v2  ;;  %v3972_v2 = vld [vmem:[#allocation33_spill] sm:$0xff] }
 0x18b   : > { %1096 = vrot.lane.b32.xlu1 %v967_v51, %s2498_s19  ;;  %1098 = vrot.lane.b32.xlu0 %v968_v46, %s2498_s19  ;;  %v3141_v3 = vpop.permute.xlu0 %822  ;;  %v759_v51 = vsel %vm583_vm2, %v2922_v17, %v3050_v13  ;;  %v674_v17 = vsel %vm668_vm1, %v3057_v16, %v2955_v29  ;;  %v593_v16 = vsel %vm583_vm2, %v2881_v55, %v3095_v53 }
 0x18c   : > { %v1009_v38 = vsel %vm965_vm0, %v759_v51, %v844_v0  ;;  %v761_v55 = vsel %vm583_vm2, %v2942_v14, %v3075_v54  ;;  %v675_v53 = vsel %vm668_vm1, %v2955_v29, %v3111_v19  ;;  %v763_v29 = vsel %vm583_vm2, %v2969_v10, %v3128_v30  ;;  %v3971_v19 = vld [vmem:[#allocation25_spill] sm:$0xff] }
 0x18d   : > { %v3143_v48 = vpop.permute.xlu1 %648  ;;  %v1011_v14 = vsel %vm965_vm0, %v761_v55, %v846_v18 }
 0x18e   : > { %v677_v43 = vsel %vm668_vm1, %v2988_v12, %v3143_v48 }
 0x18f   : > { %1104 = vrot.lane.b32.xlu1 %v971_v39, %s2498_s19  ;;  %1106 = vrot.lane.b32.xlu0 %v972_v32, %s2498_s19  ;;  %v3163_v59 = vpop.permute.xlu0 %575  ;;  %v991_v39 = vsel %vm965_vm0, %v674_v17, %v2780_v62  ;;  %v990_v32 = vsel %vm965_vm0, %v673_v58, %v2638_v42  ;;  %v976_v62 = vsel %vm965_vm0, %v2620_v34, %v593_v16  ;;  %v3974_v58 = vld [vmem:[#allocation19_spill] sm:$0xff] }
 0x190   : > { %v975_v42 = vsel %vm965_vm0, %v2807_v5, %v592_v15  ;;  %v762_v34 = vsel %vm583_vm2, %v3075_v54, %v2969_v10  ;;  %v956_v54 = vsel %vm668_vm1, %v3097_v41, %v2982_v37  ;;  %v3976_v15 = vld [vmem:[#allocation35_spill] sm:$0xff] }
 0x191   : > { %v3165_v25 = vpop.permute.xlu1 %931  ;;  %v1012_v61 = vsel %vm965_vm0, %v762_v34, %v847_v40 }
 0x192   : > { %v958_v16 = vsel %vm668_vm1, %v3165_v25, %v3976_v15 }
 0x193   : > { %1178 = vrot.lane.b32.xlu1 %v1008_v28, %s2498_s19  ;;  %1176 = vrot.lane.b32.xlu0 %v1007_v36, %s2498_s19  ;;  %v3177_v50 = vpop.permute.xlu0 %826  ;;  %v955_v36 = vsel %vm668_vm1, %v2962_v26, %v3097_v41  ;;  %v977_v26 = vsel %vm965_vm0, %v2839_v23, %v594_v11  ;;  %v992_v23 = vsel %vm965_vm0, %v675_v53, %v2655_v44  ;;  %v3981_v11 = vld [vmem:[#allocation36_spill] sm:$0xff] }
 0x194   : > { %v764_v44 = vsel %vm583_vm2, %v3128_v30, %v3972_v2 }
 0x195   : > { %v3179_v49 = vpop.permute.xlu1 %741 }
 0x196   : > { %v766_v24 = vsel %vm583_vm2, %v3179_v49, %v3981_v11 }
 0x197   : > { %1110 = vrot.lane.b32.xlu1 %v974_v6, %s2498_s19  ;;  %1108 = vrot.lane.b32.xlu0 %v973_v56, %s2498_s19  ;;  %v3193_v57 = vpop.permute.xlu0 %579 }
 0x199   : > { %v3195_v7 = vpop.permute.xlu1 %935 }
 0x19b   : > { %1140 = vrot.lane.b32.xlu1 %v989_v33, %s2498_s19  ;;  %1138 = vrot.lane.b32.xlu0 %v988_v63, %s2498_s19  ;;  %v3215_v52 = vpop.permute.xlu0 %747  ;;  %v849_v33 = vsel %vm668_vm1, %v3971_v19, %v3141_v3  ;;  %v848_v63 = vsel %vm668_vm1, %v3109_v9, %v3971_v19 }
 0x19c   : > { %v1014_v10 = vsel %vm965_vm0, %v764_v44, %v849_v33  ;;  %v1013_v51 = vsel %vm965_vm0, %v763_v29, %v848_v63  ;;  %v3982_v33 = vld [vmem:[#allocation37_spill] sm:$0xff]  ;;  %v3983_v44 = vld [vmem:[#allocation28_spill] sm:$0xff] }
 0x19d   : > { %v3217_v46 = vpop.permute.xlu1 %652  ;;  %v960_v63 = vsel %vm668_vm1, %v3195_v7, %v3982_v33 }
 0x19f   : > { %1182 = vrot.lane.b32.xlu1 %v1010_v4, %s2498_s19  ;;  %1180 = vrot.lane.b32.xlu0 %v1009_v38, %s2498_s19  ;;  %v3229_v13 = vpop.permute.xlu0 %830  ;;  %v3973_v4 = vld [vmem:[#allocation34_spill] sm:$0xff] }
 0x1a0   : > { %v678_v9 = vsel %vm668_vm1, %v3143_v48, %v3973_v4 }
 0x1a1   : > { %v3231_v47 = vpop.permute.xlu1 %745  ;;  %v995_v17 = vsel %vm965_vm0, %v678_v9, %v3974_v58  ;;  %v3984_v58 = vld [vmem:[#allocation12_spill] sm:$0xff] }
 0x1a3   : > { %1144 = vrot.lane.b32.xlu1 %v991_v39, %s2498_s19  ;;  %1142 = vrot.lane.b32.xlu0 %v990_v32, %s2498_s19  ;;  %v3245_v22 = vpop.permute.xlu0 %658  ;;  %v3975_v39 = vld [vmem:[#allocation14_spill] sm:$0xff] }
 0x1a4   : > { %v994_v32 = vsel %vm965_vm0, %v677_v43, %v3975_v39  ;;  %v3985_v39 = vld [vmem:[#allocation24_spill] sm:$0xff] }
 0x1a5   : > { %v3247_v20 = vpop.permute.xlu1 %828 }
 0x1a7   : > { %1114 = vrot.lane.b32.xlu1 %v976_v62, %s2498_s19  ;;  %1112 = vrot.lane.b32.xlu0 %v975_v42, %s2498_s19  ;;  %v3267_v5 = vpop.permute.xlu0 %941  ;;  %v957_v62 = vsel %vm668_vm1, %v2982_v37, %v3165_v25  ;;  %v3977_v42 = vld [vmem:[#allocation26_spill] sm:$0xff] }
 0x1a8   : > { %v596_v18 = vsel %vm583_vm2, %v3126_v21, %v3977_v42  ;;  %v597_v55 = vsel %vm583_vm2, %v3977_v42, %v3163_v59  ;;  %v3979_v37 = vld [vmem:[#allocation22_spill] sm:$0xff]  ;;  %v3980_v21 = vld [vmem:[#allocation27_spill] sm:$0xff]  ;;  %v3987_v42 = vld [vmem:[#allocation20_spill] sm:$0xff] }
 0x1a9   : > { %v3269_v31 = vpop.permute.xlu1 %656  ;;  %v979_v25 = vsel %vm965_vm0, %v3979_v37, %v596_v18  ;;  %v3988_v37 = vld [vmem:[#allocation15_spill] sm:$0xff] }
 0x1ab   : > { %1186 = vrot.lane.b32.xlu1 %v1012_v61, %s2498_s19  ;;  %1184 = vrot.lane.b32.xlu0 %v1011_v14, %s2498_s19  ;;  %v3275_v60 = vpop.permute.xlu0 %880  ;;  %v3978_v61 = vld [vmem:[#allocation11_spill] sm:$0xff] }
 0x1ac   : > { %v980_v14 = vsel %vm965_vm0, %v3978_v61, %v597_v55 }
 0x1ad   : > { %v3277_v28 = vpop.permute.xlu1 %939 }
 0x1af   : > { %1236 = vrot.lane.b32.xlu1 %v956_v54, %s2498_s19  ;;  %1234 = vrot.lane.b32.xlu0 %v955_v36, %s2498_s19  ;;  %v3293_v6 = vpop.permute.xlu0 %751  ;;  %v851_v54 = vsel %vm668_vm1, %v3980_v21, %v3177_v50  ;;  %v765_v36 = vsel %vm583_vm2, %v3972_v2, %v3179_v49  ;;  %v959_v2 = vsel %vm668_vm1, %v3976_v15, %v3195_v7 }
 0x1b0   : > { %v679_v15 = vsel %vm668_vm1, %v3973_v4, %v3217_v46  ;;  %v852_v4 = vsel %vm668_vm1, %v3177_v50, %v3247_v20  ;;  %v682_v50 = vsel %vm668_vm1, %v3269_v31, %v3245_v22 }
 0x1b1   : > { %v3295_v56 = vpop.permute.xlu1 %581 }
 0x1b3   : > { %1118 = vrot.lane.b32.xlu1 %v978_v45, %s2498_s19  ;;  %1116 = vrot.lane.b32.xlu0 %v977_v26, %s2498_s19  ;;  %v3309_v41 = vpop.permute.xlu0 %834  ;;  %v850_v45 = vsel %vm668_vm1, %v3141_v3, %v3980_v21 }
 0x1b5   : > { %v3311_v27 = vpop.permute.xlu1 %749 }
 0x1b7   : > { %1148 = vrot.lane.b32.xlu1 %v993_v35, %s2498_s19  ;;  %1146 = vrot.lane.b32.xlu0 %v992_v23, %s2498_s19  ;;  %v3331_v0 = vpop.permute.xlu0 %945  ;;  %v1016_v35 = vsel %vm965_vm0, %v766_v24, %v851_v54  ;;  %v1015_v23 = vsel %vm965_vm0, %v765_v36, %v850_v45  ;;  %v767_v54 = vsel %vm583_vm2, %v3981_v11, %v3231_v47 }
 0x1b9   : > { %v3333_v8 = vpop.permute.xlu1 %832 }
 0x1bb   : > { %1190 = vrot.lane.b32.xlu1 %v1014_v10, %s2498_s19  ;;  %1188 = vrot.lane.b32.xlu0 %v1013_v51, %s2498_s19  ;;  %v3345_v30 = vpop.permute.xlu0 %662  ;;  %v598_v10 = vsel %vm583_vm2, %v3163_v59, %v3983_v44  ;;  %v599_v51 = vsel %vm583_vm2, %v3983_v44, %v3193_v57  ;;  %v961_v44 = vsel %vm668_vm1, %v3982_v33, %v3277_v28 }
 0x1bc   : > { %v981_v7 = vsel %vm965_vm0, %v3985_v39, %v598_v10  ;;  %v884_v10 = vsel %vm583_vm2, %v3295_v56, %v3275_v60 }
 0x1bd   : > { %v3347_v38 = vpop.permute.xlu1 %943 }
 0x1bf   : > { %1152 = vrot.lane.b32.xlu1 %v995_v17, %s2498_s19  ;;  %1150 = vrot.lane.b32.xlu0 %v994_v32, %s2498_s19  ;;  %v3355_v12 = vpop.permute.xlu0 %753  ;;  %v982_v17 = vsel %vm965_vm0, %v3984_v58, %v599_v51  ;;  %v3986_v32 = vld [vmem:[#allocation38_spill] sm:$0xff]  ;;  %v600_v51 = vsel %vm583_vm2, %v3193_v57, %v3295_v56  ;;  %v855_v58 = vsel %vm668_vm1, %v3333_v8, %v3309_v41 }
 0x1c0   : > { %v771_v1 = vsel %vm583_vm2, %v3293_v6, %v3355_v12  ;;  %v680_v59 = vsel %vm668_vm1, %v3217_v46, %v3986_v32  ;;  %v996_v46 = vsel %vm965_vm0, %v679_v15, %v3988_v37  ;;  %v681_v24 = vsel %vm668_vm1, %v3986_v32, %v3269_v31  ;;  %v3995_v37 = vld [vmem:[#allocation30_spill] sm:$0xff] }
 0x1c1   : > { %v3357_v48 = vpop.permute.xlu1 %660  ;;  %v997_v18 = vsel %vm965_vm0, %v680_v59, %v3987_v42  ;;  %v770_v57 = vsel %vm583_vm2, %v3311_v27, %v3293_v6  ;;  %v964_v6 = vsel %vm668_vm1, %v3347_v38, %v3331_v0  ;;  %v3993_v0 = vld [vmem:[#allocation23_spill] sm:$0xff] }
 0x1c2   : > { %v1020_v32 = vsel %vm965_vm0, %v770_v57, %v855_v58  ;;  %v683_v15 = vsel %vm668_vm1, %v3245_v22, %v3357_v48 }
 0x1c3   : > { %1240 = vrot.lane.b32.xlu1 %v958_v16, %s2498_s19  ;;  %1238 = vrot.lane.b32.xlu0 %v957_v62, %s2498_s19  ;;  %v3373_v40 = vpop.permute.xlu0 %838 }
 0x1c5   : > { %v3375_v34 = vpop.permute.xlu1 %882 }
 0x1c7   : > { %1122 = vrot.lane.b32.xlu1 %v980_v14, %s2498_s19  ;;  %1120 = vrot.lane.b32.xlu0 %v979_v25, %s2498_s19  ;;  %v3395_v26 = vpop.permute.xlu0 %666  ;;  %v853_v14 = vsel %vm668_vm1, %v3247_v20, %v3229_v13  ;;  %v768_v25 = vsel %vm583_vm2, %v3231_v47, %v3215_v52  ;;  %v1017_v20 = vsel %vm965_vm0, %v767_v54, %v852_v4  ;;  %v3989_v47 = vld [vmem:[#allocation21_spill] sm:$0xff] }
 0x1c8   : > { %v1018_v36 = vsel %vm965_vm0, %v768_v25, %v853_v14  ;;  %v999_v11 = vsel %vm965_vm0, %v682_v50, %v3989_v47 }
 0x1c9   : > { %v3397_v53 = vpop.permute.xlu1 %836 }
 0x1ca   : > { %v856_v49 = vsel %vm668_vm1, %v3309_v41, %v3397_v53  ;;  %v769_v41 = vsel %vm583_vm2, %v3215_v52, %v3311_v27  ;;  %v963_v52 = vsel %vm668_vm1, %v3267_v5, %v3347_v38  ;;  %v684_v27 = vsel %vm668_vm1, %v3357_v48, %v3345_v30 }
 0x1cb   : > { %1194 = vrot.lane.b32.xlu1 %v1016_v35, %s2498_s19  ;;  %1192 = vrot.lane.b32.xlu0 %v1015_v23, %s2498_s19  ;;  %v3410_v3 = vsel %vm965_vm0, %v771_v1, %v856_v49  ;;  %v3412_v29 = vpop.permute.xlu0 %1132  ;;  %v3990_v35 = vld [vmem:[#allocation16_spill] sm:$0xff]  ;;  %v885_v48 = vsel %vm583_vm2, %v3275_v60, %v3375_v34  ;;  %v857_v25 = vsel %vm668_vm1, %v3397_v53, %v3373_v40  ;;  %v3996_v60 = vld [vmem:[#allocation31_spill] sm:$0xff] }
 0x1cc   : > { %v998_v23 = vsel %vm965_vm0, %v681_v24, %v3990_v35  ;;  %v1025_v54 = vsel %vm965_vm0, %v3996_v60, %v885_v48  ;;  %v1022_v50 = vsel %vm965_vm0, %v3355_v12, %v857_v25  ;;  %v3997_v53 = vld [vmem:[#allocation32_spill] sm:$0xff] }
 0x1cd   : > { %v3414_v19 = vpop.permute.xlu1 %664  ;;  %v706_v24 = vcombine.low %v3997_v53, %v3997_v53  ;;  %v1027_v35 = vld [vmem:[%s3886_s5] sm:$0xf] }
 0x1ce   : > { %v686_v40 = vsel %vm668_vm1, %v3414_v19, %v3395_v26 }
 0x1cf   : > { %1244 = vrot.lane.b32.xlu1 %v960_v63, %s2498_s19  ;;  %1242 = vrot.lane.b32.xlu0 %v959_v2, %s2498_s19  ;;  %v1221_v43 = vpop.permute.xlu0 %1220  ;;  %v962_v63 = vsel %vm668_vm1, %v3277_v28, %v3267_v5  ;;  %v3992_v28 = vld [vmem:[#allocation29_spill] sm:$0xff]  ;;  %v1003_v47 = vsel %vm965_vm0, %v686_v40, %v706_v24 }
 0x1d0   : > { %v983_v33 = vsel %vm965_vm0, %v3992_v28, %v600_v51  ;;  %v3627_v51 = vld [vmem:[#allocation2] sm:$0xff] }
 0x1d1   : > { %v1217_v9 = vpop.permute.xlu1 %1216 }
 0x1d3   : > { %1126 = vrot.lane.b32.xlu1 %v982_v17, %s2498_s19  ;;  %1124 = vrot.lane.b32.xlu0 %v981_v7, %s2498_s19  ;;  %v3442_v62 = vpop.permute.xlu0 %1208  ;;  %v854_v17 = vsel %vm668_vm1, %v3229_v13, %v3333_v8 }
 0x1d4   : > { %v1019_v13 = vsel %vm965_vm0, %v769_v41, %v854_v17 }
 0x1d5   : > { %v1219_v16 = vpop.permute.xlu1 %1218 }
 0x1d6   : > { %v1314_v55 = vsel %vm1254_vm3, %v1219_v16, %v1221_v43  ;;  %v1313_v61 = vsel %vm1254_vm3, %v1217_v9, %v1219_v16 }
 0x1d7   : > { %1156 = vrot.lane.b32.xlu1 %v997_v18, %s2498_s19  ;;  %2416 = vmatprep.subr.msk.mxu0 %vm965_vm0, %v1314_v55  ;;  %v1223_v45 = vpop.permute.xlu0 %1222  ;;  %v1001_v18 = vsel %vm965_vm0, %v684_v27, %v3993_v0  ;;  %v3994_v55 = vld [vmem:[#allocation17_spill] sm:$0xff] }
 0x1d8   : > { %1154 = vrot.lane.b32.xlu0 %v996_v46, %s2498_s19  ;;  %2417 = vmatpush1.msk.msra.mxu0 %vm965_vm0, %v1313_v61  ;;  %v1315_v31 = vsel %vm1254_vm3, %v1221_v43, %v1223_v45  ;;  %v3991_v43 = vld [vmem:[#allocation13_spill] sm:$0xff]  ;;  %v1000_v22 = vsel %vm965_vm0, %v683_v15, %v3994_v55 }
 0x1d9   : > { %v3463_v21 = vpop.permute.xlu1 %1170  ;;  %v1024_v9 = vsel %vm965_vm0, %v3991_v43, %v884_v10 }
 0x1db   : > { %1198 = vrot.lane.b32.xlu1 %v1018_v36, %s2498_s19 }
 0x1dc   : > { %1196 = vrot.lane.b32.xlu0 %v1017_v20, %s2498_s19 }
 0x1dd   : > { %v3478_v1 = vpop.permute.xlu1 %1224  ;;  %v3522_v39 = vpop.permute.xlu0 %1226 }
 0x1de   : > { %v1316_v49 = vsel %vm1254_vm3, %v1223_v45, %v3478_v1  ;;  %v685_v45 = vsel %vm668_vm1, %v3345_v30, %v3414_v19  ;;  %v3998_v30 = vld [vmem:[#allocation18_spill] sm:$0xff] }
 0x1df   : > { %1160 = vrot.lane.b32.xlu1 %v999_v11, %s2498_s19  ;;  %2419 = vmatprep.subr.msk.mxu1 %vm965_vm0, %v1316_v49  ;;  %v3606_v49 = vld [vmem:[%s3885_s4] sm:$0xf] }
 0x1e0   : > { %1158 = vrot.lane.b32.xlu0 %v998_v23, %s2498_s19  ;;  %2420 = vmatpush1.msk.msra.mxu1 %vm965_vm0, %v1315_v31  ;;  %v1317_v23 = vsel %vm1254_vm3, %v3478_v1, %v3522_v39 }
 0x1e1   : > { %v3494_v2 = vpop.permute.xlu1 %1094 }
 0x1e3   : > { %1248 = vrot.lane.b32.xlu1 %v962_v63, %s2498_s19 }
 0x1e4   : > { %1246 = vrot.lane.b32.xlu0 %v961_v44, %s2498_s19 }
 0x1e5   : > { %v3524_v7 = vpop.permute.xlu1 %1228 }
 0x1e6   : > { %v1318_v19 = vsel %vm1254_vm3, %v3522_v39, %v3524_v7 }
 0x1e7   : > { %1210 = vrot.lane.b32.xlu1 %v1024_v9, %s2498_s19 }
 0x1e8   : > { %1128 = vrot.lane.b32.xlu0 %v983_v33, %s2498_s19 }
 0x1eb   : > { %1202 = vrot.lane.b32.xlu1 %v1020_v32, %s2498_s19 }
 0x1ec   : > { %1200 = vrot.lane.b32.xlu0 %v1019_v13, %s2498_s19 }
 0x1ed   : > { %v3533_v8 = vpop.permute.xlu0 %1230  ;;  %v3535_v59 = vpop.permute.xlu1 %1232 }
 0x1ee   : > { %v1320_v15 = vsel %vm1254_vm3, %v3533_v8, %v3535_v59 }
 0x1ef   : > { %1252 = vrot.lane.b32.xlu1 %v964_v6, %s2498_s19 }
 0x1f0   : > { %1250 = vrot.lane.b32.xlu0 %v963_v52, %s2498_s19 }
 0x1f1   : > { %v1103_v16 = vpop.permute.xlu1 %1102  ;;  %v3551_v42 = vpop.permute.xlu0 %1100 }
 0x1f2   : > { %v3557_v5 = vsel %vm1254_vm3, %v3551_v42, %v1103_v16  ;;  %v1309_v38 = vsel %vm1254_vm3, %v3442_v62, %v3551_v42  ;;  %v1026_v62 = vsel %vm965_vm0, %v3995_v37, %v3375_v34 }
 0x1f3   : > { %1164 = vrot.lane.b32.xlu1 %v1001_v18, %s2498_s19  ;;  %1453 = vmatprep.subr.mxu0 %v3557_v5  ;;  %v1319_v18 = vsel %vm1254_vm3, %v3524_v7, %v3533_v8 }
 0x1f4   : > { %1162 = vrot.lane.b32.xlu0 %v1000_v22, %s2498_s19  ;;  %1454 = vmatpush1.msra.mxu0 %v1309_v38 }
 0x1f5   : > { %v1173_v61 = vpop.permute.xlu1 %1172  ;;  %v1175_v14 = vpop.permute.xlu0 %1174 }
 0x1f6   : > { %v1292_v46 = vsel %vm1254_vm3, %v1173_v61, %v1175_v14  ;;  %v1291_v4 = vsel %vm1254_vm3, %v3463_v21, %v1173_v61 }
 0x1f7   : > { %1214 = vrot.lane.b32.xlu1 %v1026_v62, %s2498_s19  ;;  %1455 = vmatprep.subr.mxu0 %v1292_v46 }
 0x1f8   : > { %1212 = vrot.lane.b32.xlu0 %v1025_v54, %s2498_s19  ;;  %1456 = vmatpush1.msra.mxu0 %v1291_v4 }
 0x1f9   : > { %v1137_v36 = vpop.permute.xlu1 %1136  ;;  %v1135_v34 = vpop.permute.xlu0 %1134 }
 0x1fa   : > { %v1274_v21 = vsel %vm1254_vm3, %v1135_v34, %v1137_v36  ;;  %v1273_v20 = vsel %vm1254_vm3, %v3412_v29, %v1135_v34 }
 0x1fb   : > { %1206 = vrot.lane.b32.xlu1 %v1022_v50, %s2498_s19  ;;  %1457 = vmatprep.subr.mxu0 %v1274_v21 }
 0x1fc   : > { %1204 = vrot.lane.b32.xlu0 %v3410_v3, %s2498_s19  ;;  %1458 = vmatpush1.msra.mxu0 %v1273_v20  ;;  %v1002_v3 = vsel %vm965_vm0, %v685_v45, %v3998_v30 }
 0x1fd   : > { %v1097_v12 = vpop.permute.xlu1 %1096  ;;  %v1099_v29 = vpop.permute.xlu0 %1098 }
 0x1fe   : > { %v1256_v26 = vsel %vm1254_vm3, %v1097_v12, %v1099_v29  ;;  %v1255_v11 = vsel %vm1254_vm3, %v3494_v2, %v1097_v12  ;;  %v477_v2 = vld [vmem:[#allocation2 + $0x48] sm:$0xf]  ;;  %v1257_v27 = vsel %vm1254_vm3, %v1099_v29, %v3551_v42 }
 0x1ff   : > { %1168 = vrot.lane.b32.xlu1 %v1003_v47, %s2498_s19  ;;  %1459 = vmatprep.subr.mxu0 %v1256_v26  ;;  %v984_v1 = vsel %vm965_vm0, %v477_v2, %v3295_v56 }
 0x200   : > { %1166 = vrot.lane.b32.xlu0 %v1002_v3, %s2498_s19  ;;  %1460 = vmatpush1.msra.mxu0 %v1255_v11 }
 0x201   : > { %v1105_v31 = vpop.permute.xlu1 %1104  ;;  %2422 = vmatprep.subr.msk.mxu0 %vm965_vm0, %v1318_v19  ;;  %v1107_v63 = vpop.permute.xlu0 %1106  ;;  %2418 = vmatmul.mubr.msk.f32.vlgmr.msra.gmra.mxu0 %vm1389_vm4, %v3606_v49 }
 0x202   : > { %2423 = vmatpush1.msk.msra.mxu0 %vm965_vm0, %v1317_v23  ;;  %v1260_v44 = vsel %vm1254_vm3, %v1105_v31, %v1107_v63  ;;  %v1259_v10 = vsel %vm1254_vm3, %v1103_v16, %v1105_v31  ;;  %1635 = vmatprep.mubr.f32.mxu0 %v3627_v51 }
 0x203   : > { %1524 = vmatprep.subr.mxu1 %v1260_v44  ;;  %1030 = vperm.xlu1 %2461, %v1027_v35  }
 0x204   : > { %1130 = vrot.lane.b32.xlu0 %v984_v1, %s2498_s19  ;;  %1525 = vmatpush1.msra.mxu1 %v1259_v10 }
 0x205   : > { %v1179_v43 = vpop.permute.xlu1 %1178  ;;  %v1177_v9 = vpop.permute.xlu0 %1176 }
 0x206   : > { %v1294_v58 = vsel %vm1254_vm3, %v1177_v9, %v1179_v43  ;;  %v1293_v28 = vsel %vm1254_vm3, %v1175_v14, %v1177_v9 }
 0x207   : > { %1526 = vmatprep.subr.mxu1 %v1294_v58 }
 0x208   : > { %1527 = vmatpush1.msra.mxu1 %v1293_v28 }
 0x209   : > { %v1111_v33 = vpop.permute.xlu1 %1110  ;;  %v1109_v17 = vpop.permute.xlu0 %1108 }
 0x20a   : > { %v3636_v57 = vsel %vm1254_vm3, %v1107_v63, %v1109_v17  ;;  %v3639_v56 = vsel %vm1254_vm3, %v1109_v17, %v1111_v33 }
 0x20b   : > { %1595 = vmatprep.subr.mxu0 %v3639_v56 }
 0x20c   : > { %1596 = vmatpush1.msra.mxu0 %v3636_v57 }
 0x20d   : > { %v1141_v39 = vpop.permute.xlu1 %1140  ;;  %v1139_v41 = vpop.permute.xlu0 %1138 }
 0x20e   : > { %v1276_v32 = vsel %vm1254_vm3, %v1139_v41, %v1141_v39  ;;  %v1275_v13 = vsel %vm1254_vm3, %v1137_v36, %v1139_v41 }
 0x20f   : > { %1528 = vmatprep.subr.mxu1 %v1276_v32 }
 0x210   : > { %1529 = vmatpush1.msra.mxu1 %v1275_v13 }
 0x211   : > { %v1183_v6 = vpop.permute.xlu1 %1182  ;;  %1530 = vmatprep.subr.mxu1 %v3557_v5  ;;  %v1181_v52 = vpop.permute.xlu0 %1180 }
 0x212   : > { %v1295_v16 = vsel %vm1254_vm3, %v1179_v43, %v1181_v52  ;;  %1531 = vmatpush1.msra.mxu1 %v1257_v27  ;;  %v1296_v0 = vsel %vm1254_vm3, %v1181_v52, %v1183_v6 }
 0x213   : > { %1597 = vmatprep.subr.mxu0 %v1296_v0  ;;  %2425 = vmatprep.subr.msk.mxu1 %vm965_vm0, %v1320_v15 }
 0x214   : > { %2421 = vmatmul.mubr.msk.f32.vlgmr.msra.gmra.mxu1 %vm1389_vm4, %v3606_v49  ;;  %1598 = vmatpush1.msra.mxu0 %v1295_v16 }
 0x215   : > { %2426 = vmatpush1.msk.msra.mxu1 %vm965_vm0, %v1319_v18  ;;  %v1145_v42 = vpop.permute.xlu1 %1144  ;;  %v1143_v5 = vpop.permute.xlu0 %1142  ;;  %1706 = vmatprep.mubr.f32.mxu1 %v3627_v51 }
 0x216   : > { %v1277_v38 = vsel %vm1254_vm3, %v1141_v39, %v1143_v5  ;;  %v1278_v55 = vsel %vm1254_vm3, %v1143_v5, %v1145_v42 }
 0x217   : > { %1599 = vmatprep.subr.mxu0 %v1278_v55 }
 0x218   : > { %1600 = vmatpush1.msra.mxu0 %v1277_v38 }
 0x219   : > { %v1115_v22 = vpop.permute.xlu1 %1114  ;;  %1601 = vmatprep.subr.mxu0 %v1260_v44  ;;  %v1113_v48 = vpop.permute.xlu0 %1112 }
 0x21a   : > { %v1263_v7 = vsel %vm1254_vm3, %v1111_v33, %v1113_v48  ;;  %1602 = vmatpush1.msra.mxu0 %v1259_v10  ;;  %v1264_v8 = vsel %vm1254_vm3, %v1113_v48, %v1115_v22 }
 0x21b   : > { %1666 = vmatprep.subr.mxu1 %v1264_v8  ;;  %2424 = vmatmul.mubr.msk.f32.vlgmr.msra.gmra.mxu0 %vm1389_vm4, %v3606_v49 }
 0x21c   : > { %1667 = vmatpush1.msra.mxu1 %v1263_v7  ;;  %1777 = vmatprep.mubr.f32.mxu0 %v3627_v51 }
 0x21d   : > { %v1187_v61 = vpop.permute.xlu1 %1186  ;;  %v1185_v14 = vpop.permute.xlu0 %1184 }
 0x21e   : > { %v1297_v37 = vsel %vm1254_vm3, %v1183_v6, %v1185_v14  ;;  %v1298_v62 = vsel %vm1254_vm3, %v1185_v14, %v1187_v61 }
 0x21f   : > { %1668 = vmatprep.subr.mxu1 %v1298_v62 }
 0x220   : > { %1669 = vmatpush1.msra.mxu1 %v1297_v37 }
 0x221   : > { %v1237_v46 = vpop.permute.xlu1 %1236  ;;  %v1235_v4 = vpop.permute.xlu0 %1234 }
 0x222   : > { %v1321_v25 = vsel %vm1254_vm3, %v3535_v59, %v1235_v4  ;;  %v1322_v60 = vsel %vm1254_vm3, %v1235_v4, %v1237_v46 }
 0x223   : > { %2428 = vmatprep.subr.msk.mxu0 %vm965_vm0, %v1322_v60 }
 0x224   : > { %2429 = vmatpush1.msk.msra.mxu0 %vm965_vm0, %v1321_v25 }
 0x225   : > { %v1119_v54 = vpop.permute.xlu1 %1118  ;;  %v1117_v36 = vpop.permute.xlu0 %1116 }
 0x226   : > { %v3676_v34 = vsel %vm1254_vm3, %v1115_v22, %v1117_v36  ;;  %v3679_v50 = vsel %vm1254_vm3, %v1117_v36, %v1119_v54 }
 0x227   : > { %1737 = vmatprep.subr.mxu0 %v3679_v50 }
 0x228   : > { %1738 = vmatpush1.msra.mxu0 %v3676_v34 }
 0x229   : > { %v1149_v21 = vpop.permute.xlu1 %1148  ;;  %v1147_v59 = vpop.permute.xlu0 %1146 }
 0x22a   : > { %v1279_v20 = vsel %vm1254_vm3, %v1145_v42, %v1147_v59  ;;  %v1280_v40 = vsel %vm1254_vm3, %v1147_v59, %v1149_v21 }
 0x22b   : > { %1670 = vmatprep.subr.mxu1 %v1280_v40 }
 0x22c   : > { %1671 = vmatpush1.msra.mxu1 %v1279_v20 }
 0x22d   : > { %v1191_v53 = vpop.permute.xlu1 %1190  ;;  %1672 = vmatprep.subr.mxu1 %v3639_v56  ;;  %v1189_v24 = vpop.permute.xlu0 %1188 }
 0x22e   : > { %v1299_v45 = vsel %vm1254_vm3, %v1187_v61, %v1189_v24  ;;  %1673 = vmatpush1.msra.mxu1 %v3636_v57  ;;  %v1300_v12 = vsel %vm1254_vm3, %v1189_v24, %v1191_v53 }
 0x22f   : > { %1739 = vmatprep.subr.mxu0 %v1300_v12  ;;  %2427 = vmatmul.mubr.msk.f32.vlgmr.msra.gmra.mxu1 %vm1389_vm4, %v3606_v49 }
 0x230   : > { %1740 = vmatpush1.msra.mxu0 %v1299_v45  ;;  %1848 = vmatprep.mubr.f32.mxu1 %v3627_v51 }
 0x231   : > { %v1153_v29 = vpop.permute.xlu1 %1152  ;;  %v1151_v47 = vpop.permute.xlu0 %1150 }
 0x232   : > { %v1281_v26 = vsel %vm1254_vm3, %v1149_v21, %v1151_v47  ;;  %v1282_v11 = vsel %vm1254_vm3, %v1151_v47, %v1153_v29 }
 0x233   : > { %1741 = vmatprep.subr.mxu0 %v1282_v11 }
 0x234   : > { %1742 = vmatpush1.msra.mxu0 %v1281_v26 }
 0x235   : > { %v1241_v30 = vpop.permute.xlu1 %1240  ;;  %1743 = vmatprep.subr.mxu0 %v1264_v8  ;;  %v1239_v3 = vpop.permute.xlu0 %1238 }
 0x236   : > { %v1323_v19 = vsel %vm1254_vm3, %v1237_v46, %v1239_v3  ;;  %v1324_v35 = vsel %vm1254_vm3, %v1239_v3, %v1241_v30  ;;  %1744 = vmatpush1.msra.mxu0 %v1263_v7 }
 0x237   : > { %2431 = vmatprep.subr.msk.mxu1 %vm965_vm0, %v1324_v35  ;;  %2430 = vmatmul.mubr.msk.f32.vlgmr.msra.gmra.mxu0 %vm1389_vm4, %v3606_v49  ;;  %v3757_v35 = vld [vmem:[%s3884_s3] sm:$0xff] }
 0x238   : > { %2432 = vmatpush1.msk.msra.mxu1 %vm965_vm0, %v1323_v19  ;;  %1919 = vmatprep.mubr.f32.mxu0 %v3627_v51 }
 0x239   : > { %v1123_v23 = vpop.permute.xlu1 %1122  ;;  %v1121_v31 = vpop.permute.xlu0 %1120 }
 0x23a   : > { %v1267_v63 = vsel %vm1254_vm3, %v1119_v54, %v1121_v31  ;;  %v1268_v2 = vsel %vm1254_vm3, %v1121_v31, %v1123_v23  ;;  %v3999_v31 = vld [vmem:[#allocation7_spill] sm:$0xff] }
 0x23b   : > { %1808 = vmatprep.subr.mxu1 %v1268_v2 }
 0x23c   : > { %1809 = vmatpush1.msra.mxu1 %v1267_v63 }
 0x23d   : > { %v1195_v44 = vpop.permute.xlu1 %1194  ;;  %v1193_v10 = vpop.permute.xlu0 %1192 }
 0x23e   : > { %v1301_v1 = vsel %vm1254_vm3, %v1191_v53, %v1193_v10  ;;  %v1302_v43 = vsel %vm1254_vm3, %v1193_v10, %v1195_v44  ;;  %v4000_v10 = vld [vmem:[#allocation8_spill] sm:$0xff] }
 0x23f   : > { %1810 = vmatprep.subr.mxu1 %v1302_v43 }
 0x240   : > { %1811 = vmatpush1.msra.mxu1 %v1301_v1  ;;  %v2126_v1 = vrot.slane %v3757_v35, %v4000_v10 }
 0x241   : > { %v1245_v9 = vpop.permute.xlu1 %1244  ;;  %v1243_v58 = vpop.permute.xlu0 %1242 }
 0x242   : > { %v1325_v28 = vsel %vm1254_vm3, %v1241_v30, %v1243_v58  ;;  %v1326_v33 = vsel %vm1254_vm3, %v1243_v58, %v1245_v9 }
 0x243   : > { %2434 = vmatprep.subr.msk.mxu0 %vm965_vm0, %v1326_v33 }
 0x244   : > { %2435 = vmatpush1.msk.msra.mxu0 %vm965_vm0, %v1325_v28 }
 0x245   : > { %v1127_v17 = vpop.permute.xlu1 %1126  ;;  %v1125_v57 = vpop.permute.xlu0 %1124 }
 0x246   : > { %v3710_v56 = vsel %vm1254_vm3, %v1123_v23, %v1125_v57  ;;  %v1270_v39 = vsel %vm1254_vm3, %v1125_v57, %v1127_v17 }
 0x247   : > { %1879 = vmatprep.subr.mxu0 %v1270_v39 }
 0x248   : > { %1880 = vmatpush1.msra.mxu0 %v3710_v56 }
 0x249   : > { %v1157_v41 = vpop.permute.xlu1 %1156 }
 0x24a   : > { %v1155_v32 = vpop.permute.xlu0 %1154 }
 0x24b   : > { %v1283_v13 = vsel %vm1254_vm3, %v1153_v29, %v1155_v32  ;;  %v1284_v6 = vsel %vm1254_vm3, %v1155_v32, %v1157_v41 }
 0x24c   : > { %1812 = vmatprep.subr.mxu1 %v1284_v6  ;;  %v4001_v6 = vld [vmem:[#allocation3_spill] sm:$0xff] }
 0x24d   : > { %1813 = vmatpush1.msra.mxu1 %v1283_v13  ;;  %v1199_v52 = vpop.permute.xlu1 %1198 }
 0x24e   : > { %1814 = vmatprep.subr.mxu1 %v3679_v50  ;;  %v1197_v27 = vpop.permute.xlu0 %1196 }
 0x24f   : > { %v1303_v15 = vsel %vm1254_vm3, %v1195_v44, %v1197_v27  ;;  %1815 = vmatpush1.msra.mxu1 %v3676_v34  ;;  %v1304_v16 = vsel %vm1254_vm3, %v1197_v27, %v1199_v52 }
 0x250   : > { %1881 = vmatprep.subr.mxu0 %v1304_v16  ;;  %2433 = vmatmul.mubr.msk.f32.vlgmr.msra.gmra.mxu1 %vm1389_vm4, %v3606_v49  ;;  %v4002_v16 = vld [vmem:[#allocation4_spill] sm:$0xff] }
 0x251   : > { %1882 = vmatpush1.msra.mxu0 %v1303_v15  ;;  %v1161_v0 = vpop.permute.xlu1 %1160  ;;  %1990 = vmatprep.mubr.f32.mxu1 %v3627_v51 }
 0x252   : > { %v1159_v18 = vpop.permute.xlu0 %1158 }
 0x253   : > { %v1285_v42 = vsel %vm1254_vm3, %v1157_v41, %v1159_v18  ;;  %v1286_v5 = vsel %vm1254_vm3, %v1159_v18, %v1161_v0 }
 0x254   : > { %1883 = vmatprep.subr.mxu0 %v1286_v5 }
 0x255   : > { %1884 = vmatpush1.msra.mxu0 %v1285_v42  ;;  %v1249_v38 = vpop.permute.xlu1 %1248 }
 0x256   : > { %1885 = vmatprep.subr.mxu0 %v1268_v2  ;;  %v1247_v55 = vpop.permute.xlu0 %1246 }
 0x257   : > { %v1327_v22 = vsel %vm1254_vm3, %v1245_v9, %v1247_v55  ;;  %v1328_v48 = vsel %vm1254_vm3, %v1247_v55, %v1249_v38  ;;  %1886 = vmatpush1.msra.mxu0 %v1267_v63  ;;  %v2122_v63 = vrot.slane %v3757_v35, %v3999_v31 }
 0x258   : > { %2437 = vmatprep.subr.msk.mxu1 %vm965_vm0, %v1328_v48  ;;  %2436 = vmatmul.mubr.msk.f32.vlgmr.msra.gmra.mxu0 %vm1389_vm4, %v3606_v49 }
 0x259   : > { %2438 = vmatpush1.msk.msra.mxu1 %vm965_vm0, %v1327_v22  ;;  %v1211_v7 = vpop.permute.xlu1 %1210  ;;  %2061 = vmatprep.mubr.f32.mxu0 %v3627_v51 }
 0x25a   : > { %v1129_v8 = vpop.permute.xlu0 %1128 }
 0x25b   : > { %v1310_v61 = vsel %vm1254_vm3, %v1129_v8, %v1211_v7  ;;  %v1271_v14 = vsel %vm1254_vm3, %v1127_v17, %v1129_v8 }
 0x25c   : > { %1950 = vmatprep.subr.mxu1 %v1310_v61 }
 0x25d   : > { %1951 = vmatpush1.msra.mxu1 %v1271_v14  ;;  %v1203_v37 = vpop.permute.xlu1 %1202 }
 0x25e   : > { %v1201_v62 = vpop.permute.xlu0 %1200 }
 0x25f   : > { %v1305_v46 = vsel %vm1254_vm3, %v1199_v52, %v1201_v62  ;;  %v1306_v4 = vsel %vm1254_vm3, %v1201_v62, %v1203_v37  ;;  %v2130_v52 = vrot.slane %v3757_v35, %v4001_v6 }
 0x260   : > { %1952 = vmatprep.subr.mxu1 %v1306_v4 }
 0x261   : > { %1953 = vmatpush1.msra.mxu1 %v1305_v46  ;;  %v1253_v25 = vpop.permute.xlu1 %1252 }
 0x262   : > { %v1251_v60 = vpop.permute.xlu0 %1250 }
 0x263   : > { %v1329_v54 = vsel %vm1254_vm3, %v1249_v38, %v1251_v60  ;;  %v1330_v51 = vsel %vm1254_vm3, %v1251_v60, %v1253_v25 }
 0x264   : > { %2440 = vmatprep.subr.msk.mxu0 %vm965_vm0, %v1330_v51 }
 0x265   : > { %2441 = vmatpush1.msk.msra.mxu0 %vm965_vm0, %v1329_v54  ;;  %v1165_v36 = vpop.permute.xlu1 %1164  ;;  %v4004_v54 = vld [vmem:[#allocation6_spill] sm:$0xff] }
 0x266   : > { %v1163_v34 = vpop.permute.xlu0 %1162  ;;  %v2142_v51 = vrot.slane %v3757_v35, %v4004_v54 }
 0x267   : > { %v1287_v50 = vsel %vm1254_vm3, %v1161_v0, %v1163_v34  ;;  %v1288_v21 = vsel %vm1254_vm3, %v1163_v34, %v1165_v36  ;;  %v2134_v0 = vrot.slane %v3757_v35, %v4002_v16 }
 0x268   : > { %1954 = vmatprep.subr.mxu1 %v1288_v21 }
 0x269   : > { %1955 = vmatpush1.msra.mxu1 %v1287_v50  ;;  %v1215_v59 = vpop.permute.xlu1 %1214 }
 0x26a   : > { %1956 = vmatprep.subr.mxu1 %v1270_v39  ;;  %v1213_v20 = vpop.permute.xlu0 %1212 }
 0x26b   : > { %v1311_v40 = vsel %vm1254_vm3, %v1211_v7, %v1213_v20  ;;  %1957 = vmatpush1.msra.mxu1 %v3710_v56  ;;  %v1312_v53 = vsel %vm1254_vm3, %v1213_v20, %v1215_v59 }
 0x26c   : > { %2439 = vmatmul.mubr.msk.f32.vlgmr.msra.gmra.mxu1 %vm1389_vm4, %v3606_v49  ;;  %2021 = vmatprep.subr.mxu0 %v1312_v53 }
 0x26d   : > { %2022 = vmatpush1.msra.mxu0 %v1311_v40  ;;  %v1207_v24 = vpop.permute.xlu1 %1206 }
 0x26e   : > { %v1205_v45 = vpop.permute.xlu0 %1204 }
 0x26f   : > { %v1307_v12 = vsel %vm1254_vm3, %v1203_v37, %v1205_v45  ;;  %v1308_v29 = vsel %vm1254_vm3, %v1205_v45, %v1207_v24 }
 0x270   : > { %2023 = vmatprep.subr.mxu0 %v1308_v29 }
 0x271   : > { %2024 = vmatpush1.msra.mxu0 %v1307_v12  ;;  %v1169_v47 = vpop.permute.xlu1 %1168 }
 0x272   : > { %v1167_v26 = vpop.permute.xlu0 %1166 }
 0x273   : > { %v1289_v11 = vsel %vm1254_vm3, %v1165_v36, %v1167_v26  ;;  %v1290_v30 = vsel %vm1254_vm3, %v1167_v26, %v1169_v47 }
 0x274   : > { %2025 = vmatprep.subr.mxu0 %v1290_v30 }
 0x275   : > { %2026 = vmatpush1.msra.mxu0 %v1289_v11 }
 0x276   : > { %v1131_v3 = vpop.permute.xlu0 %1130 }
 0x277   : > { %v1272_v19 = vsel %vm1254_vm3, %v1129_v8, %v1131_v3  ;;  %v4003_v8 = vld [vmem:[#allocation5_spill] sm:$0xff] }
 0x278   : > { %2027 = vmatprep.subr.mxu0 %v1272_v19  ;;  %v2138_v61 = vrot.slane %v3757_v35, %v4003_v8 }
 0x279   : > { %2028 = vmatpush1.msra.mxu0 %v1271_v14 }
 0x27a   : > { %2442 = vmatmul.mubr.msk.f32.vlgmr.msra.gmra.mxu0 %vm1389_vm4, %v3606_v49 }
 0x27e   : > { %v3759_v23 = vpop.permute.xlu1 %1030 }
 0x2c1   : > { %v1495_v2 = vpop.f32.mrf.mxu0 }
 0x2c2   : > { %v1496_v44 = vadd.f32 %v1495_v2, %v3759_v23 }
 0x2c3   : > { %v1497_v43 = vpop.f32.mrf.mxu0 }
 0x2c4   : > { %v1498_v9 = vadd.f32 %v1497_v43, %v3759_v23  ;;  %v2209_v49 = vmul.f32 %v2122_v63, %v1496_v44 }
 0x2c6   : > { %v2086_v58 = vcombine.low %v1496_v44, %v1498_v9  ;;  %v2210_v28 = vmul.f32 %v2126_v1, %v1498_v9  ;;  %v2227_v33 = vsel %vm965_vm0, %v2209_v49, 0.0  ;;  %v2264_v17 = vmul.f32 %v2209_v49, %v2209_v49 }
 0x2c8   : > { %2104 = vst [vmem:[%s3772_s8] sm:$0xff] %v2086_v58  ;;  %v2228_v57 = vsel %vm965_vm0, %v2210_v28, 0.0  ;;  %v2265_v56 = vmul.f32 %v2210_v28, %v2210_v28  ;;  %v2282_v39 = vsel %vm965_vm0, %v2264_v17, 0.0 }
 0x2c9   : > { %v2229_v41 = vadd.f32 %v2228_v57, %v2227_v33  ;;  %v4005_v33 = vld [vmem:[#allocation9_spill] sm:$0xff] }
 0x2ca   : > { %v2283_v32 = vsel %vm965_vm0, %v2265_v56, 0.0  ;;  %v2146_v17 = vrot.slane %v3757_v35, %v4005_v33 }
 0x2cb   : > { %v2284_v13 = vadd.f32 %v2283_v32, %v2282_v39 }
 0x2d4   : > { %v1566_v27 = vpop.f32.mrf.mxu1 }
 0x2d5   : > { %v1567_v15 = vadd.f32 %v1566_v27, %v3759_v23  ;;  %v3816_v27 = vld [vmem:[%s3884_s3 + $0x8] sm:$0xff] }
 0x2d6   : > { %v1568_v18 = vpop.f32.mrf.mxu1 }
 0x2d7   : > { %v2211_v42 = vmul.f32 %v2130_v52, %v1567_v15  ;;  %v1569_v5 = vadd.f32 %v1568_v18, %v3759_v23 }
 0x2d9   : > { %v2230_v38 = vsel %vm965_vm0, %v2211_v42, 0.0  ;;  %v2266_v55 = vmul.f32 %v2211_v42, %v2211_v42  ;;  %v2087_v22 = vcombine.low %v1567_v15, %v1569_v5  ;;  %v2212_v48 = vmul.f32 %v2134_v0, %v1569_v5 }
 0x2da   : > { %v2231_v7 = vadd.f32 %v2230_v38, %v2229_v41  ;;  %v4006_v41 = vld [vmem:[#allocation10_spill] sm:$0xff]  ;;  %v2154_v42 = vrot.slane %v3816_v27, %v3999_v31 }
 0x2db   : > { %v2285_v14 = vsel %vm965_vm0, %v2266_v55, 0.0  ;;  %2105 = vst [vmem:[%s3772_s8 + $0x8] sm:$0xff] %v2087_v22  ;;  %v2232_v37 = vsel %vm965_vm0, %v2212_v48, 0.0  ;;  %v2267_v62 = vmul.f32 %v2212_v48, %v2212_v48  ;;  %v1637_v46 = vpop.f32.mrf.mxu0  ;;  %v2150_v32 = vrot.slane %v3757_v35, %v4006_v41 }
 0x2dc   : > { %v2286_v4 = vadd.f32 %v2285_v14, %v2284_v13  ;;  %v2233_v25 = vadd.f32 %v2232_v37, %v2231_v7  ;;  %v1638_v60 = vadd.f32 %v1637_v46, %v3759_v23  ;;  %v2158_v55 = vrot.slane %v3816_v27, %v4000_v10 }
 0x2dd   : > { %v2287_v36 = vsel %vm965_vm0, %v2267_v62, 0.0  ;;  %v1639_v34 = vpop.f32.mrf.mxu0 }
 0x2de   : > { %v2288_v50 = vadd.f32 %v2287_v36, %v2286_v4  ;;  %v2213_v21 = vmul.f32 %v2138_v61, %v1638_v60  ;;  %v1640_v59 = vadd.f32 %v1639_v34, %v3759_v23  ;;  %v2162_v36 = vrot.slane %v3816_v27, %v4001_v6 }
 0x2e0   : > { %v2234_v20 = vsel %vm965_vm0, %v2213_v21, 0.0  ;;  %v2268_v40 = vmul.f32 %v2213_v21, %v2213_v21  ;;  %v2088_v53 = vcombine.low %v1638_v60, %v1640_v59  ;;  %v2214_v24 = vmul.f32 %v2142_v51, %v1640_v59 }
 0x2e1   : > { %v2235_v45 = vadd.f32 %v2234_v20, %v2233_v25 }
 0x2e2   : > { %v2289_v12 = vsel %vm965_vm0, %v2268_v40, 0.0  ;;  %2106 = vst [vmem:[%s3772_s8 + $0x10] sm:$0xff] %v2088_v53  ;;  %v2236_v29 = vsel %vm965_vm0, %v2214_v24, 0.0  ;;  %v2269_v47 = vmul.f32 %v2214_v24, %v2214_v24  ;;  %v2166_v53 = vrot.slane %v3816_v27, %v4002_v16 }
 0x2e3   : > { %v2290_v26 = vadd.f32 %v2289_v12, %v2288_v50  ;;  %v2237_v11 = vadd.f32 %v2236_v29, %v2235_v45  ;;  %v2174_v16 = vrot.slane %v3816_v27, %v4004_v54 }
 0x2e4   : > { %v2291_v30 = vsel %vm965_vm0, %v2269_v47, 0.0 }
 0x2e5   : > { %v2292_v3 = vadd.f32 %v2291_v30, %v2290_v26  ;;  %v2170_v26 = vrot.slane %v3816_v27, %v4003_v8  ;;  %v2178_v8 = vrot.slane %v3816_v27, %v4005_v33 }
 0x2ef   : > { %v1708_v19 = vpop.f32.mrf.mxu1 }
 0x2f0   : > { %v1709_v2 = vadd.f32 %v1708_v19, %v3759_v23 }
 0x2f1   : > { %v1710_v63 = vpop.f32.mrf.mxu1 }
 0x2f2   : > { %v1711_v44 = vadd.f32 %v1710_v63, %v3759_v23  ;;  %v2215_v56 = vmul.f32 %v2146_v17, %v1709_v2 }
 0x2f4   : > { %v2089_v1 = vcombine.low %v1709_v2, %v1711_v44  ;;  %v2270_v0 = vmul.f32 %v2215_v56, %v2215_v56  ;;  %v2216_v18 = vmul.f32 %v2150_v32, %v1711_v44  ;;  %v2238_v38 = vsel %vm965_vm0, %v2215_v56, 0.0 }
 0x2f5   : > { %v2239_v37 = vadd.f32 %v2238_v38, %v2237_v11 }
 0x2f6   : > { %2107 = vst [vmem:[%s3772_s8 + $0x18] sm:$0xff] %v2089_v1  ;;  %v2293_v35 = vsel %vm965_vm0, %v2270_v0, 0.0  ;;  %v2271_v48 = vmul.f32 %v2216_v18, %v2216_v18  ;;  %v2240_v62 = vsel %vm965_vm0, %v2216_v18, 0.0 }
 0x2f7   : > { %v1779_v43 = vpop.f32.mrf.mxu0  ;;  %v2294_v4 = vadd.f32 %v2293_v35, %v2292_v3  ;;  %v2241_v34 = vadd.f32 %v2240_v62, %v2239_v37 }
 0x2f8   : > { %v1780_v49 = vadd.f32 %v1779_v43, %v3759_v23  ;;  %v2295_v25 = vsel %vm965_vm0, %v2271_v48, 0.0 }
 0x2f9   : > { %v1781_v9 = vpop.f32.mrf.mxu0  ;;  %v2296_v21 = vadd.f32 %v2295_v25, %v2294_v4 }
 0x2fa   : > { %v1782_v58 = vadd.f32 %v1781_v9, %v3759_v23  ;;  %v2217_v7 = vmul.f32 %v2154_v42, %v1780_v49 }
 0x2fc   : > { %v2090_v28 = vcombine.low %v1780_v49, %v1782_v58  ;;  %v2272_v60 = vmul.f32 %v2217_v7, %v2217_v7  ;;  %v2218_v51 = vmul.f32 %v2158_v55, %v1782_v58  ;;  %v2242_v50 = vsel %vm965_vm0, %v2217_v7, 0.0  ;;  %v2115_v55 = vld [vmem:[%s3884_s3 + $0x10] sm:$0x3] }
 0x2fd   : > { %v2243_v24 = vadd.f32 %v2242_v50, %v2241_v34  ;;  %v2190_v25 = vrot.slane %v2115_v55, %v4000_v10 }
 0x2fe   : > { %2108 = vst [vmem:[%s3772_s8 + $0x20] sm:$0xff] %v2090_v28  ;;  %v2297_v59 = vsel %vm965_vm0, %v2272_v60, 0.0  ;;  %v2273_v20 = vmul.f32 %v2218_v51, %v2218_v51  ;;  %v2244_v45 = vsel %vm965_vm0, %v2218_v51, 0.0 }
 0x2ff   : > { %v2298_v12 = vadd.f32 %v2297_v59, %v2296_v21  ;;  %v2245_v11 = vadd.f32 %v2244_v45, %v2243_v24 }
 0x300   : > { %v2299_v29 = vsel %vm965_vm0, %v2273_v20, 0.0 }
 0x301   : > { %v2300_v3 = vadd.f32 %v2299_v29, %v2298_v12 }
 0x310   : > { %v1850_v57 = vpop.f32.mrf.mxu1 }
 0x311   : > { %v1851_v13 = vadd.f32 %v1850_v57, %v3759_v23 }
 0x312   : > { %v1852_v39 = vpop.f32.mrf.mxu1 }
 0x313   : > { %v1853_v52 = vadd.f32 %v1852_v39, %v3759_v23  ;;  %v2219_v40 = vmul.f32 %v2162_v36, %v1851_v13 }
 0x315   : > { %v2091_v15 = vcombine.low %v1851_v13, %v1853_v52  ;;  %v2274_v47 = vmul.f32 %v2219_v40, %v2219_v40  ;;  %v2220_v6 = vmul.f32 %v2166_v53, %v1853_v52  ;;  %v2246_v30 = vsel %vm965_vm0, %v2219_v40, 0.0 }
 0x316   : > { %v2247_v44 = vadd.f32 %v2246_v30, %v2245_v11  ;;  %v2182_v52 = vrot.slane %v3816_v27, %v4006_v41 }
 0x317   : > { %2109 = vst [vmem:[%s3772_s8 + $0x28] sm:$0xff] %v2091_v15  ;;  %v2301_v19 = vsel %vm965_vm0, %v2274_v47, 0.0  ;;  %v2275_v63 = vmul.f32 %v2220_v6, %v2220_v6  ;;  %v2248_v43 = vsel %vm965_vm0, %v2220_v6, 0.0 }
 0x318   : > { %v1921_v5 = vpop.f32.mrf.mxu0  ;;  %v2302_v49 = vadd.f32 %v2301_v19, %v2300_v3  ;;  %v2249_v39 = vadd.f32 %v2248_v43, %v2247_v44 }
 0x319   : > { %v1922_v61 = vadd.f32 %v1921_v5, %v3759_v23  ;;  %v2303_v28 = vsel %vm965_vm0, %v2275_v63, 0.0 }
 0x31a   : > { %v1923_v22 = vpop.f32.mrf.mxu0  ;;  %v2304_v15 = vadd.f32 %v2303_v28, %v2302_v49 }
 0x31b   : > { %v1924_v14 = vadd.f32 %v1923_v22, %v3759_v23  ;;  %v2221_v2 = vmul.f32 %v2170_v26, %v1922_v61 }
 0x31d   : > { %v2092_v46 = vcombine.low %v1922_v61, %v1924_v14  ;;  %v2276_v17 = vmul.f32 %v2221_v2, %v2221_v2  ;;  %v2222_v57 = vmul.f32 %v2174_v16, %v1924_v14  ;;  %v2250_v54 = vsel %vm965_vm0, %v2221_v2, 0.0 }
 0x31e   : > { %v2251_v18 = vadd.f32 %v2250_v54, %v2249_v39  ;;  %v2186_v61 = vrot.slane %v2115_v55, %v3999_v31 }
 0x31f   : > { %2110 = vst [vmem:[%s3772_s8 + $0x30] sm:$0xff] %v2092_v46  ;;  %v2305_v0 = vsel %vm965_vm0, %v2276_v17, 0.0  ;;  %v2277_v33 = vmul.f32 %v2222_v57, %v2222_v57  ;;  %v2252_v42 = vsel %vm965_vm0, %v2222_v57, 0.0 }
 0x320   : > { %v2306_v35 = vadd.f32 %v2305_v0, %v2304_v15  ;;  %v2253_v41 = vadd.f32 %v2252_v42, %v2251_v18 }
 0x321   : > { %v2307_v22 = vsel %vm965_vm0, %v2277_v33, 0.0 }
 0x322   : > { %v2308_v14 = vadd.f32 %v2307_v22, %v2306_v35 }
 0x32c   : > { %v1992_v1 = vpop.f32.mrf.mxu1 }
 0x32d   : > { %v1993_v9 = vadd.f32 %v1992_v1, %v3759_v23 }
 0x32e   : > { %v1994_v58 = vpop.f32.mrf.mxu1 }
 0x32f   : > { %v1995_v56 = vadd.f32 %v1994_v58, %v3759_v23  ;;  %v2223_v32 = vmul.f32 %v2178_v8, %v1993_v9 }
 0x331   : > { %v2093_v13 = vcombine.low %v1993_v9, %v1995_v56  ;;  %v2278_v5 = vmul.f32 %v2223_v32, %v2223_v32  ;;  %v2224_v38 = vmul.f32 %v2182_v52, %v1995_v56  ;;  %v2254_v48 = vsel %vm965_vm0, %v2223_v32, 0.0 }
 0x332   : > { %v2255_v37 = vadd.f32 %v2254_v48, %v2253_v41 }
 0x333   : > { %2111 = vst [vmem:[%s3772_s8 + $0x38] sm:$0xff] %v2093_v13  ;;  %v2309_v27 = vsel %vm965_vm0, %v2278_v5, 0.0  ;;  %v2279_v7 = vmul.f32 %v2224_v38, %v2224_v38  ;;  %v2256_v46 = vsel %vm965_vm0, %v2224_v38, 0.0 }
 0x334   : > { %v2310_v60 = vadd.f32 %v2309_v27, %v2308_v14  ;;  %v2257_v21 = vadd.f32 %v2256_v46, %v2255_v37 }
 0x335   : > { %v2311_v36 = vsel %vm965_vm0, %v2279_v7, 0.0 }
 0x336   : > { %v2312_v53 = vadd.f32 %v2311_v36, %v2310_v60 }
 0x33a   : > { %v2063_v62 = vpop.f32.mrf.mxu0 }
 0x33b   : > { %v2064_v4 = vadd.f32 %v2063_v62, %v3759_v23 }
 0x33c   : > { %v2065_v51 = vpop.f32.mrf.mxu0 }
 0x33d   : > { %v2225_v34 = vmul.f32 %v2186_v61, %v2064_v4  ;;  %v2066_v50 = vadd.f32 %v2065_v51, %v3759_v23 }
 0x33f   : > { %v2258_v31 = vsel %vm965_vm0, %v2225_v34, 0.0  ;;  %v2280_v59 = vmul.f32 %v2225_v34, %v2225_v34  ;;  %v2094_v20 = vcombine.low %v2064_v4, %v2066_v50  ;;  %v2226_v40 = vmul.f32 %v2190_v25, %v2066_v50 }
 0x340   : > { %v2259_v24 = vadd.f32 %v2258_v31, %v2257_v21 }
 0x341   : > { %v2313_v45 = vsel %vm965_vm0, %v2280_v59, 0.0  ;;  %2112 = vst [vmem:[%s3772_s8 + $0x40] sm:$0xff] %v2094_v20  ;;  %v2260_v10 = vsel %vm965_vm0, %v2226_v40, 0.0  ;;  %v2281_v12 = vmul.f32 %v2226_v40, %v2226_v40 }
 0x342   : > { %v2261_v29 = vadd.f32 %v2260_v10, %v2259_v24  ;;  %v2314_v47 = vadd.f32 %v2313_v45, %v2312_v53 }
 0x343   : > { %v2315_v6 = vsel %vm965_vm0, %v2281_v12, 0.0 }
 0x344   : > { %2262 = vadd.xlane.f32.xlu0 %v2261_v29  ;;  %v2316_v23 = vadd.f32 %v2315_v6, %v2314_v47 }
 0x346   : > { %2317 = vadd.xlane.f32.xlu1 %v2316_v23 }
 0x3cd   : > { %v2263_v26 = vpop.xlane.xlu0 %2262 }
 0x3cf   : > { %v2318_v11 = vpop.xlane.xlu1 %2317 }
 0x3d0   : > { %v2319_v30 = vsel %vm1254_vm3, %v2263_v26, %v2318_v11 }
 0x3d1   : > { %2321 = vst.msk [vmem:[%s289_s15] sm:$0xf] %vm2320_vm5, %v2319_v30 }
 0x3d2 PF: > { %s18_s24 = sadd.s32 1, %s2491_s24  }
 0x3d3   : > { %p15_p4 = scmp.ge.s32.totalorder %s18_s24, 4  }
 0x3d5   :  { %17 = sbr.rel (!%p15_p4) target bundleno = 1 (0x1), region = 86 }

// kernel: deconv_forward.2
= control target key start
LH: loop header
LB: loop body
LE: loop exit
PB: predicated region body
PF: predicated region fallthrough
CT: control target
= control target key end

     0   :  { %s4971_s30 = smov 0   ;;  %s6110_s0 = inlined_call_operand.vmem [shape: f32[2,8,64], index: 0, kind: input, shape index: {}]   ;;  %s6111_s1 = inlined_call_operand.vmem [shape: f32[2,4,2304], index: 1, kind: input, shape index: {}]   ;;  %s6112_s2 = inlined_call_operand.vmem [shape: f32[16,8], index: 2, kind: input, shape index: {}]   ;;  %s6113_s3 = inlined_call_operand.vmem [shape: f32[16,128], index: 3, kind: input, shape index: {}]   ;;  %s6114_s4 = inlined_call_operand.vmem [shape: f32[4,128], index: 4, kind: input, shape index: {}]   ;;  %s6115_s5 = inlined_call_operand.vmem [shape: f32[1,2304], index: 5, kind: input, shape index: {}]   ;;  %s6116_s6 = inlined_call_operand.vmem [shape: f32[4,72], index: 6, kind: input, shape index: {}]   ;;  %s6117_s7 = inlined_call_operand.vmem [shape: f32[4,1], index: 7, kind: input, shape index: {}]   ;;  %s6118_s8 = inlined_call_operand.vmem [shape: f32[2,4,2304], index: 8, kind: output, shape index: {0}]   ;;  %s6119_s9 = inlined_call_operand.vmem [shape: f32[2,4,2], index: 9, kind: output, shape index: {1}]  }
   0x1 LB: > { %s4549_s10 = sadd.s32 4294967295, %s4906_s30   ;;  %p4553_p0 = scmp.ge.s32.totalorder %s4906_s30, 1  ;;  %s4906_s30 = sphi %s4971_s30, %s20_s30  }
   0x2   : > { %p299_p1 = scmp.lt.s32.totalorder %s4906_s30, 3 }
   0x4   : > { %p300_p2 = pnand %p4553_p0, %p299_p1 }
   0x5   : > { %p343_p3 = scmp.lt.s32.totalorder (!%p300_p2), %s4549_s10, 1  ;;  %s4910_s25 = smov (!%p300_p2), 112  }
   0x6   : > { %303 = sbr.rel (%p300_p2) target bundleno = 1389 (0x56d), region = 52  ;;  %s4911_s28 = smov (!%p300_p2), 120  }
   0x7   : > { %s4912_s29 = smov (!%p300_p2), 104   ;;  %s4913_s11 = smov (!%p300_p2), 96  }
   0x8   : > { %s4914_s12 = smov (!%p300_p2), 88   ;;  %s4916_s15 = smov (!%p300_p2), 72  }
   0x9   : > { %s4917_s16 = smov (!%p300_p2), 127   ;;  %s4919_s18 = smov (!%p300_p2), 1  }
   0xb   : > { %v421_v0 = vld [vmem:[%s6112_s2] sm:$0xff]  ;;  %vm424_vm0 = vcmask 64512   ;;  %s6121_s10 = smov (!%p343_p3, %s4549_s10), 1  ;;  %v422_v2 = vld [vmem:[%s6112_s2 + $0x8] sm:$0xff]  ;;  %v4908_v21 = vmov 0.0   ;;  %vm4909_vm1 = vmmov 0  }
   0xc   : > { %4672 = vmatprep.mubr.msk.f32.mxu0 %vm424_vm0, %v421_v0  ;;  %s4554_s13 = sshll.u32 %s6121_s10, 3  ;;  %s4835_s14 = smul.u32 72, %s6121_s10  ;;  %361 = vst [vmem:[#allocation2 + $0x90] sm:$0xff] %v4908_v21  ;;  %365 = vst [vmem:[#allocation2 + $0x10] sm:$0xf0] %v4908_v21  ;;  %v5006_v22 = vld [vmem:[%s6113_s3 + $0x8] sm:$0xff]  ;;  %4695 = vmatprep.subr.mxu1 %v4908_v21 }
   0xd   : > { %s346_s17 = scalar_lea.vmem %s6110_s0, %s4554_s13  ;;  %366 = vst [vmem:[#allocation2 + $0x20] sm:$0xf0] %v4908_v21  ;;  %4696 = vmatpush3.msra.mxu1 %v5006_v22  ;;  %4697 = vmatprep.mubr.msk.f32.mxu1 %vm4909_vm1, %v4908_v21  ;;  %v5023_v26 = vld [vmem:[%s6113_s3] sm:$0xff]  ;;  %s4915_s13 = smov 80   ;;  %vm3105_vm2 = vcmask 1031168   ;;  %vm3048_vm3 = vcmask 1039360  }
   0xe   : > { %s351_s20 = scalar_lea.vmem %s6111_s1, %s4835_s14  ;;  %v423_v1 = vld [vmem:[%s346_s17] sm:$0xff]  ;;  %4705 = vmatprep.subr.mxu1 %v4908_v21  ;;  %s4918_s17 = smov 126   ;;  %vm3388_vm4 = vcmask 7168   ;;  %vm3553_vm5 = vcmask 588800   ;;  %vm4355_vm6 = vcmask 1043456   ;;  %vm4449_vm7 = vcmask 11264  }
   0xf   : > { %v367_v3 = vld [vmem:[%s351_s20] sm:$0xff]  ;;  %v368_v4 = vld [vmem:[%s351_s20 + $0x8] sm:$0xff]  ;;  %v369_v5 = vld [vmem:[%s351_s20 + $0x10] sm:$0xff]  ;;  %4670 = vmatprep.subr.mxu0 %v423_v1 }
  0x10   : > { %v370_v6 = vld [vmem:[%s351_s20 + $0x18] sm:$0xff]  ;;  %v371_v7 = vld [vmem:[%s351_s20 + $0x20] sm:$0xff]  ;;  %v372_v8 = vld [vmem:[%s351_s20 + $0x28] sm:$0xff]  ;;  %v385_v9 = vcombine.high %v367_v3, %v367_v3  ;;  %v386_v10 = vcombine.high %v368_v4, %v368_v4  ;;  %v387_v11 = vcombine.high %v369_v5, %v369_v5  ;;  %403 = vst [vmem:[#allocation2 + $0x10] sm:$0xf] %v367_v3  ;;  %4671 = vmatpush3.msra.mxu0 %v423_v1 }
  0x11   : > { %405 = vst [vmem:[#allocation2 + $0x68] sm:$0xf] %v368_v4  ;;  %407 = vst [vmem:[#allocation2 + $0xa0] sm:$0xf] %v369_v5  ;;  %v373_v12 = vld [vmem:[%s351_s20 + $0x30] sm:$0xff]  ;;  %v374_v13 = vld [vmem:[%s351_s20 + $0x38] sm:$0xff]  ;;  %v388_v15 = vcombine.high %v370_v6, %v370_v6  ;;  %v389_v16 = vcombine.high %v371_v7, %v371_v7  ;;  %v390_v17 = vcombine.high %v372_v8, %v372_v8  ;;  %4673 = vmatmul.mubr.msk.f32.vlgmr.msra.gmra.mxu0 %vm424_vm0, %v422_v2 }
  0x12   : > { %v375_v14 = vld [vmem:[%s351_s20 + $0x40] sm:$0xff]  ;;  %409 = vst [vmem:[#allocation2 + $0x18] sm:$0xf] %v370_v6  ;;  %411 = vst [vmem:[#allocation2 + $0x50] sm:$0xf] %v371_v7  ;;  %v391_v18 = vcombine.high %v373_v12, %v373_v12  ;;  %v392_v19 = vcombine.high %v374_v13, %v374_v13  ;;  %4675 = vmatprep.subr.mxu0 %v4908_v21  ;;  %4677 = vmatprep.mubr.msk.f32.mxu0 %vm4909_vm1, %v4908_v21 }
  0x13   : > { %413 = vst [vmem:[#allocation2 + $0x88] sm:$0xf] %v372_v8  ;;  %v393_v20 = vcombine.high %v375_v14, %v375_v14  ;;  %415 = vst [vmem:[#allocation2 + $0x98] sm:$0xf] %v373_v12  ;;  %4676 = vmatpush3.msra.mxu0 %v5006_v22 }
  0x14   : > { %417 = vst [vmem:[#allocation2 + $0x60] sm:$0xf] %v374_v13  ;;  %419 = vst [vmem:[#allocation2] sm:$0xf] %v375_v14  ;;  %4680 = vmatprep.subr.mxu0 %v4908_v21 }
  0x15   : > { %404 = vst [vmem:[#allocation2 + $0x58] sm:$0xf] %v385_v9  ;;  %406 = vst [vmem:[#allocation2 + $0x70] sm:$0xf] %v386_v10  ;;  %v5247_v10 = vld [vmem:[%s6114_s4] sm:$0xf] }
  0x16   : > { %408 = vst [vmem:[#allocation2 + $0x78] sm:$0xf] %v387_v11  ;;  %410 = vst [vmem:[#allocation2 + $0x30] sm:$0xf] %v388_v15 }
  0x17   : > { %412 = vst [vmem:[#allocation2 + $0x80] sm:$0xf] %v389_v16  ;;  %414 = vst [vmem:[#allocation2 + $0x48] sm:$0xf] %v390_v17  ;;  %v2955_v28 = vld [vmem:[#allocation2 + $0x10] sm:$0xff] }
  0x18   : > { %416 = vst [vmem:[#allocation2 + $0x38] sm:$0xf] %v391_v18  ;;  %418 = vst [vmem:[#allocation2 + $0xa8] sm:$0xf] %v392_v19 }
  0x19   : > { %420 = vst [vmem:[#allocation2 + $0x20] sm:$0xf] %v393_v20 }
  0x20   : > { %v5062_v29 = vld [vmem:[#allocation2 + $0x20] sm:$0xff] }
  0xd1   : > { %v5017_v23 = vpop.f32.mrf.mxu0 }
  0xd2   : > { %v5037_v27 = vrot.slane %v5017_v23, 4 }
  0xd3   : > { %v497_v24 = vpop.f32.mrf.mxu0 }
  0xd4   : > { %v510_v25 = vrot.slane %v497_v24, 4  ;;  %887 = vrot.lane.b32.xlu1 %v497_v24, %s4910_s25 }
  0xd6   : > { %660 = vrot.lane.b32.xlu0 %v510_v25, %s4911_s28  ;;  %4678 = vmatmul.mubr.msk.f32.vlgmr.msra.gmra.mxu0 %vm424_vm0, %v510_v25 }
  0xd7   : > { %4681 = vmatpush3.msra.mxu0 %v5023_v26  ;;  %4682 = vmatprep.mubr.msk.f32.mxu0 %vm4909_vm1, %v4908_v21 }
  0xd8   : > { %813 = vrot.lane.b32.xlu1 %v510_v25, %s4910_s25  ;;  %4685 = vmatprep.subr.mxu0 %v4908_v21 }
  0xda   : > { %734 = vrot.lane.b32.xlu0 %v497_v24, %s4911_s28  ;;  %4683 = vmatmul.mubr.msk.f32.vlgmr.msra.gmra.mxu0 %vm424_vm0, %v497_v24 }
  0xdb   : > { %4686 = vmatpush3.msra.mxu0 %v5006_v22  ;;  %4687 = vmatprep.mubr.msk.f32.mxu0 %vm4909_vm1, %v4908_v21 }
  0xdc   : > { %1040 = vrot.lane.b32.xlu1 %v497_v24, %s4912_s29  ;;  %4690 = vmatprep.subr.mxu0 %v4908_v21 }
  0xde   : > { %966 = vrot.lane.b32.xlu0 %v510_v25, %s4912_s29 }
  0xe0   : > { %1193 = vrot.lane.b32.xlu1 %v497_v24, %s4913_s11 }
  0xe2   : > { %1119 = vrot.lane.b32.xlu0 %v510_v25, %s4913_s11 }
  0xe4   : > { %1346 = vrot.lane.b32.xlu1 %v497_v24, %s4914_s12 }
  0xe6   : > { %1272 = vrot.lane.b32.xlu0 %v510_v25, %s4914_s12 }
  0xe8   : > { %1499 = vrot.lane.b32.xlu1 %v497_v24, %s4915_s13 }
  0xea   : > { %1425 = vrot.lane.b32.xlu0 %v510_v25, %s4915_s13 }
  0xec   : > { %1652 = vrot.lane.b32.xlu1 %v497_v24, %s4916_s15 }
  0xee   : > { %1578 = vrot.lane.b32.xlu0 %v510_v25, %s4916_s15 }
  0xf0   : > { %1956 = vrot.lane.b32.xlu1 %v5017_v23, %s4911_s28 }
  0xf2   : > { %1882 = vrot.lane.b32.xlu0 %v5037_v27, %s4911_s28 }
  0xf4   : > { %2109 = vrot.lane.b32.xlu1 %v5017_v23, %s4910_s25 }
  0xf6   : > { %2035 = vrot.lane.b32.xlu0 %v5037_v27, %s4910_s25 }
  0xf8   : > { %2262 = vrot.lane.b32.xlu1 %v5017_v23, %s4912_s29 }
  0xfa   : > { %2188 = vrot.lane.b32.xlu0 %v5037_v27, %s4912_s29  ;;  %s5987_s29 = scalar_lea.vmem %s6118_s8, %s4835_s14 }
  0xfc   : > { %2415 = vrot.lane.b32.xlu1 %v5017_v23, %s4913_s11 }
  0xfe   : > { %2341 = vrot.lane.b32.xlu0 %v5037_v27, %s4913_s11 }
 0x100   : > { %2568 = vrot.lane.b32.xlu1 %v5017_v23, %s4914_s12 }
 0x102   : > { %2494 = vrot.lane.b32.xlu0 %v5037_v27, %s4914_s12 }
 0x104   : > { %2721 = vrot.lane.b32.xlu1 %v5017_v23, %s4915_s13 }
 0x106   : > { %2647 = vrot.lane.b32.xlu0 %v5037_v27, %s4915_s13 }
 0x108   : > { %2874 = vrot.lane.b32.xlu1 %v5017_v23, %s4916_s15 }
 0x10a   : > { %2800 = vrot.lane.b32.xlu0 %v5037_v27, %s4916_s15  ;;  %s4557_s15 = sshll.u32 %s6121_s10, 2 }
 0x10c   : > { %3014 = vrot.lane.b32.xlu1 %v2955_v28, %s4917_s16 }
 0x10e   : > { %3069 = vrot.lane.b32.xlu0 %v2955_v28, %s4918_s17 }
 0x110   : > { %4863 = vrot.lane.b32.xlu1 %v4908_v21, %s4917_s16 }
 0x112   : > { %4858 = vrot.lane.b32.xlu0 %v4908_v21, %s4918_s17 }
 0x116   : > { %3220 = vrot.lane.b32.xlu0 %v2955_v28, %s4919_s18 }
 0x11a   : > { %3185 = vrot.lane.b32.xlu0 %v5062_v29, %s4918_s17 }
 0x146   : > { %v888_v30 = vpop.permute.xlu1 %887 }
 0x148   : > { %v661_v31 = vpop.permute.xlu0 %660 }
 0x149   : > { %4688 = vmatmul.mubr.msk.f32.vlgmr.msra.gmra.mxu0 %vm424_vm0, %v661_v31 }
 0x14a   : > { %v814_v32 = vpop.permute.xlu1 %813  ;;  %4691 = vmatpush3.msra.mxu0 %v5023_v26  ;;  %4692 = vmatprep.mubr.msk.f32.mxu0 %vm4909_vm1, %v4908_v21 }
 0x14b   : > { %4698 = vmatmul.mubr.msk.f32.vlgmr.msra.gmra.mxu1 %vm424_vm0, %v814_v32  ;;  %4700 = vmatprep.subr.mxu0 %v4908_v21 }
 0x14c   : > { %v735_v33 = vpop.permute.xlu0 %734  ;;  %4706 = vmatpush3.msra.mxu1 %v5006_v22  ;;  %4707 = vmatprep.mubr.msk.f32.mxu1 %vm4909_vm1, %v4908_v21 }
 0x14d   : > { %4693 = vmatmul.mubr.msk.f32.vlgmr.msra.gmra.mxu0 %vm424_vm0, %v735_v33  ;;  %4715 = vmatprep.subr.mxu1 %v4908_v21 }
 0x14e   : > { %v1041_v34 = vpop.permute.xlu1 %1040  ;;  %4701 = vmatpush3.msra.mxu0 %v5023_v26  ;;  %4702 = vmatprep.mubr.msk.f32.mxu0 %vm4909_vm1, %v4908_v21 }
 0x14f   : > { %4710 = vmatprep.subr.mxu0 %v4908_v21 }
 0x150   : > { %v967_v35 = vpop.permute.xlu0 %966 }
 0x151   : > { %4703 = vmatmul.mubr.msk.f32.vlgmr.msra.gmra.mxu0 %vm424_vm0, %v888_v30  ;;  %4708 = vmatmul.mubr.msk.f32.vlgmr.msra.gmra.mxu1 %vm424_vm0, %v967_v35 }
 0x152   : > { %v1194_v36 = vpop.permute.xlu1 %1193  ;;  %4716 = vmatpush3.msra.mxu1 %v5006_v22  ;;  %4717 = vmatprep.mubr.msk.f32.mxu1 %vm4909_vm1, %v4908_v21 }
 0x153   : > { %4711 = vmatpush3.msra.mxu0 %v5023_v26  ;;  %4712 = vmatprep.mubr.msk.f32.mxu0 %vm4909_vm1, %v4908_v21 }
 0x154   : > { %v1120_v37 = vpop.permute.xlu0 %1119  ;;  %4720 = vmatprep.subr.mxu0 %v4908_v21  ;;  %4725 = vmatprep.subr.mxu1 %v4908_v21 }
 0x155   : > { %4713 = vmatmul.mubr.msk.f32.vlgmr.msra.gmra.mxu0 %vm424_vm0, %v1041_v34  ;;  %4718 = vmatmul.mubr.msk.f32.vlgmr.msra.gmra.mxu1 %vm424_vm0, %v1120_v37 }
 0x156   : > { %v1347_v38 = vpop.permute.xlu1 %1346  ;;  %4726 = vmatpush3.msra.mxu1 %v5006_v22  ;;  %4727 = vmatprep.mubr.msk.f32.mxu1 %vm4909_vm1, %v4908_v21 }
 0x157   : > { %4721 = vmatpush3.msra.mxu0 %v5023_v26  ;;  %4722 = vmatprep.mubr.msk.f32.mxu0 %vm4909_vm1, %v4908_v21 }
 0x158   : > { %v1273_v39 = vpop.permute.xlu0 %1272  ;;  %4730 = vmatprep.subr.mxu0 %v4908_v21  ;;  %4735 = vmatprep.subr.mxu1 %v4908_v21 }
 0x159   : > { %4723 = vmatmul.mubr.msk.f32.vlgmr.msra.gmra.mxu0 %vm424_vm0, %v1194_v36  ;;  %4728 = vmatmul.mubr.msk.f32.vlgmr.msra.gmra.mxu1 %vm424_vm0, %v1273_v39 }
 0x15a   : > { %v1500_v40 = vpop.permute.xlu1 %1499  ;;  %4736 = vmatpush3.msra.mxu1 %v5006_v22  ;;  %4737 = vmatprep.mubr.msk.f32.mxu1 %vm4909_vm1, %v4908_v21 }
 0x15b   : > { %4731 = vmatpush3.msra.mxu0 %v5023_v26  ;;  %4732 = vmatprep.mubr.msk.f32.mxu0 %vm4909_vm1, %v4908_v21 }
 0x15c   : > { %v1426_v41 = vpop.permute.xlu0 %1425  ;;  %4740 = vmatprep.subr.mxu0 %v4908_v21  ;;  %4745 = vmatprep.subr.mxu1 %v4908_v21 }
 0x15d   : > { %4733 = vmatmul.mubr.msk.f32.vlgmr.msra.gmra.mxu0 %vm424_vm0, %v1347_v38  ;;  %4738 = vmatmul.mubr.msk.f32.vlgmr.msra.gmra.mxu1 %vm424_vm0, %v1426_v41 }
 0x15e   : > { %v1653_v42 = vpop.permute.xlu1 %1652  ;;  %4746 = vmatpush3.msra.mxu1 %v5006_v22  ;;  %4747 = vmatprep.mubr.msk.f32.mxu1 %vm4909_vm1, %v4908_v21 }
 0x15f   : > { %4741 = vmatpush3.msra.mxu0 %v5023_v26  ;;  %4742 = vmatprep.mubr.msk.f32.mxu0 %vm4909_vm1, %v4908_v21 }
 0x160   : > { %v1579_v43 = vpop.permute.xlu0 %1578  ;;  %4750 = vmatprep.subr.mxu0 %v4908_v21  ;;  %4755 = vmatprep.subr.mxu1 %v4908_v21 }
 0x161   : > { %4743 = vmatmul.mubr.msk.f32.vlgmr.msra.gmra.mxu0 %vm424_vm0, %v1500_v40  ;;  %4748 = vmatmul.mubr.msk.f32.vlgmr.msra.gmra.mxu1 %vm424_vm0, %v1579_v43 }
 0x162   : > { %v1957_v44 = vpop.permute.xlu1 %1956  ;;  %4756 = vmatpush3.msra.mxu1 %v5006_v22  ;;  %4757 = vmatprep.mubr.msk.f32.mxu1 %vm4909_vm1, %v4908_v21 }
 0x163   : > { %4751 = vmatpush3.msra.mxu0 %v5023_v26  ;;  %4752 = vmatprep.mubr.msk.f32.mxu0 %vm4909_vm1, %v4908_v21 }
 0x164   : > { %v1883_v45 = vpop.permute.xlu0 %1882  ;;  %4760 = vmatprep.subr.mxu0 %v4908_v21  ;;  %4765 = vmatprep.subr.mxu1 %v4908_v21 }
 0x165   : > { %4753 = vmatmul.mubr.msk.f32.vlgmr.msra.gmra.mxu0 %vm424_vm0, %v1653_v42  ;;  %4758 = vmatmul.mubr.msk.f32.vlgmr.msra.gmra.mxu1 %vm424_vm0, %v5037_v27 }
 0x166   : > { %v2110_v46 = vpop.permute.xlu1 %2109  ;;  %4766 = vmatpush3.msra.mxu1 %v5006_v22  ;;  %4767 = vmatprep.mubr.msk.f32.mxu1 %vm4909_vm1, %v4908_v21 }
 0x167   : > { %4761 = vmatpush3.msra.mxu0 %v5023_v26  ;;  %4762 = vmatprep.mubr.msk.f32.mxu0 %vm4909_vm1, %v4908_v21 }
 0x168   : > { %v2036_v47 = vpop.permute.xlu0 %2035  ;;  %4770 = vmatprep.subr.mxu0 %v4908_v21  ;;  %4775 = vmatprep.subr.mxu1 %v4908_v21 }
 0x169   : > { %4763 = vmatmul.mubr.msk.f32.vlgmr.msra.gmra.mxu0 %vm424_vm0, %v5017_v23  ;;  %4768 = vmatmul.mubr.msk.f32.vlgmr.msra.gmra.mxu1 %vm424_vm0, %v1883_v45 }
 0x16a   : > { %v2263_v48 = vpop.permute.xlu1 %2262  ;;  %4776 = vmatpush3.msra.mxu1 %v5006_v22  ;;  %4777 = vmatprep.mubr.msk.f32.mxu1 %vm4909_vm1, %v4908_v21 }
 0x16b   : > { %4771 = vmatpush3.msra.mxu0 %v5023_v26  ;;  %4772 = vmatprep.mubr.msk.f32.mxu0 %vm4909_vm1, %v4908_v21 }
 0x16c   : > { %v2189_v49 = vpop.permute.xlu0 %2188  ;;  %4780 = vmatprep.subr.mxu0 %v4908_v21  ;;  %4785 = vmatprep.subr.mxu1 %v4908_v21 }
 0x16d   : > { %4773 = vmatmul.mubr.msk.f32.vlgmr.msra.gmra.mxu0 %vm424_vm0, %v1957_v44  ;;  %4778 = vmatmul.mubr.msk.f32.vlgmr.msra.gmra.mxu1 %vm424_vm0, %v2036_v47 }
 0x16e   : > { %v2416_v50 = vpop.permute.xlu1 %2415  ;;  %4786 = vmatpush3.msra.mxu1 %v5006_v22  ;;  %4787 = vmatprep.mubr.msk.f32.mxu1 %vm4909_vm1, %v4908_v21 }
 0x16f   : > { %4781 = vmatpush3.msra.mxu0 %v5023_v26  ;;  %4782 = vmatprep.mubr.msk.f32.mxu0 %vm4909_vm1, %v4908_v21 }
 0x170   : > { %v2342_v51 = vpop.permute.xlu0 %2341  ;;  %4790 = vmatprep.subr.mxu0 %v4908_v21  ;;  %4795 = vmatprep.subr.mxu1 %v4908_v21 }
 0x171   : > { %4783 = vmatmul.mubr.msk.f32.vlgmr.msra.gmra.mxu0 %vm424_vm0, %v2110_v46  ;;  %4788 = vmatmul.mubr.msk.f32.vlgmr.msra.gmra.mxu1 %vm424_vm0, %v2189_v49 }
 0x172   : > { %v2569_v52 = vpop.permute.xlu1 %2568  ;;  %4796 = vmatpush3.msra.mxu1 %v5006_v22  ;;  %4797 = vmatprep.mubr.msk.f32.mxu1 %vm4909_vm1, %v4908_v21 }
 0x173   : > { %4791 = vmatpush3.msra.mxu0 %v5023_v26  ;;  %4792 = vmatprep.mubr.msk.f32.mxu0 %vm4909_vm1, %v4908_v21 }
 0x174   : > { %v2495_v53 = vpop.permute.xlu0 %2494  ;;  %4800 = vmatprep.subr.mxu0 %v4908_v21  ;;  %4805 = vmatprep.subr.mxu1 %v4908_v21 }
 0x175   : > { %4793 = vmatmul.mubr.msk.f32.vlgmr.msra.gmra.mxu0 %vm424_vm0, %v2263_v48  ;;  %4798 = vmatmul.mubr.msk.f32.vlgmr.msra.gmra.mxu1 %vm424_vm0, %v2342_v51 }
 0x176   : > { %4806 = vmatpush3.msra.mxu1 %v5006_v22  ;;  %4807 = vmatprep.mubr.msk.f32.mxu1 %vm4909_vm1, %v4908_v21  ;;  %v2722_v54 = vpop.permute.xlu1 %2721 }
 0x177   : > { %4801 = vmatpush3.msra.mxu0 %v5023_v26  ;;  %4802 = vmatprep.mubr.msk.f32.mxu0 %vm4909_vm1, %v4908_v21 }
 0x178   : > { %v2648_v55 = vpop.permute.xlu0 %2647  ;;  %4810 = vmatprep.subr.mxu0 %v4908_v21  ;;  %4815 = vmatprep.subr.mxu1 %v4908_v21 }
 0x179   : > { %4803 = vmatmul.mubr.msk.f32.vlgmr.msra.gmra.mxu0 %vm424_vm0, %v2416_v50  ;;  %4808 = vmatmul.mubr.msk.f32.vlgmr.msra.gmra.mxu1 %vm424_vm0, %v2495_v53 }
 0x17a   : > { %4816 = vmatpush3.msra.mxu1 %v5006_v22  ;;  %4817 = vmatprep.mubr.msk.f32.mxu1 %vm4909_vm1, %v4908_v21  ;;  %v2875_v57 = vpop.permute.xlu1 %2874 }
 0x17b   : > { %4811 = vmatpush3.msra.mxu0 %v5023_v26  ;;  %4812 = vmatprep.mubr.msk.f32.mxu0 %vm4909_vm1, %v4908_v21 }
 0x17c   : > { %v2801_v56 = vpop.permute.xlu0 %2800  ;;  %4820 = vmatprep.subr.mxu0 %v4908_v21  ;;  %4825 = vmatprep.subr.mxu1 %v4908_v21 }
 0x17d   : > { %4813 = vmatmul.mubr.msk.f32.vlgmr.msra.gmra.mxu0 %vm424_vm0, %v2569_v52  ;;  %4818 = vmatmul.mubr.msk.f32.vlgmr.msra.gmra.mxu1 %vm424_vm0, %v2648_v55 }
 0x17e   : > { %4826 = vmatpush3.msra.mxu1 %v5006_v22  ;;  %4827 = vmatprep.mubr.msk.f32.mxu1 %vm4909_vm1, %v4908_v21  ;;  %v5208_v59 = vpop.permute.xlu1 %3014 }
 0x17f   : > { %4821 = vmatpush3.msra.mxu0 %v5023_v26  ;;  %4822 = vmatprep.mubr.msk.f32.mxu0 %vm4909_vm1, %v4908_v21 }
 0x180   : > { %v5201_v58 = vpop.permute.xlu0 %3069  ;;  %4830 = vmatprep.subr.mxu0 %v4908_v21 }
 0x181   : > { %4828 = vmatmul.mubr.msk.f32.vlgmr.msra.gmra.mxu1 %vm424_vm0, %v2801_v56  ;;  %3338 = vrot.lane.b32.xlu1 %v5201_v58, %s4919_s18 }
 0x182   : > { %4823 = vmatmul.mubr.msk.f32.vlgmr.msra.gmra.mxu0 %vm424_vm0, %v2722_v54  ;;  %3621 = vmatprep.mubr.f32.mxu1 %v4908_v21  ;;  %v5217_v62 = vpop.permute.xlu1 %4863 }
 0x183   : > { %4831 = vmatpush3.msra.mxu0 %v5023_v26  ;;  %4832 = vmatprep.mubr.msk.f32.mxu0 %vm4909_vm1, %v4908_v21  ;;  %v4865_v0 = vunpack.i.l.bf16 %v5217_v62  ;;  %v4866_v20 = vunpack.i.h.bf16 %v5217_v62 }
 0x184   : > { %v4859_v60 = vpop.permute.xlu0 %4858 }
 0x185   : > { %v4860_v61 = vunpack.i.l.bf16 %v4859_v60  ;;  %3332 = vrot.lane.b32.xlu1 %v5208_v59, %s4919_s18  ;;  %v4877_v3 = vpack.i.bf16 %v4908_v21, %v4865_v0  ;;  %v3049_v4 = vsel %vm3048_vm3, %v4865_v0, %v5208_v59  ;;  %v4861_v6 = vunpack.i.h.bf16 %v4859_v60 }
 0x186   : > { %4833 = vmatmul.mubr.msk.f32.vlgmr.msra.gmra.mxu0 %vm424_vm0, %v2875_v57 }
 0x187   : > { %v4867_v63 = vpack.i.bf16 %v4860_v61, %v4908_v21  ;;  %3692 = vmatprep.mubr.f32.mxu0 %v4908_v21  ;;  %v3106_v2 = vsel %vm3105_vm2, %v4860_v61, %v5201_v58 }
 0x188   : > { %v5225_v1 = vpop.permute.xlu0 %3220 }
 0x189   : > { %3124 = vrot.lane.b32.xlu1 %v5062_v29, %s4917_s16  ;;  %4868 = vrot.lane.b32.xlu0 %v4867_v63, %s4919_s18 }
 0x18c   : > { %v5235_v5 = vpop.permute.xlu0 %3185 }
 0x18d   : > { %3294 = vrot.lane.b32.xlu1 %v3106_v2, %s4919_s18  ;;  %4873 = vrot.lane.b32.xlu0 %v4908_v21, %s4918_s17  ;;  %v3207_v7 = vsel %vm3105_vm2, %v5235_v5, %v4861_v6 }
 0x191   : > { %3256 = vrot.lane.b32.xlu1 %v3049_v4, %s4919_s18  ;;  %4878 = vrot.lane.b32.xlu0 %v4877_v3, %s4919_s18 }
 0x195   : > { %3103 = vrot.lane.b32.xlu1 %v5062_v29, %s4918_s17  ;;  %3384 = vrot.lane.b32.xlu0 %v3207_v7, %s4919_s18 }
 0x196   : > { %v579_v8 = vpop.f32.mrf.mxu0 }
 0x198   : > { %v4679_v9 = vpop.f32.mrf.mxu0 }
 0x19a   : > { %v651_v11 = vpop.f32.mrf.mxu0 }
 0x19b   : > { %v652_v12 = vadd.f32 %v651_v11, %v579_v8 }
 0x19c   : > { %v4684_v13 = vpop.f32.mrf.mxu0 }
 0x19d   : > { %v655_v14 = vadd.f32 %v652_v12, %v5247_v10 }
 0x19f   : > { %v657_v15 = vrot.slane %v655_v14, 4 }
 0x1a1   : > { %659 = vst [vmem:[#allocation2 + $0x58] sm:$0xf0] %v657_v15 }
 0x1a8   : > { %v2974_v16 = vld [vmem:[#allocation2 + $0x58] sm:$0xff] }
 0x1a9   : > { %3153 = vrot.lane.b32.xlu0 %v2974_v16, %s4918_s17 }
 0x1ad   : > { %3222 = vrot.lane.b32.xlu0 %v2974_v16, %s4919_s18 }
 0x1fb   : > { %v5252_v17 = vpop.permute.xlu0 %4868 }
 0x1ff   : > { %v5254_v18 = vpop.permute.xlu0 %4873 }
 0x200   : > { %v4875_v19 = vunpack.i.l.bf16 %v5254_v18 }
 0x202   : > { %v3208_v21 = vsel %vm3105_vm2, %v4861_v6, %v4875_v19 }
 0x203   : > { %v4882_v22 = vpack.i.bf16 %v4866_v20, %v3208_v21  ;;  %v5266_v44 = vpop.permute.xlu0 %4878 }
 0x205   : > { %4883 = vrot.lane.b32.xlu1 %v4882_v22, %s4919_s18 }
 0x207   : > { %v5276_v57 = vpop.permute.xlu0 %3384 }
 0x209   : > { %3016 = vrot.lane.b32.xlu1 %v2974_v16, %s4917_s16  ;;  %v730_v23 = vpop.f32.mrf.mxu0 }
 0x20b   : > { %v4689_v24 = vpop.f32.mrf.mxu0  ;;  %v883_v25 = vpop.f32.mrf.mxu1 }
 0x20d   : > { %v4699_v26 = vpop.f32.mrf.mxu1  ;;  %3071 = vrot.lane.b32.xlu1 %v2974_v16, %s4918_s17  ;;  %v804_v27 = vpop.f32.mrf.mxu0 }
 0x20e   : > { %v805_v28 = vadd.f32 %v804_v27, %v730_v23 }
 0x20f   : > { %v4694_v29 = vpop.f32.mrf.mxu0 }
 0x210   : > { %v808_v30 = vadd.f32 %v805_v28, %v5247_v10 }
 0x211   : > { %v957_v31 = vpop.f32.mrf.mxu0  ;;  %v1036_v32 = vpop.f32.mrf.mxu1 }
 0x212   : > { %v810_v33 = vrot.slane %v808_v30, 4  ;;  %v958_v34 = vadd.f32 %v957_v31, %v883_v25 }
 0x213   : > { %v4704_v35 = vpop.f32.mrf.mxu0  ;;  %v4709_v36 = vpop.f32.mrf.mxu1 }
 0x214   : > { %812 = vst [vmem:[#allocation2 + $0x70] sm:$0xf0] %v810_v33  ;;  %v961_v37 = vadd.f32 %v958_v34, %v5247_v10 }
 0x215   : > { %v1110_v38 = vpop.f32.mrf.mxu0  ;;  %v1189_v39 = vpop.f32.mrf.mxu1 }
 0x216   : > { %v963_v40 = vrot.slane %v961_v37, 4  ;;  %v1111_v41 = vadd.f32 %v1110_v38, %v1036_v32 }
 0x217   : > { %v4714_v42 = vpop.f32.mrf.mxu0  ;;  %v4719_v43 = vpop.f32.mrf.mxu1 }
 0x218   : > { %965 = vst [vmem:[#allocation2 + $0x78] sm:$0xf0] %v963_v40  ;;  %v1114_v45 = vadd.f32 %v1111_v41, %v5247_v10 }
 0x219   : > { %v1263_v46 = vpop.f32.mrf.mxu0  ;;  %v1342_v47 = vpop.f32.mrf.mxu1 }
 0x21a   : > { %v1116_v48 = vrot.slane %v1114_v45, 4  ;;  %v1264_v49 = vadd.f32 %v1263_v46, %v1189_v39 }
 0x21b   : > { %v4729_v50 = vpop.f32.mrf.mxu1  ;;  %v5269_v51 = vld [vmem:[#allocation2 + $0x70] sm:$0xff]  ;;  %v4724_v53 = vpop.f32.mrf.mxu0 }
 0x21c   : > { %1118 = vst [vmem:[#allocation2 + $0x30] sm:$0xf0] %v1116_v48  ;;  %v1267_v52 = vadd.f32 %v1264_v49, %v5247_v10  ;;  %3157 = vrot.lane.b32.xlu0 %v5269_v51, %s4918_s17  ;;  %3020 = vrot.lane.b32.xlu1 %v5269_v51, %s4917_s16  ;;  %v5281_v4 = vpop.permute.xlu0 %3153 }
 0x21d   : > { %v1495_v54 = vpop.f32.mrf.mxu1  ;;  %v1416_v56 = vpop.f32.mrf.mxu0 }
 0x21e   : > { %v1269_v55 = vrot.slane %v1267_v52, 4  ;;  %v1417_v60 = vadd.f32 %v1416_v56, %v1342_v47 }
 0x21f   : > { %v4739_v61 = vpop.f32.mrf.mxu1  ;;  %v4734_v63 = vpop.f32.mrf.mxu0 }
 0x220   : > { %1271 = vst [vmem:[#allocation2 + $0x80] sm:$0xf0] %v1269_v55  ;;  %3075 = vrot.lane.b32.xlu0 %v5269_v51, %s4918_s17  ;;  %v1420_v0 = vadd.f32 %v1417_v60, %v5247_v10 }
 0x221   : > { %v1648_v2 = vpop.f32.mrf.mxu1  ;;  %v1569_v3 = vpop.f32.mrf.mxu0 }
 0x222   : > { %v1422_v6 = vrot.slane %v1420_v0, 4  ;;  %v1570_v7 = vadd.f32 %v1569_v3, %v1495_v54 }
 0x223   : > { %v4749_v8 = vpop.f32.mrf.mxu1  ;;  %v4744_v9 = vpop.f32.mrf.mxu0 }
 0x224   : > { %3350 = vrot.lane.b32.xlu0 %v5281_v4, %s4919_s18  ;;  %1424 = vst [vmem:[#allocation2 + $0x48] sm:$0xf0] %v1422_v6  ;;  %v1573_v11 = vadd.f32 %v1570_v7, %v5247_v10 }
 0x225   : > { %v1801_v12 = vpop.f32.mrf.mxu1  ;;  %v1722_v13 = vpop.f32.mrf.mxu0 }
 0x226   : > { %v1575_v14 = vrot.slane %v1573_v11, 4  ;;  %v1723_v15 = vadd.f32 %v1722_v13, %v1648_v2 }
 0x227   : > { %v4759_v16 = vpop.f32.mrf.mxu1  ;;  %v4754_v19 = vpop.f32.mrf.mxu0 }
 0x228   : > { %1577 = vst [vmem:[#allocation2 + $0x38] sm:$0xf0] %v1575_v14  ;;  %v1726_v21 = vadd.f32 %v1723_v15, %v5247_v10 }
 0x229   : > { %v1952_v22 = vpop.f32.mrf.mxu1  ;;  %v1873_v23 = vpop.f32.mrf.mxu0 }
 0x22a   : > { %v1728_v24 = vrot.slane %v1726_v21, 4  ;;  %v1874_v25 = vadd.f32 %v1873_v23, %v1801_v12 }
 0x22b   : > { %v4769_v26 = vpop.f32.mrf.mxu1  ;;  %v4764_v27 = vpop.f32.mrf.mxu0 }
 0x22c   : > { %1730 = vst [vmem:[#allocation2 + $0xa8] sm:$0xf0] %v1728_v24  ;;  %v1877_v28 = vadd.f32 %v1874_v25, %v5247_v10  ;;  %v5295_v26 = vpop.permute.xlu1 %3338 }
 0x22d   : > { %v2105_v29 = vpop.f32.mrf.mxu1  ;;  %v2026_v30 = vpop.f32.mrf.mxu0 }
 0x22e   : > { %v1879_v31 = vrot.slane %v1877_v28, 4  ;;  %v2027_v32 = vadd.f32 %v2026_v30, %v1952_v22 }
 0x22f   : > { %v4779_v33 = vpop.f32.mrf.mxu1  ;;  %v4774_v34 = vpop.f32.mrf.mxu0 }
 0x230   : > { %1881 = vst [vmem:[#allocation2 + $0x68] sm:$0xf0] %v1879_v31  ;;  %v2030_v35 = vadd.f32 %v2027_v32, %v5247_v10  ;;  %v5297_v27 = vpop.permute.xlu1 %3332 }
 0x231   : > { %v2258_v36 = vpop.f32.mrf.mxu1  ;;  %v2179_v37 = vpop.f32.mrf.mxu0 }
 0x232   : > { %v2032_v38 = vrot.slane %v2030_v35, 4  ;;  %v2180_v39 = vadd.f32 %v2179_v37, %v2105_v29  ;;  %v2960_v35 = vld [vmem:[#allocation2 + $0x78] sm:$0xff] }
 0x233   : > { %v4789_v40 = vpop.f32.mrf.mxu1  ;;  %v4784_v41 = vpop.f32.mrf.mxu0  ;;  %v2968_v37 = vld [vmem:[#allocation2 + $0x38] sm:$0xff] }
 0x234   : > { %2034 = vst [vmem:[#allocation2 + $0xa0] sm:$0xf0] %v2032_v38  ;;  %v2183_v42 = vadd.f32 %v2180_v39, %v5247_v10  ;;  %v5299_v28 = vpop.permute.xlu1 %3124  ;;  %v2970_v38 = vld [vmem:[#allocation2 + $0xa8] sm:$0xff] }
 0x235   : > { %v2411_v43 = vpop.f32.mrf.mxu1  ;;  %v2332_v45 = vpop.f32.mrf.mxu0 }
 0x236   : > { %v2185_v46 = vrot.slane %v2183_v42, 4  ;;  %v2333_v47 = vadd.f32 %v2332_v45, %v2258_v36  ;;  %v5369_v45 = vpop.permute.xlu0 %3222 }
 0x237   : > { %v4799_v48 = vpop.f32.mrf.mxu1  ;;  %v4794_v49 = vpop.f32.mrf.mxu0  ;;  %v2957_v39 = vld [vmem:[#allocation2 + $0x68] sm:$0xff] }
 0x238   : > { %2187 = vst [vmem:[#allocation2 + $0x18] sm:$0xf0] %v2185_v46  ;;  %v2336_v50 = vadd.f32 %v2333_v47, %v5247_v10  ;;  %v5301_v29 = vpop.permute.xlu1 %3294 }
 0x239   : > { %v2564_v52 = vpop.f32.mrf.mxu1  ;;  %v2485_v53 = vpop.f32.mrf.mxu0 }
 0x23a   : > { %v2338_v54 = vrot.slane %v2336_v50, 4  ;;  %v2486_v55 = vadd.f32 %v2485_v53, %v2411_v43 }
 0x23b   : > { %v4809_v56 = vpop.f32.mrf.mxu1  ;;  %v4804_v60 = vpop.f32.mrf.mxu0  ;;  %v2977_v40 = vld [vmem:[#allocation2 + $0xa0] sm:$0xff] }
 0x23c   : > { %2340 = vst [vmem:[#allocation2 + $0x50] sm:$0xf0] %v2338_v54  ;;  %v2489_v61 = vadd.f32 %v2486_v55, %v5247_v10  ;;  %v5303_v30 = vpop.permute.xlu1 %3256 }
 0x23d   : > { %v2717_v63 = vpop.f32.mrf.mxu1  ;;  %v2638_v0 = vpop.f32.mrf.mxu0 }
 0x23e   : > { %v2491_v2 = vrot.slane %v2489_v61, 4  ;;  %v2639_v3 = vadd.f32 %v2638_v0, %v2564_v52 }
 0x23f   : > { %v4819_v6 = vpop.f32.mrf.mxu1  ;;  %v4814_v7 = vpop.f32.mrf.mxu0  ;;  %v2961_v41 = vld [vmem:[#allocation2 + $0x18] sm:$0xff] }
 0x240   : > { %2493 = vst [vmem:[#allocation2 + $0x88] sm:$0xf0] %v2491_v2  ;;  %v2642_v8 = vadd.f32 %v2639_v3, %v5247_v10  ;;  %v5305_v31 = vpop.permute.xlu1 %3103 }
 0x241   : > { %v2870_v9 = vpop.f32.mrf.mxu1 }
 0x242   : > { %v2791_v11 = vpop.f32.mrf.mxu0  ;;  %v2644_v12 = vrot.slane %v2642_v8, 4 }
 0x243   : > { %v2792_v13 = vadd.f32 %v2791_v11, %v2717_v63  ;;  %v4829_v14 = vpop.f32.mrf.mxu1  ;;  %v2963_v42 = vld [vmem:[#allocation2 + $0x50] sm:$0xff] }
 0x244   : > { %v4824_v15 = vpop.f32.mrf.mxu0  ;;  %2646 = vst [vmem:[#allocation2 + $0x98] sm:$0xf0] %v2644_v12 }
 0x245   : > { %v2795_v16 = vadd.f32 %v2792_v13, %v5247_v10 }
 0x246   : > { %v2944_v19 = vpop.f32.mrf.mxu0 }
 0x247   : > { %v2797_v21 = vrot.slane %v2795_v16, 4  ;;  %v2945_v22 = vadd.f32 %v2944_v19, %v2870_v9  ;;  %v2965_v43 = vld [vmem:[#allocation2 + $0x88] sm:$0xff] }
 0x248   : > { %v4834_v23 = vpop.f32.mrf.mxu0 }
 0x249   : > { %2799 = vst [vmem:[#allocation2 + $0x60] sm:$0xf0] %v2797_v21  ;;  %v2948_v24 = vadd.f32 %v2945_v22, %v5247_v10 }
 0x24b   : > { %v2950_v25 = vrot.slane %v2948_v24, 4  ;;  %v2967_v46 = vld [vmem:[#allocation2 + $0x98] sm:$0xff] }
 0x24d   : > { %2952 = vst [vmem:[#allocation2] sm:$0xf0] %v2950_v25 }
 0x250   : > { %v2969_v48 = vld [vmem:[#allocation2 + $0x60] sm:$0xff] }
 0x254   : > { %v2989_v53 = vld [vmem:[#allocation2] sm:$0xff] }
 0x277   : > { %v5307_v32 = vpop.permute.xlu1 %4883 }
 0x27b   : > { %v5309_v33 = vpop.permute.xlu1 %3016 }
 0x27c   : > { %3344 = vrot.lane.b32.xlu1 %v5309_v33, %s4919_s18  ;;  %v3050_v10 = vsel %vm3048_vm3, %v5208_v59, %v5309_v33  ;;  %v2962_v59 = vld [vmem:[#allocation2 + $0x30] sm:$0xff] }
 0x27d   : > { %3258 = vrot.lane.b32.xlu0 %v3050_v10, %s4919_s18 }
 0x27f   : > { %v5317_v34 = vpop.permute.xlu1 %3071 }
 0x280   : > { %3226 = vrot.lane.b32.xlu1 %v5269_v51, %s4919_s18  ;;  %v3107_v36 = vsel %vm3105_vm2, %v5201_v58, %v5317_v34  ;;  %v2964_v51 = vld [vmem:[#allocation2 + $0x80] sm:$0xff]  ;;  %v2966_v58 = vld [vmem:[#allocation2 + $0x48] sm:$0xff] }
 0x281   : > { %3079 = vrot.lane.b32.xlu0 %v2960_v35, %s4918_s17 }
 0x284   : > { %3296 = vrot.lane.b32.xlu1 %v3107_v36, %s4919_s18 }
 0x285   : > { %3230 = vrot.lane.b32.xlu0 %v2960_v35, %s4919_s18 }
 0x288   : > { %3161 = vrot.lane.b32.xlu1 %v2960_v35, %s4918_s17 }
 0x289   : > { %3083 = vrot.lane.b32.xlu0 %v2962_v59, %s4918_s17 }
 0x28c   : > { %3024 = vrot.lane.b32.xlu1 %v2960_v35, %s4917_s16 }
 0x28d   : > { %3234 = vrot.lane.b32.xlu0 %v2962_v59, %s4919_s18 }
 0x28e   : > { %v5373_v47 = vpop.permute.xlu0 %3157  ;;  %v3021_v50 = vpop.permute.xlu1 %3020 }
 0x290   : > { %3165 = vrot.lane.b32.xlu1 %v2962_v59, %s4918_s17 }
 0x291   : > { %3087 = vrot.lane.b32.xlu0 %v2964_v51, %s4918_s17 }
 0x292   : > { %v5378_v49 = vpop.permute.xlu0 %3075 }
 0x294   : > { %3028 = vrot.lane.b32.xlu1 %v2962_v59, %s4917_s16 }
 0x295   : > { %3238 = vrot.lane.b32.xlu0 %v2964_v51, %s4919_s18 }
 0x296   : > { %v5383_v52 = vpop.permute.xlu0 %3350 }
 0x298   : > { %3169 = vrot.lane.b32.xlu1 %v2964_v51, %s4918_s17 }
 0x299   : > { %3091 = vrot.lane.b32.xlu0 %v2966_v58, %s4918_s17 }
 0x29c   : > { %3032 = vrot.lane.b32.xlu1 %v2964_v51, %s4917_s16 }
 0x29d   : > { %3242 = vrot.lane.b32.xlu0 %v2966_v58, %s4919_s18 }
 0x2a0   : > { %3173 = vrot.lane.b32.xlu1 %v2966_v58, %s4918_s17 }
 0x2a1   : > { %3095 = vrot.lane.b32.xlu0 %v2968_v37, %s4918_s17 }
 0x2a4   : > { %3036 = vrot.lane.b32.xlu1 %v2966_v58, %s4917_s16 }
 0x2a5   : > { %3246 = vrot.lane.b32.xlu0 %v2968_v37, %s4919_s18 }
 0x2a8   : > { %3177 = vrot.lane.b32.xlu1 %v2968_v37, %s4918_s17 }
 0x2a9   : > { %3099 = vrot.lane.b32.xlu0 %v2970_v38, %s4918_s17 }
 0x2ac   : > { %3040 = vrot.lane.b32.xlu1 %v2968_v37, %s4917_s16 }
 0x2ad   : > { %3250 = vrot.lane.b32.xlu0 %v2970_v38, %s4919_s18 }
 0x2b0   : > { %3181 = vrot.lane.b32.xlu1 %v2970_v38, %s4918_s17 }
 0x2b1   : > { %3018 = vrot.lane.b32.xlu0 %v2957_v39, %s4917_s16 }
 0x2b4   : > { %3044 = vrot.lane.b32.xlu1 %v2970_v38, %s4917_s16 }
 0x2b5   : > { %3073 = vrot.lane.b32.xlu0 %v2957_v39, %s4918_s17 }
 0x2b8   : > { %3155 = vrot.lane.b32.xlu1 %v2957_v39, %s4918_s17 }
 0x2b9   : > { %3159 = vrot.lane.b32.xlu0 %v2977_v40, %s4918_s17 }
 0x2bc   : > { %3224 = vrot.lane.b32.xlu1 %v2957_v39, %s4919_s18 }
 0x2bd   : > { %3022 = vrot.lane.b32.xlu0 %v2977_v40, %s4917_s16 }
 0x2c0   : > { %3077 = vrot.lane.b32.xlu1 %v2977_v40, %s4918_s17 }
 0x2c1   : > { %3228 = vrot.lane.b32.xlu0 %v2977_v40, %s4919_s18 }
 0x2c4   : > { %3081 = vrot.lane.b32.xlu1 %v2961_v41, %s4918_s17 }
 0x2c5   : > { %3163 = vrot.lane.b32.xlu0 %v2961_v41, %s4918_s17 }
 0x2c8   : > { %3232 = vrot.lane.b32.xlu1 %v2961_v41, %s4919_s18 }
 0x2c9   : > { %3026 = vrot.lane.b32.xlu0 %v2961_v41, %s4917_s16 }
 0x2cc   : > { %3085 = vrot.lane.b32.xlu1 %v2963_v42, %s4918_s17 }
 0x2cd   : > { %3167 = vrot.lane.b32.xlu0 %v2963_v42, %s4918_s17 }
 0x2d0   : > { %3236 = vrot.lane.b32.xlu1 %v2963_v42, %s4919_s18 }
 0x2d1   : > { %3030 = vrot.lane.b32.xlu0 %v2963_v42, %s4917_s16 }
 0x2d4   : > { %3089 = vrot.lane.b32.xlu1 %v2965_v43, %s4918_s17 }
 0x2d5   : > { %3171 = vrot.lane.b32.xlu0 %v2965_v43, %s4918_s17 }
 0x2d8   : > { %3240 = vrot.lane.b32.xlu1 %v2965_v43, %s4919_s18 }
 0x2d9   : > { %3034 = vrot.lane.b32.xlu0 %v2965_v43, %s4917_s16 }
 0x2dc   : > { %3093 = vrot.lane.b32.xlu1 %v2967_v46, %s4918_s17 }
 0x2dd   : > { %3175 = vrot.lane.b32.xlu0 %v2967_v46, %s4918_s17 }
 0x2e0   : > { %3244 = vrot.lane.b32.xlu1 %v2967_v46, %s4919_s18 }
 0x2e1   : > { %3038 = vrot.lane.b32.xlu0 %v2967_v46, %s4917_s16 }
 0x2e4   : > { %3097 = vrot.lane.b32.xlu1 %v2969_v48, %s4918_s17 }
 0x2e5   : > { %3179 = vrot.lane.b32.xlu0 %v2969_v48, %s4918_s17 }
 0x2e8   : > { %3248 = vrot.lane.b32.xlu1 %v2969_v48, %s4919_s18 }
 0x2e9   : > { %3042 = vrot.lane.b32.xlu0 %v2969_v48, %s4917_s16 }
 0x2ec   : > { %3183 = vrot.lane.b32.xlu1 %v2989_v53, %s4918_s17 }
 0x2ed   : > { %3046 = vrot.lane.b32.xlu0 %v2989_v53, %s4917_s16 }
 0x2ee   : > { %v5387_v54 = vpop.permute.xlu1 %3344 }
 0x2ef   : > { %v5389_v55 = vpop.permute.xlu0 %3258 }
 0x2f0   : > { %3101 = vrot.lane.b32.xlu1 %v2989_v53, %s4918_s17 }
 0x2f2   : > { %v5392_v56 = vpop.permute.xlu1 %3226 }
 0x2f3   : > { %v5394_v60 = vpop.permute.xlu0 %3079 }
 0x2f4   : > { %3252 = vrot.lane.b32.xlu1 %v2989_v53, %s4919_s18 }
 0x2f6   : > { %v5397_v61 = vpop.permute.xlu1 %3296 }
 0x2f7   : > { %v5399_v63 = vpop.permute.xlu0 %3230 }
 0x2fa   : > { %v3162_v0 = vpop.permute.xlu1 %3161 }
 0x2fb   : > { %v5401_v2 = vpop.permute.xlu0 %3083 }
 0x2fe   : > { %v5403_v3 = vpop.permute.xlu1 %3024 }
 0x2ff   : > { %v5405_v6 = vpop.permute.xlu0 %3234 }
 0x302   : > { %v5407_v7 = vpop.permute.xlu1 %3165 }
 0x303   : > { %v5409_v8 = vpop.permute.xlu0 %3087 }
 0x306   : > { %v5411_v9 = vpop.permute.xlu1 %3028 }
 0x307   : > { %v5413_v11 = vpop.permute.xlu0 %3238 }
 0x30a   : > { %v5415_v12 = vpop.permute.xlu1 %3169 }
 0x30b   : > { %v5417_v13 = vpop.permute.xlu0 %3091 }
 0x30e   : > { %v5419_v14 = vpop.permute.xlu1 %3032 }
 0x30f   : > { %v5421_v15 = vpop.permute.xlu0 %3242 }
 0x312   : > { %v5423_v16 = vpop.permute.xlu1 %3173 }
 0x313   : > { %v5425_v19 = vpop.permute.xlu0 %3095 }
 0x316   : > { %v5427_v21 = vpop.permute.xlu1 %3036 }
 0x317   : > { %v5429_v22 = vpop.permute.xlu0 %3246 }
 0x31a   : > { %v5431_v23 = vpop.permute.xlu1 %3177 }
 0x31b   : > { %v5433_v24 = vpop.permute.xlu0 %3099 }
 0x31e   : > { %v5435_v25 = vpop.permute.xlu1 %3040 }
 0x31f   : > { %v5437_v10 = vpop.permute.xlu0 %3250 }
 0x322   : > { %v5439_v35 = vpop.permute.xlu1 %3181 }
 0x323   : > { %v3019_v36 = vpop.permute.xlu0 %3018 }
 0x324   : > { %v3051_v41 = vsel %vm3048_vm3, %v5309_v33, %v3019_v36  ;;  %v3052_v42 = vsel %vm3048_vm3, %v3019_v36, %v3021_v50 }
 0x326   : > { %v5441_v59 = vpop.permute.xlu1 %3044 }
 0x327   : > { %v3074_v51 = vpop.permute.xlu0 %3073 }
 0x328   : > { %v3108_v46 = vsel %vm3105_vm2, %v5317_v34, %v3074_v51  ;;  %v3109_v36 = vsel %vm3105_vm2, %v3074_v51, %v5378_v49 }
 0x32a   : > { %v3156_v58 = vpop.permute.xlu1 %3155 }
 0x32b   : > { %v3191_v37 = vsel %vm3105_vm2, %v5281_v4, %v3156_v58  ;;  %v3192_v38 = vsel %vm3105_vm2, %v3156_v58, %v5373_v47  ;;  %v3160_v39 = vpop.permute.xlu0 %3159 }
 0x32c   : > { %3354 = vrot.lane.b32.xlu1 %v3192_v38, %s4919_s18  ;;  %3352 = vrot.lane.b32.xlu0 %v3191_v37, %s4919_s18  ;;  %v3194_v48 = vsel %vm3105_vm2, %v3160_v39, %v3162_v0  ;;  %v3193_v38 = vsel %vm3105_vm2, %v5373_v47, %v3160_v39 }
 0x32e   : > { %v5449_v40 = vpop.permute.xlu1 %3224 }
 0x32f   : > { %v3023_v43 = vpop.permute.xlu0 %3022 }
 0x330   : > { %3260 = vrot.lane.b32.xlu1 %v3051_v41, %s4919_s18  ;;  %3262 = vrot.lane.b32.xlu0 %v3052_v42, %s4919_s18  ;;  %v3053_v58 = vsel %vm3048_vm3, %v3021_v50, %v3023_v43  ;;  %v3054_v50 = vsel %vm3048_vm3, %v3023_v43, %v5403_v3 }
 0x332   : > { %v3078_v4 = vpop.permute.xlu1 %3077 }
 0x333   : > { %v5459_v53 = vpop.permute.xlu0 %3228  ;;  %v3110_v41 = vsel %vm3105_vm2, %v5378_v49, %v3078_v4  ;;  %v3111_v47 = vsel %vm3105_vm2, %v3078_v4, %v5394_v60 }
 0x334   : > { %3358 = vrot.lane.b32.xlu1 %v3194_v48, %s4919_s18  ;;  %3298 = vrot.lane.b32.xlu0 %v3108_v46, %s4919_s18 }
 0x336   : > { %v3082_v33 = vpop.permute.xlu1 %3081 }
 0x337   : > { %v3164_v37 = vpop.permute.xlu0 %3163 }
 0x338   : > { %3264 = vrot.lane.b32.xlu1 %v3053_v58, %s4919_s18  ;;  %3300 = vrot.lane.b32.xlu0 %v3109_v36, %s4919_s18  ;;  %v3195_v42 = vsel %vm3105_vm2, %v3162_v0, %v3164_v37  ;;  %v3112_v0 = vsel %vm3105_vm2, %v5394_v60, %v3082_v33  ;;  %v3196_v36 = vsel %vm3105_vm2, %v3164_v37, %v5407_v7 }
 0x339   : > { %v3113_v37 = vsel %vm3105_vm2, %v3082_v33, %v5401_v2 }
 0x33a   : > { %v5468_v34 = vpop.permute.xlu1 %3232 }
 0x33b   : > { %v3027_v46 = vpop.permute.xlu0 %3026 }
 0x33c   : > { %3302 = vrot.lane.b32.xlu1 %v3110_v41, %s4919_s18  ;;  %3356 = vrot.lane.b32.xlu0 %v3193_v38, %s4919_s18  ;;  %v3056_v49 = vsel %vm3048_vm3, %v3027_v46, %v5411_v9  ;;  %v3055_v58 = vsel %vm3048_vm3, %v5403_v3, %v3027_v46 }
 0x33e   : > { %v3086_v51 = vpop.permute.xlu1 %3085 }
 0x33f   : > { %v3168_v39 = vpop.permute.xlu0 %3167  ;;  %v3114_v46 = vsel %vm3105_vm2, %v5401_v2, %v3086_v51 }
 0x340   : > { %3360 = vrot.lane.b32.xlu1 %v3195_v42, %s4919_s18  ;;  %3266 = vrot.lane.b32.xlu0 %v3054_v50, %s4919_s18  ;;  %v3198_v38 = vsel %vm3105_vm2, %v3168_v39, %v5415_v12 }
 0x342   : > { %v5481_v48 = vpop.permute.xlu1 %3236 }
 0x343   : > { %v3031_v41 = vpop.permute.xlu0 %3030 }
 0x344   : > { %3270 = vrot.lane.b32.xlu1 %v3056_v49, %s4919_s18  ;;  %3304 = vrot.lane.b32.xlu0 %v3111_v47, %s4919_s18  ;;  %v3058_v50 = vsel %vm3048_vm3, %v3031_v41, %v5419_v14  ;;  %v3197_v47 = vsel %vm3105_vm2, %v5407_v7, %v3168_v39  ;;  %v3115_v39 = vsel %vm3105_vm2, %v3086_v51, %v5409_v8 }
 0x346   : > { %v3090_v43 = vpop.permute.xlu1 %3089 }
 0x347   : > { %v3172_v3 = vpop.permute.xlu0 %3171 }
 0x348   : > { %3306 = vrot.lane.b32.xlu1 %v3112_v0, %s4919_s18  ;;  %3362 = vrot.lane.b32.xlu0 %v3196_v36, %s4919_s18  ;;  %v3057_v0 = vsel %vm3048_vm3, %v5411_v9, %v3031_v41  ;;  %v3200_v36 = vsel %vm3105_vm2, %v3172_v3, %v5423_v16  ;;  %v3116_v41 = vsel %vm3105_vm2, %v5409_v8, %v3090_v43 }
 0x349   : > { %v3117_v8 = vsel %vm3105_vm2, %v3090_v43, %v5417_v13 }
 0x34a   : > { %v5495_v4 = vpop.permute.xlu1 %3240 }
 0x34b   : > { %v3035_v2 = vpop.permute.xlu0 %3034 }
 0x34c   : > { %3366 = vrot.lane.b32.xlu1 %v3198_v38, %s4919_s18  ;;  %3268 = vrot.lane.b32.xlu0 %v3055_v58, %s4919_s18  ;;  %v3060_v58 = vsel %vm3048_vm3, %v3035_v2, %v5427_v21  ;;  %v3059_v51 = vsel %vm3048_vm3, %v5419_v14, %v3035_v2 }
 0x34e   : > { %v3094_v60 = vpop.permute.xlu1 %3093 }
 0x34f   : > { %v3176_v38 = vpop.permute.xlu0 %3175  ;;  %v3118_v14 = vsel %vm3105_vm2, %v5417_v13, %v3094_v60  ;;  %v3119_v13 = vsel %vm3105_vm2, %v3094_v60, %v5425_v19 }
 0x350   : > { %3274 = vrot.lane.b32.xlu1 %v3058_v50, %s4919_s18  ;;  %3308 = vrot.lane.b32.xlu0 %v3113_v37, %s4919_s18  ;;  %v3199_v37 = vsel %vm3105_vm2, %v5415_v12, %v3172_v3  ;;  %v3201_v3 = vsel %vm3105_vm2, %v5423_v16, %v3176_v38  ;;  %v4898_v16 = vld [vmem:[#allocation2 + $0x20] sm:$0xff] }
 0x352   : > { %v5509_v42 = vpop.permute.xlu1 %3244 }
 0x353   : > { %v5518_v33 = vsel %vm3388_vm4, %v5509_v42, %v5429_v22  ;;  %v3039_v50 = vpop.permute.xlu0 %3038 }
 0x354   : > { %3310 = vrot.lane.b32.xlu1 %v3114_v46, %s4919_s18  ;;  %3364 = vrot.lane.b32.xlu0 %v3197_v47, %s4919_s18  ;;  %v3062_v12 = vsel %vm3048_vm3, %v3039_v50, %v5435_v25  ;;  %v3061_v43 = vsel %vm3048_vm3, %v5427_v21, %v3039_v50 }
 0x356   : > { %v3098_v49 = vpop.permute.xlu1 %3097 }
 0x357   : > { %v3180_v46 = vpop.permute.xlu0 %3179  ;;  %v3120_v2 = vsel %vm3105_vm2, %v5425_v19, %v3098_v49  ;;  %v3121_v19 = vsel %vm3105_vm2, %v3098_v49, %v5433_v24 }
 0x358   : > { %3370 = vrot.lane.b32.xlu1 %v3200_v36, %s4919_s18  ;;  %3272 = vrot.lane.b32.xlu0 %v3057_v0, %s4919_s18  ;;  %v3204_v47 = vsel %vm3105_vm2, %v3180_v46, %v5439_v35  ;;  %v3203_v36 = vsel %vm3105_vm2, %v5431_v23, %v3180_v46  ;;  %v5641_v46 = vsel %vm3388_vm4, %v5369_v45, %v5449_v40 }
 0x35a   : > { %v5528_v7 = vpop.permute.xlu1 %3248 }
 0x35b   : > { %v5537_v9 = vsel %vm3388_vm4, %v5429_v22, %v5528_v7  ;;  %v3202_v22 = vsel %vm3105_vm2, %v3176_v38, %v5431_v23  ;;  %v3043_v0 = vpop.permute.xlu0 %3042 }
 0x35c   : > { %3278 = vrot.lane.b32.xlu1 %v3060_v58, %s4919_s18  ;;  %3312 = vrot.lane.b32.xlu0 %v3115_v39, %s4919_s18  ;;  %v3064_v21 = vsel %vm3048_vm3, %v3043_v0, %v5441_v59  ;;  %v3063_v60 = vsel %vm3048_vm3, %v5435_v25, %v3043_v0  ;;  %v3133_v58 = vsel %vm3048_vm3, %v5299_v28, %v4866_v20 }
 0x35d   : > { %v3447_v0 = vsel %vm3388_vm4, %v5295_v26, %v5397_v61 }
 0x35e   : > { %v3184_v39 = vpop.permute.xlu1 %3183 }
 0x35f   : > { %v3206_v23 = vsel %vm3105_vm2, %v3184_v39, %v5235_v5  ;;  %v3047_v38 = vpop.permute.xlu0 %3046  ;;  %v3205_v62 = vsel %vm3105_vm2, %v5439_v35, %v3184_v39  ;;  %v5615_v35 = vld [vmem:[#allocation2 + $0x90] sm:$0xff]  ;;  %v3426_v39 = vsel %vm3388_vm4, %v5301_v29, %v5397_v61 }
 0x360   : > { %3314 = vrot.lane.b32.xlu1 %v3116_v41, %s4919_s18  ;;  %3368 = vrot.lane.b32.xlu0 %v3199_v37, %s4919_s18  ;;  %v3126_v25 = vsel %vm3048_vm3, %v3047_v38, %v5299_v28  ;;  %v3065_v49 = vsel %vm3048_vm3, %v5441_v59, %v3047_v38  ;;  %v4920_v37 = vmov 0   ;;  %v3209_v59 = vld [vmem:[%s6117_s7] sm:$0xf] }
 0x361   : > { %4887 = vset.pattern.permute.xlu1 %v4920_v37  ;;  %4888 = vset.pattern.permute.xlu0 %v4920_v37 }
 0x362   : > { %v3102_v41 = vpop.permute.xlu1 %3101 }
 0x363   : > { %v3122_v5 = vsel %vm3105_vm2, %v5433_v24, %v3102_v41  ;;  %v3123_v20 = vsel %vm3105_vm2, %v3102_v41, %v5305_v31  ;;  %v4876_v24 = vunpack.i.h.bf16 %v5254_v18 }
 0x364   : > { %3374 = vrot.lane.b32.xlu1 %v3202_v22, %s4919_s18  ;;  %3276 = vrot.lane.b32.xlu0 %v3059_v51, %s4919_s18 }
 0x365   : > { %v3130_v51 = vsel %vm3105_vm2, %v5305_v31, %v4876_v24 }
 0x368   : > { %3282 = vrot.lane.b32.xlu1 %v3062_v12, %s4919_s18  ;;  %3316 = vrot.lane.b32.xlu0 %v3117_v8, %s4919_s18 }
 0x36c   : > { %3318 = vrot.lane.b32.xlu1 %v3118_v14, %s4919_s18  ;;  %3372 = vrot.lane.b32.xlu0 %v3201_v3, %s4919_s18 }
 0x370   : > { %3378 = vrot.lane.b32.xlu1 %v3204_v47, %s4919_s18  ;;  %3280 = vrot.lane.b32.xlu0 %v3061_v43, %s4919_s18  ;;  %v5649_v47 = vsel %vm3388_vm4, %v5225_v1, %v5369_v45 }
 0x374   : > { %3330 = vrot.lane.b32.xlu1 %v4898_v16, %s4919_s18  ;;  %3320 = vrot.lane.b32.xlu0 %v3119_v13, %s4919_s18  ;;  %v4870_v13 = vunpack.i.l.bf16 %v5252_v17 }
 0x376   : > { %v3390_v26 = vsel %vm3388_vm4, %v4870_v13, %v5225_v1  ;;  %v3408_v1 = vsel %vm3388_vm4, %v5303_v30, %v5389_v55 }
 0x378   : > { %3286 = vrot.lane.b32.xlu1 %v3064_v21, %s4919_s18  ;;  %3376 = vrot.lane.b32.xlu0 %v3203_v36, %s4919_s18  ;;  %v3444_v21 = vsel %vm3388_vm4, %v5297_v27, %v5389_v55 }
 0x37c   : > { %3322 = vrot.lane.b32.xlu1 %v3120_v2, %s4919_s18  ;;  %3284 = vrot.lane.b32.xlu0 %v3063_v60, %s4919_s18  ;;  %v4871_v2 = vunpack.i.h.bf16 %v5252_v17  ;;  %v4880_v60 = vunpack.i.l.bf16 %v5266_v44 }
 0x37e   : > { %v3425_v17 = vsel %vm3388_vm4, %v4871_v2, %v5301_v29  ;;  %v5693_v29 = vld [vmem:[%s6116_s6] sm:$0xf] }
 0x380   : > { %3382 = vrot.lane.b32.xlu1 %v3206_v23, %s4919_s18  ;;  %3346 = vrot.lane.b32.xlu0 %v3133_v58, %s4919_s18  ;;  %v4881_v23 = vunpack.i.h.bf16 %v5266_v44  ;;  %v3407_v44 = vsel %vm3388_vm4, %v4880_v60, %v5303_v30  ;;  %v5709_v30 = vsel %vm3388_vm4, %v5392_v56, %v5459_v53 }
 0x384   : > { %3324 = vrot.lane.b32.xlu0 %v3121_v19, %s4919_s18  ;;  %3334 = vrot.lane.b32.xlu1 %v3126_v25, %s4919_s18 }
 0x388   : > { %3380 = vrot.lane.b32.xlu0 %v3205_v62, %s4919_s18  ;;  %3326 = vrot.lane.b32.xlu1 %v3122_v5, %s4919_s18  ;;  %v5715_v5 = vsel %vm3388_vm4, %v5449_v40, %v5392_v56 }
 0x38c   : > { %3328 = vrot.lane.b32.xlu1 %v3123_v20, %s4919_s18  ;;  %3288 = vrot.lane.b32.xlu0 %v3065_v49, %s4919_s18 }
 0x390   : > { %3336 = vrot.lane.b32.xlu1 %v5299_v28, %s4919_s18  ;;  %3342 = vrot.lane.b32.xlu0 %v5615_v35, %s4919_s18  ;;  %v5627_v28 = vpop.permute.xlu1 %3252 }
 0x394   : > { %3340 = vrot.lane.b32.xlu0 %v3130_v51, %s4919_s18  ;;  %3212 = vperm.xlu1 %4887, %v3209_v59  }
 0x398   : > { %3290 = vrot.lane.b32.xlu0 %v3047_v38, %s4919_s18  ;;  %s360_s18 = scalar_lea.vmem %s6119_s9, %s4557_s15 }
 0x39e   : > { %v3355_v22 = vpop.permute.xlu1 %3354  ;;  %v3353_v50 = vpop.permute.xlu0 %3352 }
 0x39f   : > { %v3453_v18 = vsel %vm3388_vm4, %v5383_v52, %v3353_v50  ;;  %v3454_v8 = vsel %vm3388_vm4, %v3353_v50, %v3355_v22 }
 0x3a0   : > { %3571 = vmatprep.subr.mxu1 %v3454_v8 }
 0x3a1   : > { %3572 = vmatpush1.msra.mxu1 %v3453_v18 }
 0x3a2   : > { %v3261_v12 = vpop.permute.xlu1 %3260  ;;  %v3263_v14 = vpop.permute.xlu0 %3262 }
 0x3a3   : > { %v5633_v31 = vsel %vm3388_vm4, %v3261_v12, %v3263_v14  ;;  %v3450_v3 = vsel %vm3388_vm4, %v5387_v54, %v3261_v12  ;;  %v5663_v16 = vsel %vm3388_vm4, %v5389_v55, %v3261_v12  ;;  %v3389_v55 = vsel %vm3388_vm4, %v4881_v23, %v4870_v13 }
 0x3a4   : > { %3573 = vmatprep.subr.mxu1 %v5633_v31  ;;  %v5745_v12 = vsel %vm3388_vm4, %v5399_v63, %v5468_v34 }
 0x3a5   : > { %3574 = vmatpush1.msra.mxu1 %v3450_v3 }
 0x3a6   : > { %v5643_v52 = vpop.permute.xlu1 %3358  ;;  %3575 = vmatprep.subr.mxu1 %v5641_v46  ;;  %v3299_v43 = vpop.permute.xlu0 %3298 }
 0x3a7   : > { %3576 = vmatpush1.msra.mxu1 %v5649_v47  ;;  %v5654_v54 = vsel %vm3388_vm4, %v5397_v61, %v3299_v43 }
 0x3a8   : > { %3577 = vmatprep.subr.mxu1 %v5654_v54 }
 0x3a9   : > { %3578 = vmatpush1.msra.mxu1 %v3447_v0 }
 0x3aa   : > { %v3265_v45 = vpop.permute.xlu1 %3264  ;;  %3579 = vmatprep.subr.mxu1 %v5663_v16  ;;  %v3301_v36 = vpop.permute.xlu0 %3300 }
 0x3ab   : > { %3580 = vmatpush1.msra.mxu1 %v3444_v21  ;;  %v5700_v62 = vsel %vm3388_vm4, %v3263_v14, %v3265_v45  ;;  %v3428_v37 = vsel %vm3388_vm4, %v3299_v43, %v3301_v36  ;;  %v5750_v14 = vsel %vm3388_vm4, %v5459_v53, %v5399_v63 }
 0x3ac   : > { %3581 = vmatprep.subr.mxu1 %v5649_v47 }
 0x3ad   : > { %3582 = vmatpush1.msra.mxu1 %v3390_v26 }
 0x3ae   : > { %v5678_v58 = vpop.permute.xlu1 %3302  ;;  %3583 = vmatprep.subr.mxu1 %v3426_v39  ;;  %v3357_v27 = vpop.permute.xlu0 %3356 }
 0x3af   : > { %v3455_v38 = vsel %vm3388_vm4, %v3355_v22, %v3357_v27  ;;  %3584 = vmatpush1.msra.mxu1 %v3425_v17  ;;  %v3456_v19 = vsel %vm3388_vm4, %v3357_v27, %v5643_v52  ;;  %v3429_v24 = vsel %vm3388_vm4, %v3301_v36, %v5678_v58  ;;  %v5789_v36 = vsel %vm3388_vm4, %v5468_v34, %v5405_v6 }
 0x3b0   : > { %3585 = vmatprep.subr.mxu1 %v3408_v1  ;;  %3642 = vmatprep.subr.mxu0 %v3456_v19  ;;  %v5823_v1 = vsel %vm3388_vm4, %v5413_v11, %v5495_v4  ;;  %v5828_v19 = vsel %vm3388_vm4, %v5481_v48, %v5413_v11 }
 0x3b1   : > { %3586 = vmatpush1.msra.mxu1 %v3407_v44  ;;  %3643 = vmatpush1.msra.mxu0 %v3455_v38 }
 0x3b2   : > { %v3361_v61 = vpop.permute.xlu1 %3360  ;;  %3587 = vmatprep.subr.mxu1 %v3390_v26  ;;  %v3267_v25 = vpop.permute.xlu0 %3266 }
 0x3b3   : > { %3588 = vmatpush1.msra.mxu1 %v3389_v55  ;;  %v5697_v41 = vsel %vm3388_vm4, %v3265_v45, %v3267_v25  ;;  %v3457_v40 = vsel %vm3388_vm4, %v5643_v52, %v3361_v61  ;;  %v5784_v45 = vsel %vm3388_vm4, %v5405_v6, %v5481_v48 }
 0x3b4   : > { %3644 = vmatprep.subr.mxu0 %v5697_v41  ;;  %4592 = vmatmul.mubr.msk.f32.vlgmr.msra.gmra.mxu1 %vm3553_vm5, %v5693_v29 }
 0x3b5   : > { %3645 = vmatpush1.msra.mxu0 %v5700_v62  ;;  %3763 = vmatprep.mubr.f32.mxu1 %v5615_v35 }
 0x3b6   : > { %v3271_v20 = vpop.permute.xlu1 %3270  ;;  %3646 = vmatprep.subr.mxu0 %v5709_v30  ;;  %v3305_v49 = vpop.permute.xlu0 %3304 }
 0x3b7   : > { %3647 = vmatpush1.msra.mxu0 %v5715_v5  ;;  %v3430_v43 = vsel %vm3388_vm4, %v5678_v58, %v3305_v49 }
 0x3b8   : > { %3648 = vmatprep.subr.mxu0 %v3429_v24 }
 0x3b9   : > { %3649 = vmatpush1.msra.mxu0 %v3428_v37 }
 0x3ba   : > { %v5722_v59 = vpop.permute.xlu1 %3306  ;;  %3650 = vmatprep.subr.mxu0 %v5700_v62  ;;  %v3363_v51 = vpop.permute.xlu0 %3362 }
 0x3bb   : > { %3651 = vmatpush1.msra.mxu0 %v5633_v31  ;;  %v3458_v56 = vsel %vm3388_vm4, %v3361_v61, %v3363_v51  ;;  %v3431_v52 = vsel %vm3388_vm4, %v3305_v49, %v5722_v59 }
 0x3bc   : > { %3652 = vmatprep.subr.mxu0 %v5715_v5  ;;  %3713 = vmatprep.subr.mxu1 %v3458_v56 }
 0x3bd   : > { %3653 = vmatpush1.msra.mxu0 %v5641_v46  ;;  %3714 = vmatpush1.msra.mxu1 %v3457_v40 }
 0x3be   : > { %v3367_v22 = vpop.permute.xlu1 %3366  ;;  %3654 = vmatprep.subr.mxu0 %v3428_v37  ;;  %v3269_v50 = vpop.permute.xlu0 %3268  ;;  %v5865_v37 = vsel %vm3388_vm4, %v5495_v4, %v5421_v15 }
 0x3bf   : > { %v5732_v18 = vsel %vm3388_vm4, %v3267_v25, %v3269_v50  ;;  %3655 = vmatpush1.msra.mxu0 %v5654_v54  ;;  %v5736_v8 = vsel %vm3388_vm4, %v3269_v50, %v3271_v20 }
 0x3c0   : > { %3656 = vmatprep.subr.mxu0 %v5633_v31  ;;  %3715 = vmatprep.subr.mxu1 %v5736_v8 }
 0x3c1   : > { %3657 = vmatpush1.msra.mxu0 %v5663_v16  ;;  %3716 = vmatpush1.msra.mxu1 %v5732_v18 }
 0x3c2   : > { %v3275_v3 = vpop.permute.xlu1 %3274  ;;  %3658 = vmatprep.subr.mxu0 %v5641_v46  ;;  %3717 = vmatprep.subr.mxu1 %v5745_v12  ;;  %v3309_v31 = vpop.permute.xlu0 %3308 }
 0x3c3   : > { %3659 = vmatpush1.msra.mxu0 %v5649_v47  ;;  %3718 = vmatpush1.msra.mxu1 %v5750_v14  ;;  %v3432_v26 = vsel %vm3388_vm4, %v5722_v59, %v3309_v31 }
 0x3c4   : > { %3719 = vmatprep.subr.mxu1 %v3431_v52  ;;  %4593 = vmatmul.mubr.msk.f32.vlgmr.msra.gmra.mxu0 %vm3553_vm5, %v5693_v29 }
 0x3c5   : > { %3720 = vmatpush1.msra.mxu1 %v3430_v43  ;;  %3834 = vmatprep.mubr.f32.mxu0 %v5615_v35 }
 0x3c6   : > { %v5763_v63 = vpop.permute.xlu1 %3310  ;;  %3721 = vmatprep.subr.mxu1 %v5732_v18  ;;  %v3365_v53 = vpop.permute.xlu0 %3364 }
 0x3c7   : > { %v3459_v46 = vsel %vm3388_vm4, %v3363_v51, %v3365_v53  ;;  %3722 = vmatpush1.msra.mxu1 %v5697_v41  ;;  %v3460_v47 = vsel %vm3388_vm4, %v3365_v53, %v3367_v22  ;;  %v3433_v60 = vsel %vm3388_vm4, %v3309_v31, %v5763_v63 }
 0x3c8   : > { %3723 = vmatprep.subr.mxu1 %v5750_v14  ;;  %3784 = vmatprep.subr.mxu0 %v3460_v47 }
 0x3c9   : > { %3724 = vmatpush1.msra.mxu1 %v5709_v30  ;;  %3785 = vmatpush1.msra.mxu0 %v3459_v46 }
 0x3ca   : > { %v3371_v54 = vpop.permute.xlu1 %3370  ;;  %3725 = vmatprep.subr.mxu1 %v3430_v43  ;;  %v3273_v13 = vpop.permute.xlu0 %3272 }
 0x3cb   : > { %v5772_v0 = vsel %vm3388_vm4, %v3271_v20, %v3273_v13  ;;  %3726 = vmatpush1.msra.mxu1 %v3429_v24  ;;  %v5775_v16 = vsel %vm3388_vm4, %v3273_v13, %v3275_v3  ;;  %v3402_v24 = vsel %vm3388_vm4, %v5421_v15, %v5509_v42  ;;  %v4885_v13 = vunpack.i.l.bf16 %v5307_v32 }
 0x3cc   : > { %3727 = vmatprep.subr.mxu1 %v5697_v41  ;;  %3786 = vmatprep.subr.mxu0 %v5775_v16 }
 0x3cd   : > { %3728 = vmatpush1.msra.mxu1 %v5700_v62  ;;  %3787 = vmatpush1.msra.mxu0 %v5772_v0 }
 0x3ce   : > { %v3279_v21 = vpop.permute.xlu1 %3278  ;;  %3729 = vmatprep.subr.mxu1 %v5709_v30  ;;  %3788 = vmatprep.subr.mxu0 %v5784_v45  ;;  %v3313_v2 = vpop.permute.xlu0 %3312 }
 0x3cf   : > { %3730 = vmatpush1.msra.mxu1 %v5715_v5  ;;  %3789 = vmatpush1.msra.mxu0 %v5789_v36  ;;  %v3434_v55 = vsel %vm3388_vm4, %v5763_v63, %v3313_v2 }
 0x3d0   : > { %3790 = vmatprep.subr.mxu0 %v3433_v60  ;;  %4594 = vmatmul.mubr.msk.f32.vlgmr.msra.gmra.mxu1 %vm3553_vm5, %v5693_v29 }
 0x3d1   : > { %3791 = vmatpush1.msra.mxu0 %v3432_v26  ;;  %3905 = vmatprep.mubr.f32.mxu1 %v5615_v35 }
 0x3d2   : > { %v5802_v6 = vpop.permute.xlu1 %3314  ;;  %3792 = vmatprep.subr.mxu0 %v5772_v0  ;;  %v3369_v34 = vpop.permute.xlu0 %3368 }
 0x3d3   : > { %v3461_v39 = vsel %vm3388_vm4, %v3367_v22, %v3369_v34  ;;  %3793 = vmatpush1.msra.mxu0 %v5736_v8  ;;  %v3462_v23 = vsel %vm3388_vm4, %v3369_v34, %v3371_v54  ;;  %v3435_v25 = vsel %vm3388_vm4, %v3313_v2, %v5802_v6  ;;  %v3470_v2 = vsel %vm3388_vm4, %v5276_v57, %v4885_v13 }
 0x3d4   : > { %3794 = vmatprep.subr.mxu0 %v5789_v36  ;;  %3855 = vmatprep.subr.mxu1 %v3462_v23 }
 0x3d5   : > { %3795 = vmatpush1.msra.mxu0 %v5745_v12  ;;  %3856 = vmatpush1.msra.mxu1 %v3461_v39 }
 0x3d6   : > { %v3375_v58 = vpop.permute.xlu1 %3374  ;;  %3796 = vmatprep.subr.mxu0 %v3432_v26  ;;  %v3277_v27 = vpop.permute.xlu0 %3276  ;;  %v3406_v26 = vsel %vm3388_vm4, %v5437_v10, %v5627_v28 }
 0x3d7   : > { %v5811_v17 = vsel %vm3388_vm4, %v3275_v3, %v3277_v27  ;;  %3797 = vmatpush1.msra.mxu0 %v3431_v52  ;;  %v5814_v38 = vsel %vm3388_vm4, %v3277_v27, %v3279_v21 }
 0x3d8   : > { %3798 = vmatprep.subr.mxu0 %v5736_v8  ;;  %3857 = vmatprep.subr.mxu1 %v5814_v38 }
 0x3d9   : > { %3799 = vmatpush1.msra.mxu0 %v5732_v18  ;;  %3858 = vmatpush1.msra.mxu1 %v5811_v17 }
 0x3da   : > { %v3283_v44 = vpop.permute.xlu1 %3282  ;;  %3800 = vmatprep.subr.mxu0 %v5745_v12  ;;  %3859 = vmatprep.subr.mxu1 %v5823_v1  ;;  %v3317_v61 = vpop.permute.xlu0 %3316 }
 0x3db   : > { %3801 = vmatpush1.msra.mxu0 %v5750_v14  ;;  %3860 = vmatpush1.msra.mxu1 %v5828_v19  ;;  %v3436_v42 = vsel %vm3388_vm4, %v5802_v6, %v3317_v61 }
 0x3dc   : > { %4595 = vmatmul.mubr.msk.f32.vlgmr.msra.gmra.mxu0 %vm3553_vm5, %v5693_v29  ;;  %3861 = vmatprep.subr.mxu1 %v3435_v25 }
 0x3dd   : > { %3862 = vmatpush1.msra.mxu1 %v3434_v55  ;;  %3976 = vmatprep.mubr.f32.mxu0 %v5615_v35 }
 0x3de   : > { %v3319_v11 = vpop.permute.xlu1 %3318  ;;  %3863 = vmatprep.subr.mxu1 %v5811_v17  ;;  %v3373_v48 = vpop.permute.xlu0 %3372 }
 0x3df   : > { %v3463_v41 = vsel %vm3388_vm4, %v3371_v54, %v3373_v48  ;;  %3864 = vmatpush1.msra.mxu1 %v5775_v16  ;;  %v3464_v62 = vsel %vm3388_vm4, %v3373_v48, %v3375_v58  ;;  %v3437_v56 = vsel %vm3388_vm4, %v3317_v61, %v3319_v11 }
 0x3e0   : > { %3865 = vmatprep.subr.mxu1 %v5828_v19  ;;  %3926 = vmatprep.subr.mxu0 %v3464_v62 }
 0x3e1   : > { %3866 = vmatpush1.msra.mxu1 %v5784_v45  ;;  %3927 = vmatpush1.msra.mxu0 %v3463_v41 }
 0x3e2   : > { %v5847_v30 = vpop.permute.xlu1 %3378  ;;  %3867 = vmatprep.subr.mxu1 %v3434_v55  ;;  %v3281_v5 = vpop.permute.xlu0 %3280 }
 0x3e3   : > { %v5850_v20 = vsel %vm3388_vm4, %v3279_v21, %v3281_v5  ;;  %3868 = vmatpush1.msra.mxu1 %v3433_v60  ;;  %v5853_v49 = vsel %vm3388_vm4, %v3281_v5, %v3283_v44 }
 0x3e4   : > { %3869 = vmatprep.subr.mxu1 %v5775_v16  ;;  %3928 = vmatprep.subr.mxu0 %v5853_v49 }
 0x3e5   : > { %3870 = vmatpush1.msra.mxu1 %v5772_v0  ;;  %3929 = vmatpush1.msra.mxu0 %v5850_v20 }
 0x3e6   : > { %v5867_v59 = vpop.permute.xlu1 %3330  ;;  %3871 = vmatprep.subr.mxu1 %v5784_v45  ;;  %3930 = vmatprep.subr.mxu0 %v3402_v24  ;;  %v3321_v51 = vpop.permute.xlu0 %3320 }
 0x3e7   : > { %3872 = vmatpush1.msra.mxu1 %v5789_v36  ;;  %3931 = vmatpush1.msra.mxu0 %v5865_v37  ;;  %v3438_v52 = vsel %vm3388_vm4, %v3319_v11, %v3321_v51  ;;  %v4886_v36 = vunpack.i.h.bf16 %v5307_v32  ;;  %v3405_v32 = vsel %vm3388_vm4, %v5528_v7, %v5437_v10  ;;  %v3443_v10 = vsel %vm3388_vm4, %v5627_v28, %v5867_v59 }
 0x3e8   : > { %4596 = vmatmul.mubr.msk.f32.vlgmr.msra.gmra.mxu1 %vm3553_vm5, %v5693_v29  ;;  %3932 = vmatprep.subr.mxu0 %v3437_v56 }
 0x3e9   : > { %3933 = vmatpush1.msra.mxu0 %v3436_v42  ;;  %4047 = vmatprep.mubr.f32.mxu1 %v5615_v35 }
 0x3ea   : > { %v3287_v15 = vpop.permute.xlu1 %3286  ;;  %3934 = vmatprep.subr.mxu0 %v5850_v20  ;;  %v3377_v4 = vpop.permute.xlu0 %3376 }
 0x3eb   : > { %v3465_v40 = vsel %vm3388_vm4, %v3375_v58, %v3377_v4  ;;  %3935 = vmatpush1.msra.mxu0 %v5814_v38  ;;  %v3466_v22 = vsel %vm3388_vm4, %v3377_v4, %v5847_v30 }
 0x3ec   : > { %3936 = vmatprep.subr.mxu0 %v5865_v37  ;;  %3997 = vmatprep.subr.mxu1 %v3466_v22 }
 0x3ed   : > { %3937 = vmatpush1.msra.mxu0 %v5823_v1  ;;  %3998 = vmatpush1.msra.mxu1 %v3465_v40 }
 0x3ee   : > { %v5885_v50 = vpop.permute.xlu1 %3322  ;;  %3938 = vmatprep.subr.mxu0 %v3436_v42  ;;  %v3285_v18 = vpop.permute.xlu0 %3284 }
 0x3ef   : > { %v5888_v8 = vsel %vm3388_vm4, %v3283_v44, %v3285_v18  ;;  %3939 = vmatpush1.msra.mxu0 %v3435_v25  ;;  %v5891_v12 = vsel %vm3388_vm4, %v3285_v18, %v3287_v15  ;;  %v5903_v31 = vsel %vm3388_vm4, %v3321_v51, %v5885_v50 }
 0x3f0   : > { %3940 = vmatprep.subr.mxu0 %v5814_v38  ;;  %3999 = vmatprep.subr.mxu1 %v5891_v12 }
 0x3f1   : > { %3941 = vmatpush1.msra.mxu0 %v5811_v17  ;;  %4000 = vmatpush1.msra.mxu1 %v5888_v8 }
 0x3f2   : > { %v3383_v14 = vpop.permute.xlu1 %3382  ;;  %3942 = vmatprep.subr.mxu0 %v5823_v1  ;;  %4001 = vmatprep.subr.mxu1 %v5537_v9  ;;  %v3347_v3 = vpop.permute.xlu0 %3346 }
 0x3f3   : > { %3943 = vmatpush1.msra.mxu0 %v5828_v19  ;;  %4002 = vmatpush1.msra.mxu1 %v5518_v33  ;;  %v3469_v60 = vsel %vm3388_vm4, %v3383_v14, %v5276_v57  ;;  %v3452_v6 = vsel %vm3388_vm4, %v3347_v3, %v4886_v36  ;;  %v4247_v19 = vlaneseq }
 0x3f4   : > { %4597 = vmatmul.mubr.msk.f32.vlgmr.msra.gmra.mxu0 %vm3553_vm5, %v5693_v29  ;;  %4003 = vmatprep.subr.mxu1 %v5903_v31 }
 0x3f5   : > { %4004 = vmatpush1.msra.mxu1 %v3438_v52  ;;  %4118 = vmatprep.mubr.f32.mxu0 %v5615_v35  ;;  %v5961_v44 = vshrl.u32 %v4247_v19, 7 }
 0x3f6   : > { %v3335_v43 = vpop.permute.xlu1 %3334  ;;  %4005 = vmatprep.subr.mxu1 %v5888_v8  ;;  %v3325_v63 = vpop.permute.xlu0 %3324 }
 0x3f7   : > { %4006 = vmatpush1.msra.mxu1 %v5853_v49  ;;  %v3451_v39 = vsel %vm3388_vm4, %v3335_v43, %v3347_v3  ;;  %v3440_v58 = vsel %vm3388_vm4, %v5885_v50, %v3325_v63  ;;  %v5972_v61 = vsub.s32 1, %v5961_v44  ;;  %v4261_v13 = vsub.s32 3, %v5961_v44 }
 0x3f8   : > { %4007 = vmatprep.subr.mxu1 %v5518_v33 }
 0x3f9   : > { %4008 = vmatpush1.msra.mxu1 %v3402_v24 }
 0x3fa   : > { %v3327_v53 = vpop.permute.xlu1 %3326  ;;  %4009 = vmatprep.subr.mxu1 %v3438_v52  ;;  %v3381_v46 = vpop.permute.xlu0 %3380 }
 0x3fb   : > { %v3467_v47 = vsel %vm3388_vm4, %v5847_v30, %v3381_v46  ;;  %4010 = vmatpush1.msra.mxu1 %v3437_v56  ;;  %v3468_v54 = vsel %vm3388_vm4, %v3381_v46, %v3383_v14  ;;  %v3441_v57 = vsel %vm3388_vm4, %v3325_v63, %v3327_v53  ;;  %v4257_v63 = vsub.s32 2, %v5961_v44 }
 0x3fc   : > { %4011 = vmatprep.subr.mxu1 %v5853_v49  ;;  %4068 = vmatprep.subr.mxu0 %v3468_v54 }
 0x3fd   : > { %4012 = vmatpush1.msra.mxu1 %v5850_v20  ;;  %4069 = vmatpush1.msra.mxu0 %v3467_v47 }
 0x3fe   : > { %4013 = vmatprep.subr.mxu1 %v3402_v24  ;;  %v3289_v0 = vpop.permute.xlu0 %3288  ;;  %v3329_v21 = vpop.permute.xlu1 %3328 }
 0x3ff   : > { %4014 = vmatpush1.msra.mxu1 %v5865_v37  ;;  %v3445_v16 = vsel %vm3388_vm4, %v3289_v0, %v3335_v43  ;;  %v3423_v45 = vsel %vm3388_vm4, %v3287_v15, %v3289_v0  ;;  %v3442_v38 = vsel %vm3388_vm4, %v3327_v53, %v3329_v21 }
 0x400   : > { %4598 = vmatmul.mubr.msk.f32.vlgmr.msra.gmra.mxu1 %vm3553_vm5, %v5693_v29  ;;  %4070 = vmatprep.subr.mxu0 %v3445_v16 }
 0x401   : > { %4139 = vmatprep.subr.mxu1 %v3470_v2  ;;  %4071 = vmatpush1.msra.mxu0 %v3423_v45  ;;  %v4269_v2 = vsub.s32 5, %v5961_v44 }
 0x402   : > { %4140 = vmatpush1.msra.mxu1 %v3469_v60  ;;  %4072 = vmatprep.subr.mxu0 %v3406_v26  ;;  %v3343_v34 = vpop.permute.xlu0 %3342  ;;  %v3337_v7 = vpop.permute.xlu1 %3336 }
 0x403   : > { %4141 = vmatprep.subr.mxu1 %v3452_v6  ;;  %4073 = vmatpush1.msra.mxu0 %v3405_v32  ;;  %v3449_v23 = vsel %vm3388_vm4, %v5867_v59, %v3343_v34  ;;  %v3446_v28 = vsel %vm3388_vm4, %v3335_v43, %v3337_v7 }
 0x404   : > { %4142 = vmatpush1.msra.mxu1 %v3451_v39  ;;  %4074 = vmatprep.subr.mxu0 %v3441_v57 }
 0x405   : > { %4143 = vmatprep.subr.mxu1 %v3449_v23  ;;  %4075 = vmatpush1.msra.mxu0 %v3440_v58 }
 0x406   : > { %4144 = vmatpush1.msra.mxu1 %v3443_v10  ;;  %4076 = vmatprep.subr.mxu0 %v3423_v45  ;;  %v3341_v27 = vpop.permute.xlu0 %3340 }
 0x407   : > { %4077 = vmatpush1.msra.mxu0 %v5891_v12  ;;  %v3448_v17 = vsel %vm3388_vm4, %v3329_v21, %v3341_v27  ;;  %4189 = vmatprep.mubr.f32.mxu1 %v5615_v35 }
 0x408   : > { %4078 = vmatprep.subr.mxu0 %v3405_v32  ;;  %4145 = vmatprep.subr.mxu1 %v3448_v17 }
 0x409   : > { %4079 = vmatpush1.msra.mxu0 %v5537_v9  ;;  %4146 = vmatpush1.msra.mxu1 %v3442_v38 }
 0x40a   : > { %4080 = vmatprep.subr.mxu0 %v3440_v58  ;;  %4147 = vmatprep.subr.mxu1 %v3446_v28  ;;  %v3291_v1 = vpop.permute.xlu0 %3290 }
 0x40b   : > { %4081 = vmatpush1.msra.mxu0 %v5903_v31  ;;  %4148 = vmatpush1.msra.mxu1 %v3445_v16  ;;  %v3424_v35 = vsel %vm3388_vm4, %v3289_v0, %v3291_v1  ;;  %v4265_v0 = vsub.s32 4, %v5961_v44  ;;  %v4277_v1 = vsub.s32 7, %v5961_v44 }
 0x40c   : > { %4082 = vmatprep.subr.mxu0 %v5891_v12  ;;  %4149 = vmatprep.subr.mxu1 %v3443_v10 }
 0x40d   : > { %4083 = vmatpush1.msra.mxu0 %v5888_v8  ;;  %4150 = vmatpush1.msra.mxu1 %v3406_v26 }
 0x40e   : > { %4084 = vmatprep.subr.mxu0 %v5537_v9  ;;  %4151 = vmatprep.subr.mxu1 %v3442_v38  ;;  %v5964_v9 = vsub.s32 0, %v5961_v44 }
 0x40f   : > { %4085 = vmatpush1.msra.mxu0 %v5518_v33  ;;  %4152 = vmatpush1.msra.mxu1 %v3441_v57  ;;  %v5969_v33 = vld [vmem:[%s6115_s5] sm:$0xff]  ;;  %v5974_v25 = vpop.permute.xlu1 %3212  ;;  %v4273_v57 = vsub.s32 6, %v5961_v44 }
 0x410   : > { %4599 = vmatmul.mubr.msk.f32.vlgmr.msra.gmra.mxu0 %vm3553_vm5, %v5693_v29  ;;  %4153 = vmatprep.subr.mxu1 %v3424_v35  ;;  %v4250_v55 = vrot.slane %v5969_v33, %v5964_v9  ;;  %v4254_v48 = vrot.slane %v5969_v33, %v5972_v61  ;;  %v4258_v54 = vrot.slane %v5969_v33, %v4257_v63 }
 0x411   : > { %4154 = vmatpush1.msra.mxu1 %v3423_v45  ;;  %v4262_v45 = vrot.slane %v5969_v33, %v4261_v13  ;;  %v4266_v21 = vrot.slane %v5969_v33, %v4265_v0  ;;  %v4270_v27 = vrot.slane %v5969_v33, %v4269_v2  ;;  %v4274_v28 = vrot.slane %v5969_v33, %v4273_v57 }
 0x412   : > { %4155 = vmatprep.subr.mxu1 %v3406_v26 }
 0x413   : > { %4156 = vmatpush1.msra.mxu1 %v3405_v32 }
 0x414   : > { %4600 = vmatmul.mubr.msk.f32.vlgmr.msra.gmra.mxu1 %vm3553_vm5, %v5693_v29 }
 0x474   : > { %v3623_v29 = vpop.f32.mrf.mxu1 }
 0x475   : > { %v3624_v11 = vadd.f32 %v3623_v29, %v5974_v25 }
 0x476   : > { %v3625_v41 = vpop.f32.mrf.mxu1 }
 0x477   : > { %v3626_v62 = vadd.f32 %v3625_v41, %v5974_v25  ;;  %v4337_v30 = vmul.f32 %v4250_v55, %v3624_v11 }
 0x479   : > { %v4214_v5 = vcombine.low %v3624_v11, %v3626_v62  ;;  %v4338_v20 = vmul.f32 %v4254_v48, %v3626_v62  ;;  %v4356_v49 = vsel %vm4355_vm6, %v4337_v30, 0.0  ;;  %v4393_v24 = vmul.f32 %v4337_v30, %v4337_v30  ;;  %v6032_v11 = vld [vmem:[%s6115_s5 + $0x8] sm:$0xff] }
 0x47b   : > { %4232 = vst [vmem:[%s5987_s29] sm:$0xff] %v4214_v5  ;;  %v4357_v37 = vsel %vm4355_vm6, %v4338_v20, 0.0  ;;  %v4394_v59 = vmul.f32 %v4338_v20, %v4338_v20  ;;  %v4411_v51 = vsel %vm4355_vm6, %v4393_v24, 0.0  ;;  %v4278_v5 = vrot.slane %v5969_v33, %v4277_v1 }
 0x47c   : > { %v4358_v56 = vadd.f32 %v4357_v37, %v4356_v49  ;;  %v4282_v49 = vrot.slane %v6032_v11, %v5964_v9 }
 0x47d   : > { %v4412_v42 = vsel %vm4355_vm6, %v4394_v59, 0.0 }
 0x47e   : > { %v4413_v15 = vadd.f32 %v4412_v42, %v4411_v51 }
 0x484   : > { %v3694_v4 = vpop.f32.mrf.mxu0 }
 0x485   : > { %v3695_v22 = vadd.f32 %v3694_v4, %v5974_v25 }
 0x486   : > { %v3696_v40 = vpop.f32.mrf.mxu0 }
 0x487   : > { %v3697_v50 = vadd.f32 %v3696_v40, %v5974_v25  ;;  %v4339_v16 = vmul.f32 %v4258_v54, %v3695_v22 }
 0x489   : > { %v4215_v18 = vcombine.low %v3695_v22, %v3697_v50  ;;  %v4395_v26 = vmul.f32 %v4339_v16, %v4339_v16  ;;  %v4340_v32 = vmul.f32 %v4262_v45, %v3697_v50  ;;  %v4359_v39 = vsel %vm4355_vm6, %v4339_v16, 0.0 }
 0x48a   : > { %v4360_v17 = vadd.f32 %v4359_v39, %v4358_v56 }
 0x48b   : > { %4233 = vst [vmem:[%s5987_s29 + $0x8] sm:$0xff] %v4215_v18  ;;  %v4414_v58 = vsel %vm4355_vm6, %v4395_v26, 0.0  ;;  %v4396_v10 = vmul.f32 %v4340_v32, %v4340_v32  ;;  %v4361_v38 = vsel %vm4355_vm6, %v4340_v32, 0.0  ;;  %v4294_v26 = vrot.slane %v6032_v11, %v4261_v13 }
 0x48c   : > { %v4415_v35 = vadd.f32 %v4414_v58, %v4413_v15  ;;  %v4362_v48 = vadd.f32 %v4361_v38, %v4360_v17 }
 0x48d   : > { %v4416_v19 = vsel %vm4355_vm6, %v4396_v10, 0.0 }
 0x48e   : > { %v4417_v20 = vadd.f32 %v4416_v19, %v4415_v35 }
 0x490   : > { %v3765_v8 = vpop.f32.mrf.mxu1 }
 0x491   : > { %v3766_v14 = vadd.f32 %v3765_v8, %v5974_v25 }
 0x492   : > { %v3767_v12 = vpop.f32.mrf.mxu1 }
 0x493   : > { %v3768_v3 = vadd.f32 %v3767_v12, %v5974_v25  ;;  %v4341_v7 = vmul.f32 %v4266_v21, %v3766_v14  ;;  %v4286_v12 = vrot.slane %v6032_v11, %v5972_v61 }
 0x495   : > { %v4216_v31 = vcombine.low %v3766_v14, %v3768_v3  ;;  %v4397_v55 = vmul.f32 %v4341_v7, %v4341_v7  ;;  %v4342_v29 = vmul.f32 %v4270_v27, %v3768_v3  ;;  %v4363_v62 = vsel %vm4355_vm6, %v4341_v7, 0.0 }
 0x496   : > { %v4364_v42 = vadd.f32 %v4363_v62, %v4362_v48 }
 0x497   : > { %4234 = vst [vmem:[%s5987_s29 + $0x10] sm:$0xff] %v4216_v31  ;;  %v4418_v37 = vsel %vm4355_vm6, %v4397_v55, 0.0  ;;  %v4398_v59 = vmul.f32 %v4342_v29, %v4342_v29  ;;  %v4365_v15 = vsel %vm4355_vm6, %v4342_v29, 0.0  ;;  %v4302_v55 = vrot.slane %v6032_v11, %v4269_v2 }
 0x498   : > { %v4419_v33 = vadd.f32 %v4418_v37, %v4417_v20  ;;  %v4366_v14 = vadd.f32 %v4365_v15, %v4364_v42  ;;  %v4306_v2 = vrot.slane %v6032_v11, %v4273_v57 }
 0x499   : > { %v4420_v50 = vsel %vm4355_vm6, %v4398_v59, 0.0 }
 0x49c   : > { %v3836_v52 = vpop.f32.mrf.mxu0 }
 0x49d   : > { %v3837_v53 = vadd.f32 %v3836_v52, %v5974_v25  ;;  %v4290_v52 = vrot.slane %v6032_v11, %v4257_v63  ;;  %v4298_v63 = vrot.slane %v6032_v11, %v4265_v0 }
 0x49e   : > { %v3838_v43 = vpop.f32.mrf.mxu0 }
 0x49f   : > { %v3839_v46 = vadd.f32 %v3838_v43, %v5974_v25  ;;  %v4343_v30 = vmul.f32 %v4274_v28, %v3837_v53  ;;  %v4421_v43 = vadd.f32 %v4420_v50, %v4419_v33  ;;  %v4310_v50 = vrot.slane %v6032_v11, %v4277_v1 }
 0x4a1   : > { %v4217_v47 = vcombine.low %v3837_v53, %v3839_v46  ;;  %v4399_v4 = vmul.f32 %v4343_v30, %v4343_v30  ;;  %v4344_v40 = vmul.f32 %v4278_v5, %v3839_v46  ;;  %v4367_v18 = vsel %vm4355_vm6, %v4343_v30, 0.0 }
 0x4a2   : > { %v4368_v53 = vadd.f32 %v4367_v18, %v4366_v14  ;;  %v4243_v18 = vld [vmem:[%s6115_s5 + $0x10] sm:$0x3] }
 0x4a3   : > { %4235 = vst [vmem:[%s5987_s29 + $0x18] sm:$0xff] %v4217_v47  ;;  %v4422_v3 = vsel %vm4355_vm6, %v4399_v4, 0.0  ;;  %v4400_v31 = vmul.f32 %v4344_v40, %v4344_v40  ;;  %v4369_v46 = vsel %vm4355_vm6, %v4344_v40, 0.0  ;;  %v4318_v44 = vrot.slane %v4243_v18, %v5972_v61 }
 0x4a4   : > { %v4423_v16 = vadd.f32 %v4422_v3, %v4421_v43  ;;  %v4370_v32 = vadd.f32 %v4369_v46, %v4368_v53  ;;  %v4314_v43 = vrot.slane %v4243_v18, %v5964_v9 }
 0x4a8   : > { %v3907_v36 = vpop.f32.mrf.mxu1 }
 0x4a9   : > { %v3908_v6 = vadd.f32 %v3907_v36, %v5974_v25  ;;  %v4424_v36 = vsel %vm4355_vm6, %v4400_v31, 0.0 }
 0x4aa   : > { %v3909_v60 = vpop.f32.mrf.mxu1  ;;  %v4425_v10 = vadd.f32 %v4424_v36, %v4423_v16 }
 0x4ab   : > { %v3910_v34 = vadd.f32 %v3909_v60, %v5974_v25  ;;  %v4345_v8 = vmul.f32 %v4282_v49, %v3908_v6 }
 0x4ad   : > { %v4218_v23 = vcombine.low %v3908_v6, %v3910_v34  ;;  %v4401_v47 = vmul.f32 %v4345_v8, %v4345_v8  ;;  %v4346_v54 = vmul.f32 %v4286_v12, %v3910_v34  ;;  %v4371_v21 = vsel %vm4355_vm6, %v4345_v8, 0.0 }
 0x4ae   : > { %v4372_v7 = vadd.f32 %v4371_v21, %v4370_v32 }
 0x4af   : > { %4236 = vst [vmem:[%s5987_s29 + $0x20] sm:$0xff] %v4218_v23  ;;  %v4426_v34 = vsel %vm4355_vm6, %v4401_v47, 0.0  ;;  %v4402_v39 = vmul.f32 %v4346_v54, %v4346_v54  ;;  %v4373_v27 = vsel %vm4355_vm6, %v4346_v54, 0.0 }
 0x4b0   : > { %v4427_v28 = vadd.f32 %v4426_v34, %v4425_v10  ;;  %v4374_v29 = vadd.f32 %v4373_v27, %v4372_v7 }
 0x4b1   : > { %v4428_v35 = vsel %vm4355_vm6, %v4402_v39, 0.0 }
 0x4b2   : > { %v4429_v62 = vadd.f32 %v4428_v35, %v4427_v28 }
 0x4b4   : > { %v3978_v41 = vpop.f32.mrf.mxu0 }
 0x4b5   : > { %v3979_v51 = vadd.f32 %v3978_v41, %v5974_v25 }
 0x4b6   : > { %v3980_v24 = vpop.f32.mrf.mxu0 }
 0x4b7   : > { %v3981_v56 = vadd.f32 %v3980_v24, %v5974_v25  ;;  %v4347_v60 = vmul.f32 %v4290_v52, %v3979_v51 }
 0x4b9   : > { %v4219_v22 = vcombine.low %v3979_v51, %v3981_v56  ;;  %v4403_v17 = vmul.f32 %v4347_v60, %v4347_v60  ;;  %v4348_v13 = vmul.f32 %v4294_v26, %v3981_v56  ;;  %v4375_v0 = vsel %vm4355_vm6, %v4347_v60, 0.0 }
 0x4ba   : > { %v4376_v30 = vadd.f32 %v4375_v0, %v4374_v29 }
 0x4bb   : > { %4237 = vst [vmem:[%s5987_s29 + $0x28] sm:$0xff] %v4219_v22  ;;  %v4430_v48 = vsel %vm4355_vm6, %v4403_v17, 0.0  ;;  %v4404_v41 = vmul.f32 %v4348_v13, %v4348_v13  ;;  %v4377_v5 = vsel %vm4355_vm6, %v4348_v13, 0.0 }
 0x4bc   : > { %v4431_v24 = vadd.f32 %v4430_v48, %v4429_v62  ;;  %v4378_v51 = vadd.f32 %v4377_v5, %v4376_v30 }
 0x4bd   : > { %v4432_v37 = vsel %vm4355_vm6, %v4404_v41, 0.0 }
 0x4be   : > { %v4433_v15 = vadd.f32 %v4432_v37, %v4431_v24 }
 0x4c0   : > { %v4049_v45 = vpop.f32.mrf.mxu1 }
 0x4c1   : > { %v4050_v23 = vadd.f32 %v4049_v45, %v5974_v25 }
 0x4c2   : > { %v4051_v6 = vpop.f32.mrf.mxu1 }
 0x4c3   : > { %v4052_v58 = vadd.f32 %v4051_v6, %v5974_v25  ;;  %v4349_v19 = vmul.f32 %v4298_v63, %v4050_v23 }
 0x4c5   : > { %v4220_v38 = vcombine.low %v4050_v23, %v4052_v58  ;;  %v4405_v20 = vmul.f32 %v4349_v19, %v4349_v19  ;;  %v4350_v49 = vmul.f32 %v4302_v55, %v4052_v58  ;;  %v4379_v59 = vsel %vm4355_vm6, %v4349_v19, 0.0 }
 0x4c6   : > { %v4380_v4 = vadd.f32 %v4379_v59, %v4378_v51 }
 0x4c7   : > { %4238 = vst [vmem:[%s5987_s29 + $0x30] sm:$0xff] %v4220_v38  ;;  %v4434_v56 = vsel %vm4355_vm6, %v4405_v20, 0.0  ;;  %v4406_v42 = vmul.f32 %v4350_v49, %v4350_v49  ;;  %v4381_v22 = vsel %vm4355_vm6, %v4350_v49, 0.0 }
 0x4c8   : > { %v4435_v8 = vadd.f32 %v4434_v56, %v4433_v15  ;;  %v4382_v31 = vadd.f32 %v4381_v22, %v4380_v4 }
 0x4c9   : > { %v4436_v14 = vsel %vm4355_vm6, %v4406_v42, 0.0 }
 0x4ca   : > { %v4437_v47 = vadd.f32 %v4436_v14, %v4435_v8 }
 0x4d0   : > { %v4120_v40 = vpop.f32.mrf.mxu0 }
 0x4d1   : > { %v4121_v33 = vadd.f32 %v4120_v40, %v5974_v25 }
 0x4d2   : > { %v4122_v12 = vpop.f32.mrf.mxu0 }
 0x4d3   : > { %v4351_v57 = vmul.f32 %v4306_v2, %v4121_v33  ;;  %v4123_v3 = vadd.f32 %v4122_v12, %v5974_v25 }
 0x4d4   : > { %v4191_v52 = vpop.f32.mrf.mxu1 }
 0x4d5   : > { %v4383_v1 = vsel %vm4355_vm6, %v4351_v57, 0.0  ;;  %v4407_v11 = vmul.f32 %v4351_v57, %v4351_v57  ;;  %v4221_v53 = vcombine.low %v4121_v33, %v4123_v3  ;;  %v4352_v46 = vmul.f32 %v4310_v50, %v4123_v3 }
 0x4d6   : > { %v4384_v54 = vadd.f32 %v4383_v1, %v4382_v31  ;;  %v4192_v16 = vadd.f32 %v4191_v52, %v5974_v25  ;;  %v4193_v45 = vpop.f32.mrf.mxu1 }
 0x4d7   : > { %v4438_v36 = vsel %vm4355_vm6, %v4407_v11, 0.0  ;;  %4239 = vst [vmem:[%s5987_s29 + $0x38] sm:$0xff] %v4221_v53  ;;  %v4385_v21 = vsel %vm4355_vm6, %v4352_v46, 0.0  ;;  %v4408_v60 = vmul.f32 %v4352_v46, %v4352_v46  ;;  %v4194_v9 = vadd.f32 %v4193_v45, %v5974_v25 }
 0x4d8   : > { %v4439_v61 = vadd.f32 %v4438_v36, %v4437_v47  ;;  %v4386_v26 = vadd.f32 %v4385_v21, %v4384_v54  ;;  %v4353_v32 = vmul.f32 %v4314_v43, %v4192_v16 }
 0x4d9   : > { %v4440_v63 = vsel %vm4355_vm6, %v4408_v60, 0.0  ;;  %v4222_v6 = vcombine.low %v4192_v16, %v4194_v9  ;;  %v4354_v34 = vmul.f32 %v4318_v44, %v4194_v9 }
 0x4da   : > { %v4441_v39 = vadd.f32 %v4440_v63, %v4439_v61  ;;  %v4387_v23 = vsel %vm4355_vm6, %v4353_v32, 0.0  ;;  %v4409_v58 = vmul.f32 %v4353_v32, %v4353_v32 }
 0x4db   : > { %v4388_v10 = vadd.f32 %v4387_v23, %v4386_v26  ;;  %4240 = vst [vmem:[%s5987_s29 + $0x40] sm:$0xff] %v4222_v6  ;;  %v4389_v7 = vsel %vm4355_vm6, %v4354_v34, 0.0  ;;  %v4410_v27 = vmul.f32 %v4354_v34, %v4354_v34 }
 0x4dc   : > { %v4442_v17 = vsel %vm4355_vm6, %v4409_v58, 0.0 }
 0x4dd   : > { %v4390_v25 = vadd.f32 %v4389_v7, %v4388_v10  ;;  %v4443_v13 = vadd.f32 %v4442_v17, %v4441_v39  ;;  %v4444_v38 = vsel %vm4355_vm6, %v4410_v27, 0.0 }
 0x4df   : > { %4391 = vadd.xlane.f32.xlu0 %v4390_v25  ;;  %v4445_v28 = vadd.f32 %v4444_v38, %v4443_v13 }
 0x4e1   : > { %4446 = vadd.xlane.f32.xlu1 %v4445_v28 }
 0x568   : > { %v4392_v35 = vpop.xlane.xlu0 %4391 }
 0x56a   : > { %v4447_v0 = vpop.xlane.xlu1 %4446 }
 0x56b   : > { %v4448_v19 = vsel %vm3388_vm4, %v4392_v35, %v4447_v0 }
 0x56c   : > { %4450 = vst.msk [vmem:[%s360_s18] sm:$0xf] %vm4449_vm7, %v4448_v19 }
 0x56d PF: > { %s20_s30 = sadd.s32 1, %s4906_s30  }
 0x56e   : > { %p17_p4 = scmp.ge.s32.totalorder %s20_s30, 4  }
 0x570   :  { %19 = sbr.rel (!%p17_p4) target bundleno = 1 (0x1), region = 97 }

</bundles_post_ra>
